<compile_context>
chip_gen: v6e
topology: v6e:2x2x1
jax: 0.10.0
libtpu: 0.0.40
codegen_flags: <defaults>
</compile_context>

<pallas_src>
import functools
import math

import jax
import jax.numpy as jnp
import numpy as np
from jax.experimental import pallas as pl
from jax.experimental.pallas import tpu as pltpu


def _gga_kernel(x_ref, wq_ref, wk_ref, wv_ref, wo_ref, bin_ref, bo_ref,
                out_ref, pooled_ref, *, num_heads, head_dim, groups_per_tile):
    # x_ref:      (groups_per_tile, group_size, C)   one tile of groups
    # w*_ref:     (C, C)   pre-transposed projection weights (scale folded in Wq)
    # bin_ref:    (3, C)   rows = (bq*scale, bk, bv)
    # bo_ref:     (1, C)   out-projection bias
    # out_ref:    (G, C)   resident output block (written on last grid step)
    # pooled_ref: (G, C)   f32 VMEM scratch, persists across the grid
    i = pl.program_id(0)

    # --- Stage 1: per-group max pool for this tile (sublane reduce). --------
    tile = x_ref[...].astype(jnp.float32)                     # (gpt, S, C)
    row0 = pl.multiple_of(i * groups_per_tile, groups_per_tile)
    pooled_ref[pl.ds(row0, groups_per_tile), :] = jnp.max(tile, axis=1)

    # --- Stage 2 (epilogue): multi-head self-attention over all G tokens. ---
    @pl.when(i == pl.num_programs(0) - 1)
    def _():
        pooled = pooled_ref[...]                              # (G, C) f32
        b = bin_ref[...]                                      # (3, C)
        q = jnp.dot(pooled, wq_ref[...],
                    preferred_element_type=jnp.float32) + b[0:1, :]
        k = jnp.dot(pooled, wk_ref[...],
                    preferred_element_type=jnp.float32) + b[1:2, :]
        v = jnp.dot(pooled, wv_ref[...],
                    preferred_element_type=jnp.float32) + b[2:3, :]

        # Initialize the accumulator with the out-projection bias (broadcast),
        # so the epilogue's final add disappears into the head accumulation.
        y = jnp.broadcast_to(bo_ref[...].astype(jnp.float32), pooled.shape)
        for h in range(num_heads):                            # static unrolled
            lo = h * head_dim
            qh = q[:, lo:lo + head_dim]                       # (G, dh)
            kh = k[:, lo:lo + head_dim]
            vh = v[:, lo:lo + head_dim]
            # scores = qh @ kh.T (contract last dims; no explicit transpose)
            s = jax.lax.dot_general(qh, kh, (((1,), (1,)), ((), ())),
                                    preferred_element_type=jnp.float32)
            s = s - jnp.max(s, axis=-1, keepdims=True)
            p = jnp.exp(s)
            p = p * pl.reciprocal(jnp.sum(p, axis=-1, keepdims=True),
                                  approx=False)
            oh = jnp.dot(p, vh, preferred_element_type=jnp.float32)   # (G, dh)
            # Accumulate out-projection per head: y += oh @ Wo.T[lo:hi, :]
            # (avoids a lane-axis concatenate of the heads).
            y = y + jnp.dot(oh, wo_ref[lo:lo + head_dim, :],
                            preferred_element_type=jnp.float32)
        out_ref[...] = y.astype(out_ref.dtype)


def group_global_attention(x, pe, in_proj_weight, in_proj_bias,
                           out_proj_weight, out_proj_bias, *,
                           num_heads, group_size, groups_per_tile=None):
    """Pallas implementation of GroupGlobalAttention.forward(x, pe)."""
    del pe  # unused by the original PyTorch forward
    n, c = x.shape
    assert n % group_size == 0, "torch .view(batch, group_size, -1) needs this"
    assert c % num_heads == 0
    g = n // group_size
    head_dim = c // num_heads
    scale = 1.0 / math.sqrt(head_dim)

    if groups_per_tile is None:
        # Big tiles amortize the ~0.35 us per-grid-step overhead; keep each
        # (double-buffered) x block under ~8 MiB of VMEM.
        bytes_per_group = group_size * c * x.dtype.itemsize
        groups_per_tile = max(1, min(g, (8 << 20) // max(1, bytes_per_group)))
    while g % groups_per_tile != 0:        # keep every block full (no ragged tail)
        groups_per_tile -= 1
    grid = (g // groups_per_tile,)

    # Pre-transpose the packed projection weights; fold the 1/sqrt(dh) scale
    # into Wq / bq so the kernel never multiplies by it.
    wq_t = in_proj_weight[:c].T * scale                  # (C, C)
    wk_t = in_proj_weight[c:2 * c].T                     # (C, C)
    wv_t = in_proj_weight[2 * c:].T                      # (C, C)
    wo_t = out_proj_weight.T                             # (C, C)
    b_in = jnp.stack([in_proj_bias[:c] * scale,
                      in_proj_bias[c:2 * c],
                      in_proj_bias[2 * c:]], axis=0)     # (3, C)
    b_out = out_proj_bias[None, :]                       # (1, C)

    x_grouped = x.reshape(g, group_size, c)              # free view in XLA

    kernel = functools.partial(_gga_kernel, num_heads=num_heads,
                               head_dim=head_dim,
                               groups_per_tile=groups_per_tile)

    # NOTE: for extremely large G the epilogue's (G, G) score tile would itself
    # need tiling; typical flatformer group counts fit comfortably in VMEM.
    out = pl.pallas_call(
        kernel,
        out_shape=jax.ShapeDtypeStruct((g, c), x.dtype),
        grid_spec=pltpu.PrefetchScalarGridSpec(
            num_scalar_prefetch=0,
            grid=grid,
            in_specs=[
                pl.BlockSpec((groups_per_tile, group_size, c),
                             lambda i: (i, 0, 0)),
                pl.BlockSpec((c, c), lambda i: (0, 0)),   # Wq.T * scale
                pl.BlockSpec((c, c), lambda i: (0, 0)),   # Wk.T
                pl.BlockSpec((c, c), lambda i: (0, 0)),   # Wv.T
                pl.BlockSpec((c, c), lambda i: (0, 0)),   # Wo.T
                pl.BlockSpec((3, c), lambda i: (0, 0)),   # biases (q,k,v)
                pl.BlockSpec((1, c), lambda i: (0, 0)),   # out bias
            ],
            out_specs=pl.BlockSpec((g, c), lambda i: (0, 0)),
            scratch_shapes=[pltpu.VMEM((g, c), jnp.float32)],
        ),
        compiler_params=pltpu.CompilerParams(
            dimension_semantics=("arbitrary",)),          # resident output acc
    )(x_grouped, wq_t, wk_t, wv_t, wo_t, b_in, b_out)
    return out


def ref_group_global_attention(x, in_proj_weight, in_proj_bias,
                               out_proj_weight, out_proj_bias, *,
                               num_heads, group_size):
    """Plain-JAX port of the PyTorch forward (ground truth)."""
    n, c = x.shape
    g = n // group_size
    head_dim = c // num_heads
    scale = 1.0 / math.sqrt(head_dim)
    with jax.default_matmul_precision("highest"):
        pooled = jnp.max(x.reshape(g, group_size, c), axis=1)
        wq, wk, wv = (in_proj_weight[:c], in_proj_weight[c:2 * c],
                      in_proj_weight[2 * c:])
        bq, bk, bv = (in_proj_bias[:c], in_proj_bias[c:2 * c],
                      in_proj_bias[2 * c:])
        q = (pooled @ wq.T + bq) * scale
        k = pooled @ wk.T + bk
        v = pooled @ wv.T + bv
        qh = q.reshape(g, num_heads, head_dim).transpose(1, 0, 2)
        kh = k.reshape(g, num_heads, head_dim).transpose(1, 0, 2)
        vh = v.reshape(g, num_heads, head_dim).transpose(1, 0, 2)
        s = jnp.einsum("hqd,hkd->hqk", qh, kh)
        p = jax.nn.softmax(s, axis=-1)
        o = jnp.einsum("hqk,hkd->hqd", p, vh)
        o = o.transpose(1, 0, 2).reshape(g, c)
        return o @ out_proj_weight.T + out_proj_bias


if __name__ == "__main__":
    in_channels = 128          # lane-dense feature width (flatformer default)
    num_heads = 8
    group_size = 8
    n_points = 512             # N divisible by group_size -> G = 64 groups

    key = jax.random.PRNGKey(0)
    kx, kw1, kb1, kw2, kb2 = jax.random.split(key, 5)
    x = jax.random.normal(kx, (n_points, in_channels), dtype=jnp.float32)
    pe = jnp.zeros_like(x)     # unused by the forward, kept for interface parity

    bound = 1.0 / np.sqrt(in_channels)
    in_proj_weight = jax.random.uniform(
        kw1, (3 * in_channels, in_channels), minval=-bound, maxval=bound,
        dtype=jnp.float32)
    in_proj_bias = jax.random.uniform(
        kb1, (3 * in_channels,), minval=-bound, maxval=bound, dtype=jnp.float32)
    out_proj_weight = jax.random.uniform(
        kw2, (in_channels, in_channels), minval=-bound, maxval=bound,
        dtype=jnp.float32)
    out_proj_bias = jax.random.uniform(
        kb2, (in_channels,), minval=-bound, maxval=bound, dtype=jnp.float32)

    out = group_global_attention(
        x, pe, in_proj_weight, in_proj_bias, out_proj_weight, out_proj_bias,
        num_heads=num_heads, group_size=group_size,
        groups_per_tile=16)    # grid=(4,) to exercise the pipelined pool stage
    out = jax.block_until_ready(out)

    ref = ref_group_global_attention(
        x, in_proj_weight, in_proj_bias, out_proj_weight, out_proj_bias,
        num_heads=num_heads, group_size=group_size)

    assert out.shape == (n_points // group_size, in_channels), out.shape
    np.testing.assert_allclose(np.asarray(out), np.asarray(ref),
                               rtol=1e-3, atol=1e-3)
    print("KERNEL_OK")
</pallas_src>

<mosaic_0001>
module attributes {stable_mosaic.version = 11 : i64} {
  func.func @_gga_kernel(%arg0: i32, %arg1: memref<16x8x128xf32, #tpu.memory_space<vmem>>, %arg2: memref<128x128xf32, #tpu.memory_space<vmem>>, %arg3: memref<128x128xf32, #tpu.memory_space<vmem>>, %arg4: memref<128x128xf32, #tpu.memory_space<vmem>>, %arg5: memref<128x128xf32, #tpu.memory_space<vmem>>, %arg6: memref<3x128xf32, #tpu.memory_space<vmem>>, %arg7: memref<1x128xf32, #tpu.memory_space<vmem>>, %arg8: memref<64x128xf32, #tpu.memory_space<vmem>>, %arg9: memref<64x128xf32, #tpu.memory_space<vmem>>) attributes {dimension_semantics = [#tpu.dimension_semantics<arbitrary>], iteration_bounds = array<i64: 4>, scalar_prefetch = 0 : i64, scratch_operands = 1 : i64, tpu.core_type = #tpu.core_type<tc>, window_params = [{transform_indices = @transform_0, window_bounds = array<i64: 16, 8, 128>}, {pipeline_mode = #tpu.pipeline_mode<synchronous>, transform_indices = @transform_1, window_bounds = array<i64: 128, 128>}, {pipeline_mode = #tpu.pipeline_mode<synchronous>, transform_indices = @transform_2, window_bounds = array<i64: 128, 128>}, {pipeline_mode = #tpu.pipeline_mode<synchronous>, transform_indices = @transform_3, window_bounds = array<i64: 128, 128>}, {pipeline_mode = #tpu.pipeline_mode<synchronous>, transform_indices = @transform_4, window_bounds = array<i64: 128, 128>}, {pipeline_mode = #tpu.pipeline_mode<synchronous>, transform_indices = @transform_5, window_bounds = array<i64: 3, 128>}, {pipeline_mode = #tpu.pipeline_mode<synchronous>, transform_indices = @transform_6, window_bounds = array<i64: 1, 128>}, {pipeline_mode = #tpu.pipeline_mode<synchronous>, transform_indices = @transform_7, window_bounds = array<i64: 64, 128>}]} {
    %c0 = arith.constant 0 : index
    %c0_0 = arith.constant 0 : index
    %c0_1 = arith.constant 0 : index
    %0 = vector.load %arg1[%c0, %c0_0, %c0_1] : memref<16x8x128xf32, #tpu.memory_space<vmem>>, vector<16x8x128xf32>
    %c16_i32 = arith.constant 16 : i32
    %1 = arith.muli %arg0, %c16_i32 : i32
    %2 = tpu.assume_multiple %1, 16 : i32
    %cst = arith.constant dense<0xFF800000> : vector<16x128xf32>
    %3 = vector.multi_reduction <maximumf>, %0, %cst [1] : vector<16x8x128xf32> to vector<16x128xf32>
    %4 = arith.index_cast %2 : i32 to index
    %c0_2 = arith.constant 0 : index
    %5 = vector.load %arg9[%4, %c0_2] : memref<64x128xf32, #tpu.memory_space<vmem>>, vector<16x128xf32>
    tpu.vector_store %arg9[%4, %c0_2], %3 {strides = array<i32>} : memref<64x128xf32, #tpu.memory_space<vmem>>, vector<16x128xf32>,
    %c3_i32 = arith.constant 3 : i32
    %6 = arith.cmpi eq, %arg0, %c3_i32 : i32
    %7 = arith.extui %6 : i1 to i32
    %c0_i32 = arith.constant 0 : i32
    %8 = arith.cmpi ne, %7, %c0_i32 : i32
    scf.if %8 {
      %c0_3 = arith.constant 0 : index
      %c0_4 = arith.constant 0 : index
      %9 = vector.load %arg9[%c0_3, %c0_4] : memref<64x128xf32, #tpu.memory_space<vmem>>, vector<64x128xf32>
      %c0_5 = arith.constant 0 : index
      %c0_6 = arith.constant 0 : index
      %10 = vector.load %arg6[%c0_5, %c0_6] : memref<3x128xf32, #tpu.memory_space<vmem>>, vector<3x128xf32>
      %c0_7 = arith.constant 0 : index
      %c0_8 = arith.constant 0 : index
      %11 = vector.load %arg2[%c0_7, %c0_8] : memref<128x128xf32, #tpu.memory_space<vmem>>, vector<128x128xf32>
      %cst_9 = arith.constant dense<0.000000e+00> : vector<64x128xf32>
      %12 = tpu.matmul %9, %11, %cst_9 {dimension_numbers = #tpu.dot_dimension_numbers<[1], [0], [0], [1], [0, 0, 1, 1], [], []>} : vector<64x128xf32>, vector<128x128xf32>, vector<64x128xf32> -> vector<64x128xf32>
      %13 = vector.extract_strided_slice %10 {offsets = [0, 0], sizes = [1, 128], strides = [1, 1]} : vector<3x128xf32> to vector<1x128xf32>
      %14 = vector.broadcast %13 : vector<1x128xf32> to vector<64x128xf32>
      %15 = arith.addf %12, %14 : vector<64x128xf32>
      %c0_10 = arith.constant 0 : index
      %c0_11 = arith.constant 0 : index
      %16 = vector.load %arg3[%c0_10, %c0_11] : memref<128x128xf32, #tpu.memory_space<vmem>>, vector<128x128xf32>
      %cst_12 = arith.constant dense<0.000000e+00> : vector<64x128xf32>
      %17 = tpu.matmul %9, %16, %cst_12 {dimension_numbers = #tpu.dot_dimension_numbers<[1], [0], [0], [1], [0, 0, 1, 1], [], []>} : vector<64x128xf32>, vector<128x128xf32>, vector<64x128xf32> -> vector<64x128xf32>
      %18 = vector.extract_strided_slice %10 {offsets = [1, 0], sizes = [1, 128], strides = [1, 1]} : vector<3x128xf32> to vector<1x128xf32>
      %19 = vector.broadcast %18 : vector<1x128xf32> to vector<64x128xf32>
      %20 = arith.addf %17, %19 : vector<64x128xf32>
      %c0_13 = arith.constant 0 : index
      %c0_14 = arith.constant 0 : index
      %21 = vector.load %arg4[%c0_13, %c0_14] : memref<128x128xf32, #tpu.memory_space<vmem>>, vector<128x128xf32>
      %cst_15 = arith.constant dense<0.000000e+00> : vector<64x128xf32>
      %22 = tpu.matmul %9, %21, %cst_15 {dimension_numbers = #tpu.dot_dimension_numbers<[1], [0], [0], [1], [0, 0, 1, 1], [], []>} : vector<64x128xf32>, vector<128x128xf32>, vector<64x128xf32> -> vector<64x128xf32>
      %23 = vector.extract_strided_slice %10 {offsets = [2, 0], sizes = [1, 128], strides = [1, 1]} : vector<3x128xf32> to vector<1x128xf32>
      %24 = vector.broadcast %23 : vector<1x128xf32> to vector<64x128xf32>
      %25 = arith.addf %22, %24 : vector<64x128xf32>
      %c0_16 = arith.constant 0 : index
      %c0_17 = arith.constant 0 : index
      %26 = vector.load %arg7[%c0_16, %c0_17] : memref<1x128xf32, #tpu.memory_space<vmem>>, vector<1x128xf32>
      %27 = vector.shape_cast %26 : vector<1x128xf32> to vector<1x128xf32>
      %28 = vector.broadcast %27 : vector<1x128xf32> to vector<64x128xf32>
      %29 = vector.extract_strided_slice %15 {offsets = [0, 0], sizes = [64, 16], strides = [1, 1]} : vector<64x128xf32> to vector<64x16xf32>
      %30 = vector.extract_strided_slice %20 {offsets = [0, 0], sizes = [64, 16], strides = [1, 1]} : vector<64x128xf32> to vector<64x16xf32>
      %31 = vector.extract_strided_slice %25 {offsets = [0, 0], sizes = [64, 16], strides = [1, 1]} : vector<64x128xf32> to vector<64x16xf32>
      %cst_18 = arith.constant dense<0.000000e+00> : vector<64x64xf32>
      %32 = tpu.matmul %29, %30, %cst_18 {dimension_numbers = #tpu.dot_dimension_numbers<[1], [1], [0], [0], [0, 0, 1, 0], [], []>} : vector<64x16xf32>, vector<64x16xf32>, vector<64x64xf32> -> vector<64x64xf32>
      %cst_19 = arith.constant dense<0xFF800000> : vector<64xf32>
      %33 = vector.multi_reduction <maximumf>, %32, %cst_19 [1] : vector<64x64xf32> to vector<64xf32>
      %34 = vector.shape_cast %33 : vector<64xf32> to vector<64x1xf32>
      %35 = vector.broadcast %34 : vector<64x1xf32> to vector<64x64xf32>
      %36 = arith.subf %32, %35 : vector<64x64xf32>
      %37 = math.exp %36 : vector<64x64xf32>
      %cst_20 = arith.constant dense<0.000000e+00> : vector<64xf32>
      %38 = vector.multi_reduction <add>, %37, %cst_20 [1] : vector<64x64xf32> to vector<64xf32>
      %39 = vector.shape_cast %38 : vector<64xf32> to vector<64x1xf32>
      %40 = tpu.reciprocal %39 : vector<64x1xf32> -> vector<64x1xf32>
      %41 = vector.broadcast %40 : vector<64x1xf32> to vector<64x64xf32>
      %42 = arith.mulf %37, %41 : vector<64x64xf32>
      %cst_21 = arith.constant dense<0.000000e+00> : vector<64x16xf32>
      %43 = tpu.matmul %42, %31, %cst_21 {dimension_numbers = #tpu.dot_dimension_numbers<[1], [0], [0], [1], [0, 0, 1, 1], [], []>} : vector<64x64xf32>, vector<64x16xf32>, vector<64x16xf32> -> vector<64x16xf32>
      %c0_22 = arith.constant 0 : index
      %c0_23 = arith.constant 0 : index
      %44 = vector.load %arg5[%c0_22, %c0_23] : memref<128x128xf32, #tpu.memory_space<vmem>>, vector<16x128xf32>
      %cst_24 = arith.constant dense<0.000000e+00> : vector<64x128xf32>
      %45 = tpu.matmul %43, %44, %cst_24 {dimension_numbers = #tpu.dot_dimension_numbers<[1], [0], [0], [1], [0, 0, 1, 1], [], []>} : vector<64x16xf32>, vector<16x128xf32>, vector<64x128xf32> -> vector<64x128xf32>
      %46 = arith.addf %28, %45 : vector<64x128xf32>
      %47 = vector.extract_strided_slice %15 {offsets = [0, 16], sizes = [64, 16], strides = [1, 1]} : vector<64x128xf32> to vector<64x16xf32>
      %48 = vector.extract_strided_slice %20 {offsets = [0, 16], sizes = [64, 16], strides = [1, 1]} : vector<64x128xf32> to vector<64x16xf32>
      %49 = vector.extract_strided_slice %25 {offsets = [0, 16], sizes = [64, 16], strides = [1, 1]} : vector<64x128xf32> to vector<64x16xf32>
      %cst_25 = arith.constant dense<0.000000e+00> : vector<64x64xf32>
      %50 = tpu.matmul %47, %48, %cst_25 {dimension_numbers = #tpu.dot_dimension_numbers<[1], [1], [0], [0], [0, 0, 1, 0], [], []>} : vector<64x16xf32>, vector<64x16xf32>, vector<64x64xf32> -> vector<64x64xf32>
      %cst_26 = arith.constant dense<0xFF800000> : vector<64xf32>
      %51 = vector.multi_reduction <maximumf>, %50, %cst_26 [1] : vector<64x64xf32> to vector<64xf32>
      %52 = vector.shape_cast %51 : vector<64xf32> to vector<64x1xf32>
      %53 = vector.broadcast %52 : vector<64x1xf32> to vector<64x64xf32>
      %54 = arith.subf %50, %53 : vector<64x64xf32>
      %55 = math.exp %54 : vector<64x64xf32>
      %cst_27 = arith.constant dense<0.000000e+00> : vector<64xf32>
      %56 = vector.multi_reduction <add>, %55, %cst_27 [1] : vector<64x64xf32> to vector<64xf32>
      %57 = vector.shape_cast %56 : vector<64xf32> to vector<64x1xf32>
      %58 = tpu.reciprocal %57 : vector<64x1xf32> -> vector<64x1xf32>
      %59 = vector.broadcast %58 : vector<64x1xf32> to vector<64x64xf32>
      %60 = arith.mulf %55, %59 : vector<64x64xf32>
      %cst_28 = arith.constant dense<0.000000e+00> : vector<64x16xf32>
      %61 = tpu.matmul %60, %49, %cst_28 {dimension_numbers = #tpu.dot_dimension_numbers<[1], [0], [0], [1], [0, 0, 1, 1], [], []>} : vector<64x64xf32>, vector<64x16xf32>, vector<64x16xf32> -> vector<64x16xf32>
      %c16 = arith.constant 16 : index
      %c0_29 = arith.constant 0 : index
      %62 = vector.load %arg5[%c16, %c0_29] : memref<128x128xf32, #tpu.memory_space<vmem>>, vector<16x128xf32>
      %cst_30 = arith.constant dense<0.000000e+00> : vector<64x128xf32>
      %63 = tpu.matmul %61, %62, %cst_30 {dimension_numbers = #tpu.dot_dimension_numbers<[1], [0], [0], [1], [0, 0, 1, 1], [], []>} : vector<64x16xf32>, vector<16x128xf32>, vector<64x128xf32> -> vector<64x128xf32>
      %64 = arith.addf %46, %63 : vector<64x128xf32>
      %65 = vector.extract_strided_slice %15 {offsets = [0, 32], sizes = [64, 16], strides = [1, 1]} : vector<64x128xf32> to vector<64x16xf32>
      %66 = vector.extract_strided_slice %20 {offsets = [0, 32], sizes = [64, 16], strides = [1, 1]} : vector<64x128xf32> to vector<64x16xf32>
      %67 = vector.extract_strided_slice %25 {offsets = [0, 32], sizes = [64, 16], strides = [1, 1]} : vector<64x128xf32> to vector<64x16xf32>
      %cst_31 = arith.constant dense<0.000000e+00> : vector<64x64xf32>
      %68 = tpu.matmul %65, %66, %cst_31 {dimension_numbers = #tpu.dot_dimension_numbers<[1], [1], [0], [0], [0, 0, 1, 0], [], []>} : vector<64x16xf32>, vector<64x16xf32>, vector<64x64xf32> -> vector<64x64xf32>
      %cst_32 = arith.constant dense<0xFF800000> : vector<64xf32>
      %69 = vector.multi_reduction <maximumf>, %68, %cst_32 [1] : vector<64x64xf32> to vector<64xf32>
      %70 = vector.shape_cast %69 : vector<64xf32> to vector<64x1xf32>
      %71 = vector.broadcast %70 : vector<64x1xf32> to vector<64x64xf32>
      %72 = arith.subf %68, %71 : vector<64x64xf32>
      %73 = math.exp %72 : vector<64x64xf32>
      %cst_33 = arith.constant dense<0.000000e+00> : vector<64xf32>
      %74 = vector.multi_reduction <add>, %73, %cst_33 [1] : vector<64x64xf32> to vector<64xf32>
      %75 = vector.shape_cast %74 : vector<64xf32> to vector<64x1xf32>
      %76 = tpu.reciprocal %75 : vector<64x1xf32> -> vector<64x1xf32>
      %77 = vector.broadcast %76 : vector<64x1xf32> to vector<64x64xf32>
      %78 = arith.mulf %73, %77 : vector<64x64xf32>
      %cst_34 = arith.constant dense<0.000000e+00> : vector<64x16xf32>
      %79 = tpu.matmul %78, %67, %cst_34 {dimension_numbers = #tpu.dot_dimension_numbers<[1], [0], [0], [1], [0, 0, 1, 1], [], []>} : vector<64x64xf32>, vector<64x16xf32>, vector<64x16xf32> -> vector<64x16xf32>
      %c32 = arith.constant 32 : index
      %c0_35 = arith.constant 0 : index
      %80 = vector.load %arg5[%c32, %c0_35] : memref<128x128xf32, #tpu.memory_space<vmem>>, vector<16x128xf32>
      %cst_36 = arith.constant dense<0.000000e+00> : vector<64x128xf32>
      %81 = tpu.matmul %79, %80, %cst_36 {dimension_numbers = #tpu.dot_dimension_numbers<[1], [0], [0], [1], [0, 0, 1, 1], [], []>} : vector<64x16xf32>, vector<16x128xf32>, vector<64x128xf32> -> vector<64x128xf32>
      %82 = arith.addf %64, %81 : vector<64x128xf32>
      %83 = vector.extract_strided_slice %15 {offsets = [0, 48], sizes = [64, 16], strides = [1, 1]} : vector<64x128xf32> to vector<64x16xf32>
      %84 = vector.extract_strided_slice %20 {offsets = [0, 48], sizes = [64, 16], strides = [1, 1]} : vector<64x128xf32> to vector<64x16xf32>
      %85 = vector.extract_strided_slice %25 {offsets = [0, 48], sizes = [64, 16], strides = [1, 1]} : vector<64x128xf32> to vector<64x16xf32>
      %cst_37 = arith.constant dense<0.000000e+00> : vector<64x64xf32>
      %86 = tpu.matmul %83, %84, %cst_37 {dimension_numbers = #tpu.dot_dimension_numbers<[1], [1], [0], [0], [0, 0, 1, 0], [], []>} : vector<64x16xf32>, vector<64x16xf32>, vector<64x64xf32> -> vector<64x64xf32>
      %cst_38 = arith.constant dense<0xFF800000> : vector<64xf32>
      %87 = vector.multi_reduction <maximumf>, %86, %cst_38 [1] : vector<64x64xf32> to vector<64xf32>
      %88 = vector.shape_cast %87 : vector<64xf32> to vector<64x1xf32>
      %89 = vector.broadcast %88 : vector<64x1xf32> to vector<64x64xf32>
      %90 = arith.subf %86, %89 : vector<64x64xf32>
      %91 = math.exp %90 : vector<64x64xf32>
      %cst_39 = arith.constant dense<0.000000e+00> : vector<64xf32>
      %92 = vector.multi_reduction <add>, %91, %cst_39 [1] : vector<64x64xf32> to vector<64xf32>
      %93 = vector.shape_cast %92 : vector<64xf32> to vector<64x1xf32>
      %94 = tpu.reciprocal %93 : vector<64x1xf32> -> vector<64x1xf32>
      %95 = vector.broadcast %94 : vector<64x1xf32> to vector<64x64xf32>
      %96 = arith.mulf %91, %95 : vector<64x64xf32>
      %cst_40 = arith.constant dense<0.000000e+00> : vector<64x16xf32>
      %97 = tpu.matmul %96, %85, %cst_40 {dimension_numbers = #tpu.dot_dimension_numbers<[1], [0], [0], [1], [0, 0, 1, 1], [], []>} : vector<64x64xf32>, vector<64x16xf32>, vector<64x16xf32> -> vector<64x16xf32>
      %c48 = arith.constant 48 : index
      %c0_41 = arith.constant 0 : index
      %98 = vector.load %arg5[%c48, %c0_41] : memref<128x128xf32, #tpu.memory_space<vmem>>, vector<16x128xf32>
      %cst_42 = arith.constant dense<0.000000e+00> : vector<64x128xf32>
      %99 = tpu.matmul %97, %98, %cst_42 {dimension_numbers = #tpu.dot_dimension_numbers<[1], [0], [0], [1], [0, 0, 1, 1], [], []>} : vector<64x16xf32>, vector<16x128xf32>, vector<64x128xf32> -> vector<64x128xf32>
      %100 = arith.addf %82, %99 : vector<64x128xf32>
      %101 = vector.extract_strided_slice %15 {offsets = [0, 64], sizes = [64, 16], strides = [1, 1]} : vector<64x128xf32> to vector<64x16xf32>
      %102 = vector.extract_strided_slice %20 {offsets = [0, 64], sizes = [64, 16], strides = [1, 1]} : vector<64x128xf32> to vector<64x16xf32>
      %103 = vector.extract_strided_slice %25 {offsets = [0, 64], sizes = [64, 16], strides = [1, 1]} : vector<64x128xf32> to vector<64x16xf32>
      %cst_43 = arith.constant dense<0.000000e+00> : vector<64x64xf32>
      %104 = tpu.matmul %101, %102, %cst_43 {dimension_numbers = #tpu.dot_dimension_numbers<[1], [1], [0], [0], [0, 0, 1, 0], [], []>} : vector<64x16xf32>, vector<64x16xf32>, vector<64x64xf32> -> vector<64x64xf32>
      %cst_44 = arith.constant dense<0xFF800000> : vector<64xf32>
      %105 = vector.multi_reduction <maximumf>, %104, %cst_44 [1] : vector<64x64xf32> to vector<64xf32>
      %106 = vector.shape_cast %105 : vector<64xf32> to vector<64x1xf32>
      %107 = vector.broadcast %106 : vector<64x1xf32> to vector<64x64xf32>
      %108 = arith.subf %104, %107 : vector<64x64xf32>
      %109 = math.exp %108 : vector<64x64xf32>
      %cst_45 = arith.constant dense<0.000000e+00> : vector<64xf32>
      %110 = vector.multi_reduction <add>, %109, %cst_45 [1] : vector<64x64xf32> to vector<64xf32>
      %111 = vector.shape_cast %110 : vector<64xf32> to vector<64x1xf32>
      %112 = tpu.reciprocal %111 : vector<64x1xf32> -> vector<64x1xf32>
      %113 = vector.broadcast %112 : vector<64x1xf32> to vector<64x64xf32>
      %114 = arith.mulf %109, %113 : vector<64x64xf32>
      %cst_46 = arith.constant dense<0.000000e+00> : vector<64x16xf32>
      %115 = tpu.matmul %114, %103, %cst_46 {dimension_numbers = #tpu.dot_dimension_numbers<[1], [0], [0], [1], [0, 0, 1, 1], [], []>} : vector<64x64xf32>, vector<64x16xf32>, vector<64x16xf32> -> vector<64x16xf32>
      %c64 = arith.constant 64 : index
      %c0_47 = arith.constant 0 : index
      %116 = vector.load %arg5[%c64, %c0_47] : memref<128x128xf32, #tpu.memory_space<vmem>>, vector<16x128xf32>
      %cst_48 = arith.constant dense<0.000000e+00> : vector<64x128xf32>
      %117 = tpu.matmul %115, %116, %cst_48 {dimension_numbers = #tpu.dot_dimension_numbers<[1], [0], [0], [1], [0, 0, 1, 1], [], []>} : vector<64x16xf32>, vector<16x128xf32>, vector<64x128xf32> -> vector<64x128xf32>
      %118 = arith.addf %100, %117 : vector<64x128xf32>
      %119 = vector.extract_strided_slice %15 {offsets = [0, 80], sizes = [64, 16], strides = [1, 1]} : vector<64x128xf32> to vector<64x16xf32>
      %120 = vector.extract_strided_slice %20 {offsets = [0, 80], sizes = [64, 16], strides = [1, 1]} : vector<64x128xf32> to vector<64x16xf32>
      %121 = vector.extract_strided_slice %25 {offsets = [0, 80], sizes = [64, 16], strides = [1, 1]} : vector<64x128xf32> to vector<64x16xf32>
      %cst_49 = arith.constant dense<0.000000e+00> : vector<64x64xf32>
      %122 = tpu.matmul %119, %120, %cst_49 {dimension_numbers = #tpu.dot_dimension_numbers<[1], [1], [0], [0], [0, 0, 1, 0], [], []>} : vector<64x16xf32>, vector<64x16xf32>, vector<64x64xf32> -> vector<64x64xf32>
      %cst_50 = arith.constant dense<0xFF800000> : vector<64xf32>
      %123 = vector.multi_reduction <maximumf>, %122, %cst_50 [1] : vector<64x64xf32> to vector<64xf32>
      %124 = vector.shape_cast %123 : vector<64xf32> to vector<64x1xf32>
      %125 = vector.broadcast %124 : vector<64x1xf32> to vector<64x64xf32>
      %126 = arith.subf %122, %125 : vector<64x64xf32>
      %127 = math.exp %126 : vector<64x64xf32>
      %cst_51 = arith.constant dense<0.000000e+00> : vector<64xf32>
      %128 = vector.multi_reduction <add>, %127, %cst_51 [1] : vector<64x64xf32> to vector<64xf32>
      %129 = vector.shape_cast %128 : vector<64xf32> to vector<64x1xf32>
      %130 = tpu.reciprocal %129 : vector<64x1xf32> -> vector<64x1xf32>
      %131 = vector.broadcast %130 : vector<64x1xf32> to vector<64x64xf32>
      %132 = arith.mulf %127, %131 : vector<64x64xf32>
      %cst_52 = arith.constant dense<0.000000e+00> : vector<64x16xf32>
      %133 = tpu.matmul %132, %121, %cst_52 {dimension_numbers = #tpu.dot_dimension_numbers<[1], [0], [0], [1], [0, 0, 1, 1], [], []>} : vector<64x64xf32>, vector<64x16xf32>, vector<64x16xf32> -> vector<64x16xf32>
      %c80 = arith.constant 80 : index
      %c0_53 = arith.constant 0 : index
      %134 = vector.load %arg5[%c80, %c0_53] : memref<128x128xf32, #tpu.memory_space<vmem>>, vector<16x128xf32>
      %cst_54 = arith.constant dense<0.000000e+00> : vector<64x128xf32>
      %135 = tpu.matmul %133, %134, %cst_54 {dimension_numbers = #tpu.dot_dimension_numbers<[1], [0], [0], [1], [0, 0, 1, 1], [], []>} : vector<64x16xf32>, vector<16x128xf32>, vector<64x128xf32> -> vector<64x128xf32>
      %136 = arith.addf %118, %135 : vector<64x128xf32>
      %137 = vector.extract_strided_slice %15 {offsets = [0, 96], sizes = [64, 16], strides = [1, 1]} : vector<64x128xf32> to vector<64x16xf32>
      %138 = vector.extract_strided_slice %20 {offsets = [0, 96], sizes = [64, 16], strides = [1, 1]} : vector<64x128xf32> to vector<64x16xf32>
      %139 = vector.extract_strided_slice %25 {offsets = [0, 96], sizes = [64, 16], strides = [1, 1]} : vector<64x128xf32> to vector<64x16xf32>
      %cst_55 = arith.constant dense<0.000000e+00> : vector<64x64xf32>
      %140 = tpu.matmul %137, %138, %cst_55 {dimension_numbers = #tpu.dot_dimension_numbers<[1], [1], [0], [0], [0, 0, 1, 0], [], []>} : vector<64x16xf32>, vector<64x16xf32>, vector<64x64xf32> -> vector<64x64xf32>
      %cst_56 = arith.constant dense<0xFF800000> : vector<64xf32>
      %141 = vector.multi_reduction <maximumf>, %140, %cst_56 [1] : vector<64x64xf32> to vector<64xf32>
      %142 = vector.shape_cast %141 : vector<64xf32> to vector<64x1xf32>
      %143 = vector.broadcast %142 : vector<64x1xf32> to vector<64x64xf32>
      %144 = arith.subf %140, %143 : vector<64x64xf32>
      %145 = math.exp %144 : vector<64x64xf32>
      %cst_57 = arith.constant dense<0.000000e+00> : vector<64xf32>
      %146 = vector.multi_reduction <add>, %145, %cst_57 [1] : vector<64x64xf32> to vector<64xf32>
      %147 = vector.shape_cast %146 : vector<64xf32> to vector<64x1xf32>
      %148 = tpu.reciprocal %147 : vector<64x1xf32> -> vector<64x1xf32>
      %149 = vector.broadcast %148 : vector<64x1xf32> to vector<64x64xf32>
      %150 = arith.mulf %145, %149 : vector<64x64xf32>
      %cst_58 = arith.constant dense<0.000000e+00> : vector<64x16xf32>
      %151 = tpu.matmul %150, %139, %cst_58 {dimension_numbers = #tpu.dot_dimension_numbers<[1], [0], [0], [1], [0, 0, 1, 1], [], []>} : vector<64x64xf32>, vector<64x16xf32>, vector<64x16xf32> -> vector<64x16xf32>
      %c96 = arith.constant 96 : index
      %c0_59 = arith.constant 0 : index
      %152 = vector.load %arg5[%c96, %c0_59] : memref<128x128xf32, #tpu.memory_space<vmem>>, vector<16x128xf32>
      %cst_60 = arith.constant dense<0.000000e+00> : vector<64x128xf32>
      %153 = tpu.matmul %151, %152, %cst_60 {dimension_numbers = #tpu.dot_dimension_numbers<[1], [0], [0], [1], [0, 0, 1, 1], [], []>} : vector<64x16xf32>, vector<16x128xf32>, vector<64x128xf32> -> vector<64x128xf32>
      %154 = arith.addf %136, %153 : vector<64x128xf32>
      %155 = vector.extract_strided_slice %15 {offsets = [0, 112], sizes = [64, 16], strides = [1, 1]} : vector<64x128xf32> to vector<64x16xf32>
      %156 = vector.extract_strided_slice %20 {offsets = [0, 112], sizes = [64, 16], strides = [1, 1]} : vector<64x128xf32> to vector<64x16xf32>
      %157 = vector.extract_strided_slice %25 {offsets = [0, 112], sizes = [64, 16], strides = [1, 1]} : vector<64x128xf32> to vector<64x16xf32>
      %cst_61 = arith.constant dense<0.000000e+00> : vector<64x64xf32>
      %158 = tpu.matmul %155, %156, %cst_61 {dimension_numbers = #tpu.dot_dimension_numbers<[1], [1], [0], [0], [0, 0, 1, 0], [], []>} : vector<64x16xf32>, vector<64x16xf32>, vector<64x64xf32> -> vector<64x64xf32>
      %cst_62 = arith.constant dense<0xFF800000> : vector<64xf32>
      %159 = vector.multi_reduction <maximumf>, %158, %cst_62 [1] : vector<64x64xf32> to vector<64xf32>
      %160 = vector.shape_cast %159 : vector<64xf32> to vector<64x1xf32>
      %161 = vector.broadcast %160 : vector<64x1xf32> to vector<64x64xf32>
      %162 = arith.subf %158, %161 : vector<64x64xf32>
      %163 = math.exp %162 : vector<64x64xf32>
      %cst_63 = arith.constant dense<0.000000e+00> : vector<64xf32>
      %164 = vector.multi_reduction <add>, %163, %cst_63 [1] : vector<64x64xf32> to vector<64xf32>
      %165 = vector.shape_cast %164 : vector<64xf32> to vector<64x1xf32>
      %166 = tpu.reciprocal %165 : vector<64x1xf32> -> vector<64x1xf32>
      %167 = vector.broadcast %166 : vector<64x1xf32> to vector<64x64xf32>
      %168 = arith.mulf %163, %167 : vector<64x64xf32>
      %cst_64 = arith.constant dense<0.000000e+00> : vector<64x16xf32>
      %169 = tpu.matmul %168, %157, %cst_64 {dimension_numbers = #tpu.dot_dimension_numbers<[1], [0], [0], [1], [0, 0, 1, 1], [], []>} : vector<64x64xf32>, vector<64x16xf32>, vector<64x16xf32> -> vector<64x16xf32>
      %c112 = arith.constant 112 : index
      %c0_65 = arith.constant 0 : index
      %170 = vector.load %arg5[%c112, %c0_65] : memref<128x128xf32, #tpu.memory_space<vmem>>, vector<16x128xf32>
      %cst_66 = arith.constant dense<0.000000e+00> : vector<64x128xf32>
      %171 = tpu.matmul %169, %170, %cst_66 {dimension_numbers = #tpu.dot_dimension_numbers<[1], [0], [0], [1], [0, 0, 1, 1], [], []>} : vector<64x16xf32>, vector<16x128xf32>, vector<64x128xf32> -> vector<64x128xf32>
      %172 = arith.addf %154, %171 : vector<64x128xf32>
      %c0_67 = arith.constant 0 : index
      %c0_68 = arith.constant 0 : index
      %173 = vector.load %arg8[%c0_67, %c0_68] : memref<64x128xf32, #tpu.memory_space<vmem>>, vector<64x128xf32>
      tpu.vector_store %arg8[%c0_67, %c0_68], %172 {strides = array<i32>} : memref<64x128xf32, #tpu.memory_space<vmem>>, vector<64x128xf32>,
    } else {
    }
    return
  }
  func.func @transform_0(%arg0: i32) -> (i32, i32, i32) {
    %c0_i32 = arith.constant 0 : i32
    %c0_i32_0 = arith.constant 0 : i32
    %c0_i32_1 = arith.constant 0 : i32
    return %arg0, %c0_i32, %c0_i32_0 : i32, i32, i32
  }
  func.func @transform_1(%arg0: i32) -> (i32, i32) {
    %c0_i32 = arith.constant 0 : i32
    %c0_i32_0 = arith.constant 0 : i32
    %c0_i32_1 = arith.constant 0 : i32
    return %c0_i32, %c0_i32_0 : i32, i32
  }
  func.func @transform_2(%arg0: i32) -> (i32, i32) {
    %c0_i32 = arith.constant 0 : i32
    %c0_i32_0 = arith.constant 0 : i32
    %c0_i32_1 = arith.constant 0 : i32
    return %c0_i32, %c0_i32_0 : i32, i32
  }
  func.func @transform_3(%arg0: i32) -> (i32, i32) {
    %c0_i32 = arith.constant 0 : i32
    %c0_i32_0 = arith.constant 0 : i32
    %c0_i32_1 = arith.constant 0 : i32
    return %c0_i32, %c0_i32_0 : i32, i32
  }
  func.func @transform_4(%arg0: i32) -> (i32, i32) {
    %c0_i32 = arith.constant 0 : i32
    %c0_i32_0 = arith.constant 0 : i32
    %c0_i32_1 = arith.constant 0 : i32
    return %c0_i32, %c0_i32_0 : i32, i32
  }
  func.func @transform_5(%arg0: i32) -> (i32, i32) {
    %c0_i32 = arith.constant 0 : i32
    %c0_i32_0 = arith.constant 0 : i32
    %c0_i32_1 = arith.constant 0 : i32
    return %c0_i32, %c0_i32_0 : i32, i32
  }
  func.func @transform_6(%arg0: i32) -> (i32, i32) {
    %c0_i32 = arith.constant 0 : i32
    %c0_i32_0 = arith.constant 0 : i32
    %c0_i32_1 = arith.constant 0 : i32
    return %c0_i32, %c0_i32_0 : i32, i32
  }
  func.func @transform_7(%arg0: i32) -> (i32, i32) {
    %c0_i32 = arith.constant 0 : i32
    %c0_i32_0 = arith.constant 0 : i32
    %c0_i32_1 = arith.constant 0 : i32
    return %c0_i32, %c0_i32_0 : i32, i32
  }
}

</mosaic_0001>

<bundles_post_ra>
// kernel: tpu_custom_call.1
= control target key start
LH: loop header
LB: loop body
LE: loop exit
PB: predicated region body
PF: predicated region fallthrough
CT: control target
= control target key end

     0   :  { %12 = vsyncpa [#allocation4], 0  ;;  %s9155_s0 = inlined_call_operand.hbm [shape: f32[64,8,128], index: 0, kind: input, shape index: {}]   ;;  %s9156_s1 = inlined_call_operand.hbm [shape: f32[128,128], index: 1, kind: input, shape index: {}]   ;;  %s9157_s2 = inlined_call_operand.hbm [shape: f32[128,128], index: 2, kind: input, shape index: {}]   ;;  %s9158_s3 = inlined_call_operand.hbm [shape: f32[128,128], index: 3, kind: input, shape index: {}]   ;;  %s9159_s4 = inlined_call_operand.hbm [shape: f32[128,128], index: 4, kind: input, shape index: {}]   ;;  %s9160_s5 = inlined_call_operand.vmem [shape: f32[3,128], index: 5, kind: input, shape index: {}]   ;;  %s9161_s6 = inlined_call_operand.vmem [shape: f32[1,128], index: 6, kind: input, shape index: {}]   ;;  %s9162_s7 = inlined_call_operand.hbm [shape: f32[64,128], index: 7, kind: output, shape index: {}]  }
   0x1   :  { %14 = vsyncpa [#allocation4 + $0x1], 0 }
   0x2   :  { %15 = vsyncpa [#allocation7], 0 }
   0x3   :  { %16 = vsyncpa [#allocation10], 0 }
   0x4   :  { %17 = vsyncpa [#allocation5], 0  ;;  %s7375_s24 = smov 0   ;;  %s7377_s25 = smov 0  }
   0x5   :  { %s7379_s26 = smov 0   ;;  %s7381_s27 = smov 0  }
   0x6 LB: > { %s7394_s28 = sadd.s32 4294967295, %s7316_s27   ;;  %p43_p0 = scmp.ne.s32.totalorder %s7308_s25, %s7304_s24  ;;  %s7316_s27 = sphi %s7381_s27, %s9181_s27   ;;  %s7312_s26 = sphi %s7379_s26, %s9180_s26   ;;  %s7308_s25 = sphi %s7377_s25, %s9179_s25   ;;  %s7304_s24 = sphi %s7375_s24, %s9178_s24  }
   0x7   : > { %p9163_p1 = scmp.eq.s32.totalorder %s7394_s28, 0  ;;  %p5364_p2 = scmp.ge.s32.totalorder %s7316_s27, 1 }
   0x8   : > { %p201_p3 = scmp.lt.s32.totalorder %s7316_s27, 5  ;;  %s7318_s8 = smov [#allocation6]  }
   0x9   : > { %p7402_p4 = por %p9163_p1, %p43_p0  ;;  %s213_s9 = sshll.u32 %s7318_s8, 4  ;;  %s214_s9 = int_to_ptr.vmem [resolvable:$true] %s213_s9 }
   0xa   : > { %p7406_p5 = pnand %p5364_p2, %p201_p3  ;;  %s7319_s11 = smov [#allocation9]  }
   0xb   : > { %s9166_s29 = scalar_select %p7402_p4, 1, 0 }
   0xc   : > { %s9167_s30 = scalar_select %p7406_p5, 1, 0 }
   0xd   : > { %p6781_p6 = pneg %p7406_p5  ;;  %s239_s12 = sshll.u32 %s7319_s11, 4  ;;  %s240_s12 = int_to_ptr.vmem [resolvable:$true] %s239_s12 }
   0xe   : > { %s7320_s13 = smov [#allocation8]   ;;  %s7125_s15 = scalar_lea.vmem %s214_s9, 2048 }
   0xf   : > { %p7414_p7 = pnand %p6781_p6, %p9163_p1  ;;  %s226_s14 = sshll.u32 %s7320_s13, 4  ;;  %s227_s14 = int_to_ptr.vmem [resolvable:$true] %s226_s14 }
  0x10   : > { %p7126_p9 = scmp.ne.s32.totalorder %s214_s9, %s7125_s15  ;;  %p7133_p12 = scmp.lt.s32.totalorder %s214_s9, %s214_s9 }
  0x11   : > { %p7116_p8 = pneg %p7414_p7  ;;  %p7134_p13 = scmp.lt.s32.totalorder %s7125_s15, %s7125_s15 }
  0x13   : > { %p7128_p10 = pnand %p7126_p9, %p7116_p8  ;;  %p7135_p0 = por %p7134_p13, %p7133_p12 }
  0x15   : > { %p7129_p11 = pneg %p7128_p10 }
  0x17   : > { %p7136_p2 = pnand %p7135_p0, %p7129_p11 }
  0x19   : > { %7139 = shalt.err (!%p7136_p2)
}
  0x1a   : > { %s7321_s16 = smov 128   ;;  %s7322_s17 = smov 8  }
  0x1b   : > { %6784 = dma.hbm_to_vmem [thread:$0]  (!%p7414_p7), %s9156_s1, 2048, %s214_s9, [#allocation7], %s7321_s16, %s7321_s16, %s7322_s17  }
  0x1c   : > { %s7151_s20 = scalar_lea.vmem %s240_s12, 2048  ;;  %p7159_p10 = scmp.lt.s32.totalorder %s240_s12, %s240_s12 }
  0x1d   : > { %p7152_p3 = scmp.ne.s32.totalorder %s240_s12, %s7151_s20  ;;  %p7160_p11 = scmp.lt.s32.totalorder %s7151_s20, %s7151_s20 }
  0x1f   : > { %p7154_p6 = pnand %p7152_p3, %p7116_p8  ;;  %p7161_p12 = por %p7160_p11, %p7159_p10 }
  0x21   : > { %p7155_p9 = pneg %p7154_p6 }
  0x23   : > { %p7162_p13 = pnand %p7161_p12, %p7155_p9 }
  0x25   : > { %7165 = shalt.err (!%p7162_p13)
}
  0x26   : > { %6790 = dma.hbm_to_vmem [thread:$0]  (!%p7414_p7), %s9158_s3, 2048, %s240_s12, [#allocation10], %s7321_s16, %s7321_s16, %s7322_s17  }
  0x27   : > { %s7177_s23 = scalar_lea.vmem %s227_s14, 2048  ;;  %p7185_p6 = scmp.lt.s32.totalorder %s227_s14, %s227_s14 }
  0x28   : > { %p7178_p0 = scmp.ne.s32.totalorder %s227_s14, %s7177_s23  ;;  %p7186_p9 = scmp.lt.s32.totalorder %s7177_s23, %s7177_s23 }
  0x2a   : > { %p7180_p2 = pnand %p7178_p0, %p7116_p8  ;;  %p7187_p10 = por %p7186_p9, %p7185_p6 }
  0x2c   : > { %p7181_p3 = pneg %p7180_p2 }
  0x2e   : > { %p7188_p11 = pnand %p7187_p10, %p7181_p3 }
  0x30   : > { %7191 = shalt.err (!%p7188_p11)
}
  0x31   : > { %6787 = dma.hbm_to_vmem [thread:$0]  (!%p7414_p7), %s9157_s2, 2048, %s227_s14, [#allocation7], %s7321_s16, %s7321_s16, %s7322_s17  }
  0x32   : > { %s7323_s9 = smov [#allocation11]  }
  0x33   : > { %s252_s11 = sshll.u32 %s7323_s9, 4  ;;  %s253_s11 = int_to_ptr.vmem [resolvable:$true] %s252_s11 }
  0x34   : > { %s7203_s12 = scalar_lea.vmem %s253_s11, 2048  ;;  %p7211_p2 = scmp.lt.s32.totalorder %s253_s11, %s253_s11 }
  0x35   : > { %p7204_p12 = scmp.ne.s32.totalorder %s253_s11, %s7203_s12  ;;  %p7212_p3 = scmp.lt.s32.totalorder %s7203_s12, %s7203_s12 }
  0x37   : > { %p7206_p13 = pnand %p7204_p12, %p7116_p8  ;;  %p7213_p6 = por %p7212_p3, %p7211_p2 }
  0x39   : > { %p7207_p0 = pneg %p7206_p13 }
  0x3b   : > { %p7214_p9 = pnand %p7213_p6, %p7207_p0 }
  0x3d   : > { %7217 = shalt.err (!%p7214_p9)
}
  0x3e   : > { %6793 = dma.hbm_to_vmem [thread:$0]  (!%p7414_p7), %s9159_s4, 2048, %s253_s11, [#allocation10], %s7321_s16, %s7321_s16, %s7322_s17  }
  0x3f   : > { %s7465_s15 = sadd.s32 1, %s7316_s27   ;;  %s30_s10 = sadd.s32 1, %s7312_s26 }
  0x40   : > { %s27_s18 = ssub.s32 %s7316_s27, %s7465_s15  ;;  %p37_p8 = scmp.ne.s32.totalorder %s7312_s26, %s7308_s25 }
  0x41   : > { %p28_p10 = scmp.eq.s32.totalorder %s27_s18, 0  ;;  %p38_p11 = scmp.eq.s32.totalorder %s7316_s27, 0 }
  0x42   : > { %p6802_p12 = scmp.lt.s32.totalorder %s7316_s27, 4  ;;  %s272_s19 = sand.u32 1, %s7312_s26  }
  0x43   : > { %s7476_s20 = scalar_select %p28_p10, %s7312_s26, %s30_s10  }
  0x44   : > { %p39_p13 = por %p38_p11, %p37_p8  ;;  %s5370_s21 = sshll.u32 %s272_s19, 7 }
  0x45   : > { %s5642_s22 = sshll.u32 %s7316_s27, 11  ;;  %s276_s9 = scalar_lea.vmem [#allocation3], %s5370_s21 }
  0x46   : > { %s7482_s8 = scalar_lea.hbm %s9155_s0, %s5642_s22  ;;  %s283_s11 = sshll.u32 %s276_s9, 4  ;;  %s7488_s11 = int_to_ptr.vmem [resolvable:$true] %s283_s11 }
  0x47   : > { %p7484_p7 = pnand %p6802_p12, %p39_p13  ;;  %s7490_s13 = scalar_lea.sflag [#allocation4], %s272_s19 }
  0x48   : > { %s7218_s27 = scalar_lea.hbm %s7482_s8, 2048  ;;  %s7223_s18 = scalar_lea.hbm %s9155_s0, 8192 }
  0x49   : > { %p7219_p0 = scmp.ne.s32.totalorder %s7482_s8, %s7218_s27  ;;  %p7220_p2 = pneg %p7484_p7 }
  0x4a   : > { %p7224_p9 = scmp.lt.s32.totalorder %s7482_s8, %s9155_s0  ;;  %p7225_p8 = scmp.lt.s32.totalorder %s7223_s18, %s7218_s27 }
  0x4b   : > { %p7221_p3 = pnand %p7220_p2, %p7219_p0 }
  0x4c   : > { %p7226_p10 = por %p7225_p8, %p7224_p9 }
  0x4d   : > { %p7222_p6 = pneg %p7221_p3 }
  0x4f   : > { %p7227_p11 = pnand %p7226_p10, %p7222_p6 }
  0x51   : > { %7230 = shalt.err (!%p7227_p11)
}
  0x52   : > { %s7231_s19 = scalar_lea.vmem %s7488_s11, 2048  ;;  %s7324_s23 = smov [#allocation3]  }
  0x53   : > { %p7232_p12 = scmp.ne.s32.totalorder %s7488_s11, %s7231_s19  ;;  %s7236_s24 = sshll.u32 %s7324_s23, 4  ;;  %s7237_s24 = int_to_ptr.vmem [resolvable:$false] %s7236_s24 }
  0x54   : > { %s7238_s9 = scalar_lea.vmem %s7237_s24, 4096  ;;  %p7239_p3 = scmp.lt.s32.totalorder %s7488_s11, %s7237_s24 }
  0x55   : > { %p7234_p13 = pnand %p7232_p12, %p7220_p2  ;;  %p7240_p1 = scmp.lt.s32.totalorder %s7238_s9, %s7231_s19 }
  0x57   : > { %p7235_p0 = pneg %p7234_p13  ;;  %p7241_p4 = por %p7240_p1, %p7239_p3 }
  0x59   : > { %p7242_p5 = pnand %p7241_p4, %p7235_p0 }
  0x5b   : > { %7245 = shalt.err (!%p7242_p5)
}
  0x5c   : > { %6797 = dma.hbm_to_vmem [thread:$0]  (!%p7484_p7), %s7482_s8, 2048, %s7488_s11, %s7490_s13, %s7321_s16, %s7321_s16, %s7322_s17  }
  0x5d   : > { %p9170_p2 = scmp.ne.s32.totalorder %s9167_s30, 0 }
  0x5e   : > { %s297_s27 = sand.u32 (!%p9170_p2), 1, %s7308_s25   ;;  %p9171_p1 = scmp.ne.s32.totalorder (!%p9170_p2), %s9166_s29, 0 }
  0x5f   : > { %295 = sbr.rel (%p9170_p2) target bundleno = 3570 (0xdf2), region = 48  ;;  %s5374_s14 = sshll.u32 (!%p9170_p2), %s297_s27, 7 }
  0x60   : > { %s298_s10 = scalar_lea.sflag (!%p9170_p2), [#allocation4], %s297_s27  ;;  %s7517_s18 = scalar_lea.vmem (!%p9170_p2), [#allocation3], %s5374_s14 }
  0x64   : > { %7287 = dma.done.wait (%p9171_p1), %s298_s10, 2048  }
  0x65   : > { %7289 = vsyncadd (%p9171_p1), %s298_s10, 4294965248  ;;  %p9172_p4 = scmp.eq.s32.totalorder %s7394_s28, 0 }
  0x67   : > { %7291 = dma.done.wait (%p9172_p4), [#allocation7], 4096   ;;  %p9173_p5 = pmov %p9172_p4 }
  0x68   : > { %p9174_p7 = pmov %p9172_p4 }
  0x69   : > { %7293 = vsyncadd (%p9173_p5), [#allocation7], 4294963200 }
  0x6a   : > { %7295 = dma.done.wait (%p9174_p7), [#allocation10], 4096   ;;  %p9175_p6 = pmov %p9172_p4 }
  0x6b   : > { %v344_v0 = vld [vmem:[%s7517_s18] sm:$0xff]  ;;  %v345_v1 = vld [vmem:[%s7517_s18 + $0x8] sm:$0xff]  ;;  %v346_v2 = vld [vmem:[%s7517_s18 + $0x10] sm:$0xff]  ;;  %vm473_vm0 = vcmask 1041409   ;;  %vm475_vm1 = vcmask 1042434   ;;  %vm477_vm2 = vcmask 1043459  }
  0x6c   : > { %7297 = vsyncadd (%p9175_p6), [#allocation10], 4294963200  ;;  %v347_v3 = vld [vmem:[%s7517_s18 + $0x18] sm:$0xff]  ;;  %v348_v4 = vld [vmem:[%s7517_s18 + $0x20] sm:$0xff]  ;;  %v361_v6 = vrot.slane %v344_v0, 4  ;;  %v367_v7 = vrot.slane %v345_v1, 4 }
  0x6d   : > { %v349_v5 = vld [vmem:[%s7517_s18 + $0x28] sm:$0xff]  ;;  %v373_v8 = vrot.slane %v346_v2, 4  ;;  %v350_v9 = vld [vmem:[%s7517_s18 + $0x30] sm:$0xff]  ;;  %v351_v10 = vld [vmem:[%s7517_s18 + $0x38] sm:$0xff]  ;;  %v379_v11 = vrot.slane %v347_v3, 4  ;;  %v385_v12 = vrot.slane %v348_v4, 4 }
  0x6e   : > { %v391_v13 = vrot.slane %v349_v5, 4  ;;  %v362_v14 = vmax.f32 %v344_v0, %v361_v6  ;;  %v368_v15 = vmax.f32 %v345_v1, %v367_v7  ;;  %v397_v17 = vrot.slane %v350_v9, 4  ;;  %v352_v46 = vld [vmem:[%s7517_s18 + $0x40] sm:$0xff]  ;;  %v353_v47 = vld [vmem:[%s7517_s18 + $0x48] sm:$0xff]  ;;  %v354_v52 = vld [vmem:[%s7517_s18 + $0x50] sm:$0xff]  ;;  %s5379_s29 = sshll.u32 %s7394_s28, 4 }
  0x6f   : > { %v374_v16 = vmax.f32 %v346_v2, %v373_v8  ;;  %v380_v18 = vmax.f32 %v347_v3, %v379_v11  ;;  %v386_v19 = vmax.f32 %v348_v4, %v385_v12  ;;  %v403_v21 = vrot.slane %v351_v10, 4  ;;  %v355_v53 = vld [vmem:[%s7517_s18 + $0x58] sm:$0xff]  ;;  %v356_v58 = vld [vmem:[%s7517_s18 + $0x60] sm:$0xff]  ;;  %v357_v61 = vld [vmem:[%s7517_s18 + $0x68] sm:$0xff]  ;;  %s7555_s30 = scalar_lea.vmem [#allocation2], %s5379_s29  ;;  %p5380_p9 = scmp.ne.s32.totalorder %s7394_s28, 3 }
  0x70   : > { %v392_v20 = vmax.f32 %v349_v5, %v391_v13  ;;  %v363_v22 = vrot.slane %v362_v14, 2  ;;  %v369_v23 = vrot.slane %v368_v15, 2  ;;  %v398_v25 = vmax.f32 %v350_v9, %v397_v17  ;;  %v358_v13 = vld [vmem:[%s7517_s18 + $0x70] sm:$0xff] }
  0x71   : > { %v375_v24 = vrot.slane %v374_v16, 2  ;;  %vm479_vm3 = vcmask 1044484   ;;  %v381_v26 = vrot.slane %v380_v18, 2  ;;  %v387_v27 = vrot.slane %v386_v19, 2 }
  0x72   : > { %v393_v28 = vrot.slane %v392_v20, 2  ;;  %v404_v29 = vmax.f32 %v351_v10, %v403_v21  ;;  %vm481_vm4 = vcmask 1045509   ;;  %v364_v30 = vmax.f32 %v362_v14, %v363_v22 }
  0x73   : > { %v370_v31 = vmax.f32 %v368_v15, %v369_v23  ;;  %v376_v32 = vmax.f32 %v374_v16, %v375_v24  ;;  %v399_v33 = vrot.slane %v398_v25, 2  ;;  %vm483_vm5 = vcmask 1046534  }
  0x74   : > { %v382_v34 = vmax.f32 %v380_v18, %v381_v26  ;;  %v388_v35 = vmax.f32 %v386_v19, %v387_v27  ;;  %v394_v36 = vmax.f32 %v392_v20, %v393_v28  ;;  %v405_v37 = vrot.slane %v404_v29, 2  ;;  %v359_v18 = vld [vmem:[%s7517_s18 + $0x78] sm:$0xff] }
  0x75   : > { %vm485_vm6 = vcmask 1047559   ;;  %v365_v38 = vrot.slane %v364_v30, 1  ;;  %v371_v39 = vrot.slane %v370_v31, 1  ;;  %v377_v40 = vrot.slane %v376_v32, 1 }
  0x76   : > { %v400_v41 = vmax.f32 %v398_v25, %v399_v33  ;;  %v383_v42 = vrot.slane %v382_v34, 1  ;;  %v389_v43 = vrot.slane %v388_v35, 1  ;;  %v395_v44 = vrot.slane %v394_v36, 1 }
  0x77   : > { %v406_v45 = vmax.f32 %v404_v29, %v405_v37  ;;  %v366_v48 = vmax.f32 %v364_v30, %v365_v38  ;;  %v372_v49 = vmax.f32 %v370_v31, %v371_v39  ;;  %v378_v50 = vmax.f32 %v376_v32, %v377_v40 }
  0x78   : > { %v401_v51 = vrot.slane %v400_v41, 1  ;;  %v384_v54 = vmax.f32 %v382_v34, %v383_v42  ;;  %v390_v55 = vmax.f32 %v388_v35, %v389_v43  ;;  %v396_v56 = vmax.f32 %v394_v36, %v395_v44 }
  0x79   : > { %v407_v57 = vrot.slane %v406_v45, 1  ;;  %v474_v60 = vsel %vm473_vm0, %v372_v49, %v366_v48  ;;  %v409_v62 = vrot.slane %v352_v46, 4  ;;  %v415_v63 = vrot.slane %v353_v47, 4 }
  0x7a   : > { %v402_v59 = vmax.f32 %v400_v41, %v401_v51  ;;  %v476_v1 = vsel %vm475_vm1, %v378_v50, %v474_v60  ;;  %v421_v2 = vrot.slane %v354_v52, 4  ;;  %v427_v3 = vrot.slane %v355_v53, 4 }
  0x7b   : > { %v408_v0 = vmax.f32 %v406_v45, %v407_v57  ;;  %v478_v4 = vsel %vm477_vm2, %v384_v54, %v476_v1  ;;  %v410_v5 = vmax.f32 %v352_v46, %v409_v62  ;;  %v416_v6 = vmax.f32 %v353_v47, %v415_v63 }
  0x7c   : > { %v433_v7 = vrot.slane %v356_v58, 4  ;;  %v480_v8 = vsel %vm479_vm3, %v390_v55, %v478_v4  ;;  %v422_v9 = vmax.f32 %v354_v52, %v421_v2  ;;  %v428_v10 = vmax.f32 %v355_v53, %v427_v3 }
  0x7d   : > { %v439_v11 = vrot.slane %v357_v61, 4  ;;  %v482_v12 = vsel %vm481_vm4, %v396_v56, %v480_v8  ;;  %v411_v14 = vrot.slane %v410_v5, 2  ;;  %v417_v15 = vrot.slane %v416_v6, 2 }
  0x7e   : > { %v434_v16 = vmax.f32 %v356_v58, %v433_v7  ;;  %v484_v17 = vsel %vm483_vm5, %v402_v59, %v482_v12  ;;  %v423_v19 = vrot.slane %v422_v9, 2  ;;  %v429_v20 = vrot.slane %v428_v10, 2 }
  0x7f   : > { %v440_v21 = vmax.f32 %v357_v61, %v439_v11  ;;  %v486_v22 = vsel %vm485_vm6, %v408_v0, %v484_v17  ;;  %v412_v23 = vmax.f32 %v410_v5, %v411_v14  ;;  %v418_v24 = vmax.f32 %v416_v6, %v417_v15 }
  0x80   : > { %v435_v25 = vrot.slane %v434_v16, 2  ;;  %497 = vst [vmem:[%s7555_s30] sm:$0xff] %v486_v22  ;;  %v424_v26 = vmax.f32 %v422_v9, %v423_v19  ;;  %v430_v27 = vmax.f32 %v428_v10, %v429_v20  ;;  %v445_v29 = vrot.slane %v358_v13, 4 }
  0x81   : > { %v441_v28 = vrot.slane %v440_v21, 2  ;;  %v413_v30 = vrot.slane %v412_v23, 1  ;;  %v419_v31 = vrot.slane %v418_v24, 1  ;;  %v451_v33 = vrot.slane %v359_v18, 4 }
  0x82   : > { %v436_v32 = vmax.f32 %v434_v16, %v435_v25  ;;  %v425_v34 = vrot.slane %v424_v26, 1  ;;  %v431_v35 = vrot.slane %v430_v27, 1  ;;  %v446_v37 = vmax.f32 %v358_v13, %v445_v29 }
  0x83   : > { %v442_v36 = vmax.f32 %v440_v21, %v441_v28  ;;  %v414_v38 = vmax.f32 %v412_v23, %v413_v30  ;;  %v420_v39 = vmax.f32 %v418_v24, %v419_v31  ;;  %v452_v41 = vmax.f32 %v359_v18, %v451_v33 }
  0x84   : > { %v437_v40 = vrot.slane %v436_v32, 1  ;;  %v426_v42 = vmax.f32 %v424_v26, %v425_v34  ;;  %v432_v43 = vmax.f32 %v430_v27, %v431_v35  ;;  %v447_v45 = vrot.slane %v446_v37, 2 }
  0x85   : > { %v443_v44 = vrot.slane %v442_v36, 1  ;;  %v453_v47 = vrot.slane %v452_v41, 2  ;;  %v487_v48 = vsel %vm473_vm0, %v420_v39, %v414_v38 }
  0x86   : > { %v438_v46 = vmax.f32 %v436_v32, %v437_v40  ;;  %v448_v50 = vmax.f32 %v446_v37, %v447_v45  ;;  %v488_v51 = vsel %vm475_vm1, %v426_v42, %v487_v48 }
  0x87   : > { %v444_v49 = vmax.f32 %v442_v36, %v443_v44  ;;  %v454_v52 = vmax.f32 %v452_v41, %v453_v47  ;;  %v489_v53 = vsel %vm477_vm2, %v432_v43, %v488_v51 }
  0x88   : > { %v449_v54 = vrot.slane %v448_v50, 1  ;;  %v490_v55 = vsel %vm479_vm3, %v438_v46, %v489_v53 }
  0x89   : > { %v455_v56 = vrot.slane %v454_v52, 1  ;;  %v491_v57 = vsel %vm481_vm4, %v444_v49, %v490_v55 }
  0x8a   : > { %v450_v58 = vmax.f32 %v448_v50, %v449_v54  ;;  %502 = sbr.rel (%p5380_p9) target bundleno = 3554 (0xde2), region = 72 }
  0x8b   : > { %v456_v59 = vmax.f32 %v454_v52, %v455_v56 }
  0x8c   : > { %v492_v60 = vsel %vm483_vm5, %v450_v58, %v491_v57 }
  0x8d   : > { %v493_v61 = vsel %vm485_vm6, %v456_v59, %v492_v60 }
  0x8e   : > { %498 = vst [vmem:[%s7555_s30 + $0x8] sm:$0xff] %v493_v61 }
  0x8f   : > { %v652_v62 = vld [vmem:[#allocation8 + $0x78] sm:$0xff]  ;;  %v651_v63 = vld [vmem:[#allocation8 + $0x70] sm:$0xff]  ;;  %v650_v0 = vld [vmem:[#allocation8 + $0x68] sm:$0xff]  ;;  %v528_v54 = vlaneseq  ;;  %vm894_vm7 = vcmask 130048   ;;  %vm1048_vm8 = vcmask 523264   ;;  %s7325_s8 = smov 112  }
  0x90   : > { %6095 = vmatprep.subr.mxu1 %v652_v62  ;;  %v649_v1 = vld [vmem:[#allocation8 + $0x60] sm:$0xff]  ;;  %v648_v3 = vld [vmem:[#allocation8 + $0x58] sm:$0xff]  ;;  %v526_v5 = vld [vmem:[#allocation6 + $0x70] sm:$0xff]  ;;  %s7326_s11 = smov 96   ;;  %s7327_s12 = smov 80  }
  0x91   : > { %6096 = vmatpush3.msra.mxu1 %v652_v62  ;;  %v527_v4 = vld [vmem:[#allocation6 + $0x78] sm:$0xff]  ;;  %v647_v6 = vld [vmem:[#allocation8 + $0x50] sm:$0xff]  ;;  %v525_v7 = vld [vmem:[#allocation6 + $0x68] sm:$0xff]  ;;  %v7602_v55 = vshrl.u32 %v528_v54, 7  ;;  %s7328_s13 = smov 64   ;;  %s7329_s19 = smov 48  }
  0x92   : > { %6097 = vmatprep.subr.mxu1 %v651_v63  ;;  %6051 = vmatprep.subr.mxu0 %v527_v4  ;;  %v646_v8 = vld [vmem:[#allocation8 + $0x48] sm:$0xff]  ;;  %v524_v9 = vld [vmem:[#allocation6 + $0x60] sm:$0xff]  ;;  %v523_v11 = vld [vmem:[#allocation6 + $0x58] sm:$0xff]  ;;  %s7330_s23 = smov 32   ;;  %s7331_s27 = smov 16  }
  0x93   : > { %6098 = vmatpush3.msra.mxu1 %v651_v63  ;;  %6052 = vmatpush3.msra.mxu0 %v527_v4  ;;  %v645_v10 = vld [vmem:[#allocation8 + $0x40] sm:$0xff]  ;;  %v644_v12 = vld [vmem:[#allocation8 + $0x38] sm:$0xff]  ;;  %v522_v13 = vld [vmem:[#allocation6 + $0x50] sm:$0xff]  ;;  %v530_v57 = vsub.s32 0, %v7602_v55 }
  0x94   : > { %6099 = vmatprep.subr.mxu1 %v650_v0  ;;  %6053 = vmatprep.subr.mxu0 %v526_v5  ;;  %v643_v14 = vld [vmem:[#allocation8 + $0x30] sm:$0xff]  ;;  %v521_v15 = vld [vmem:[#allocation6 + $0x48] sm:$0xff]  ;;  %v520_v17 = vld [vmem:[#allocation6 + $0x40] sm:$0xff] }
  0x95   : > { %v7567_v2 = vld [vmem:[#allocation2] sm:$0xff]  ;;  %6100 = vmatpush3.msra.mxu1 %v650_v0  ;;  %6054 = vmatpush3.msra.mxu0 %v526_v5  ;;  %v642_v16 = vld [vmem:[#allocation8 + $0x28] sm:$0xff]  ;;  %v519_v19 = vld [vmem:[#allocation6 + $0x38] sm:$0xff]  ;;  %v655_v0 = vsub.s32 1, %v7602_v55 }
  0x96   : > { %6127 = vmatprep.mubr.f32.mxu1 %v7567_v2  ;;  %6101 = vmatprep.subr.mxu1 %v649_v1  ;;  %v641_v18 = vld [vmem:[#allocation8 + $0x20] sm:$0xff]  ;;  %v640_v20 = vld [vmem:[#allocation8 + $0x18] sm:$0xff]  ;;  %v518_v21 = vld [vmem:[#allocation6 + $0x30] sm:$0xff] }
  0x97   : > { %6102 = vmatpush3.msra.mxu1 %v649_v1  ;;  %6055 = vmatprep.subr.mxu0 %v525_v7  ;;  %v639_v22 = vld [vmem:[#allocation8 + $0x10] sm:$0xff]  ;;  %v517_v23 = vld [vmem:[#allocation6 + $0x28] sm:$0xff]  ;;  %v516_v25 = vld [vmem:[#allocation6 + $0x20] sm:$0xff] }
  0x98   : > { %6103 = vmatprep.subr.mxu1 %v648_v3  ;;  %6056 = vmatpush3.msra.mxu0 %v525_v7  ;;  %v638_v24 = vld [vmem:[#allocation8 + $0x8] sm:$0xff]  ;;  %v637_v26 = vld [vmem:[#allocation8] sm:$0xff]  ;;  %v515_v27 = vld [vmem:[#allocation6 + $0x18] sm:$0xff] }
  0x99   : > { %6104 = vmatpush3.msra.mxu1 %v648_v3  ;;  %6057 = vmatprep.subr.mxu0 %v524_v9  ;;  %v7570_v28 = vld [vmem:[#allocation2 + $0x8] sm:$0xff]  ;;  %v514_v29 = vld [vmem:[#allocation6 + $0x10] sm:$0xff]  ;;  %v7576_v32 = vld [vmem:[#allocation2 + $0x18] sm:$0xff] }
  0x9a   : > { %6105 = vmatprep.subr.mxu1 %v647_v6  ;;  %6058 = vmatpush3.msra.mxu0 %v524_v9  ;;  %v7572_v30 = vld [vmem:[#allocation2 + $0x10] sm:$0xff]  ;;  %v513_v31 = vld [vmem:[#allocation6 + $0x8] sm:$0xff]  ;;  %v512_v33 = vld [vmem:[#allocation6] sm:$0xff] }
  0x9b   : > { %6106 = vmatpush3.msra.mxu1 %v647_v6  ;;  %6059 = vmatprep.subr.mxu0 %v523_v11  ;;  %v7578_v34 = vld [vmem:[#allocation2 + $0x20] sm:$0xff]  ;;  %v7583_v35 = vld [vmem:[#allocation2 + $0x28] sm:$0xff]  ;;  %v7585_v36 = vld [vmem:[#allocation2 + $0x30] sm:$0xff] }
  0x9c   : > { %6107 = vmatprep.subr.mxu1 %v646_v8  ;;  %6060 = vmatpush3.msra.mxu0 %v523_v11  ;;  %v510_v37 = vld [vmem:[#allocation2 + $0x38] sm:$0xff]  ;;  %v776_v39 = vld [vmem:[#allocation9 + $0x70] sm:$0xff]  ;;  %v775_v40 = vld [vmem:[#allocation9 + $0x68] sm:$0xff] }
  0x9d   : > { %6108 = vmatpush3.msra.mxu1 %v646_v8  ;;  %6061 = vmatprep.subr.mxu0 %v522_v13  ;;  %v777_v38 = vld [vmem:[#allocation9 + $0x78] sm:$0xff]  ;;  %v774_v41 = vld [vmem:[#allocation9 + $0x60] sm:$0xff]  ;;  %v772_v43 = vld [vmem:[#allocation9 + $0x50] sm:$0xff] }
  0x9e   : > { %6109 = vmatprep.subr.mxu1 %v645_v10  ;;  %6062 = vmatpush3.msra.mxu0 %v522_v13  ;;  %v773_v42 = vld [vmem:[#allocation9 + $0x58] sm:$0xff]  ;;  %v771_v44 = vld [vmem:[#allocation9 + $0x48] sm:$0xff]  ;;  %v770_v45 = vld [vmem:[#allocation9 + $0x40] sm:$0xff] }
  0x9f   : > { %6110 = vmatpush3.msra.mxu1 %v645_v10  ;;  %6063 = vmatprep.subr.mxu0 %v521_v15  ;;  %v769_v46 = vld [vmem:[#allocation9 + $0x38] sm:$0xff]  ;;  %v768_v47 = vld [vmem:[#allocation9 + $0x30] sm:$0xff]  ;;  %v767_v48 = vld [vmem:[#allocation9 + $0x28] sm:$0xff] }
  0xa0   : > { %6111 = vmatprep.subr.mxu1 %v644_v12  ;;  %6064 = vmatpush3.msra.mxu0 %v521_v15  ;;  %v766_v49 = vld [vmem:[#allocation9 + $0x20] sm:$0xff]  ;;  %v765_v50 = vld [vmem:[#allocation9 + $0x18] sm:$0xff]  ;;  %v764_v51 = vld [vmem:[#allocation9 + $0x10] sm:$0xff] }
  0xa1   : > { %6112 = vmatpush3.msra.mxu1 %v644_v12  ;;  %6065 = vmatprep.subr.mxu0 %v520_v17  ;;  %v763_v52 = vld [vmem:[#allocation9 + $0x8] sm:$0xff]  ;;  %v762_v53 = vld [vmem:[#allocation9] sm:$0xff] }
  0xa2   : > { %6113 = vmatprep.subr.mxu1 %v643_v14  ;;  %6066 = vmatpush3.msra.mxu0 %v520_v17  ;;  %v7608_v59 = vld [vmem:[%s9160_s5] sm:$0x7] }
  0xa3   : > { %6114 = vmatpush3.msra.mxu1 %v643_v14  ;;  %6067 = vmatprep.subr.mxu0 %v519_v19  ;;  %v531_v61 = vrot.slane %v7608_v59, %v530_v57  ;;  %v656_v5 = vrot.slane %v7608_v59, %v655_v0 }
  0xa4   : > { %6115 = vmatprep.subr.mxu1 %v642_v16  ;;  %6068 = vmatpush3.msra.mxu0 %v519_v19 }
  0xa5   : > { %6116 = vmatpush3.msra.mxu1 %v642_v16  ;;  %6069 = vmatprep.subr.mxu0 %v518_v21 }
  0xa6   : > { %6117 = vmatprep.subr.mxu1 %v641_v18  ;;  %6070 = vmatpush3.msra.mxu0 %v518_v21 }
  0xa7   : > { %6118 = vmatpush3.msra.mxu1 %v641_v18  ;;  %6071 = vmatprep.subr.mxu0 %v517_v23 }
  0xa8   : > { %6119 = vmatprep.subr.mxu1 %v640_v20  ;;  %6072 = vmatpush3.msra.mxu0 %v517_v23 }
  0xa9   : > { %6120 = vmatpush3.msra.mxu1 %v640_v20  ;;  %6073 = vmatprep.subr.mxu0 %v516_v25 }
  0xaa   : > { %6121 = vmatprep.subr.mxu1 %v639_v22  ;;  %6074 = vmatpush3.msra.mxu0 %v516_v25 }
  0xab   : > { %6122 = vmatpush3.msra.mxu1 %v639_v22  ;;  %6075 = vmatprep.subr.mxu0 %v515_v27 }
  0xac   : > { %6123 = vmatprep.subr.mxu1 %v638_v24  ;;  %6076 = vmatpush3.msra.mxu0 %v515_v27 }
  0xad   : > { %6124 = vmatpush3.msra.mxu1 %v638_v24  ;;  %6077 = vmatprep.subr.mxu0 %v514_v29 }
  0xae   : > { %6125 = vmatprep.subr.mxu1 %v637_v26  ;;  %6078 = vmatpush3.msra.mxu0 %v514_v29 }
  0xaf   : > { %6126 = vmatpush3.msra.mxu1 %v637_v26  ;;  %6079 = vmatprep.subr.mxu0 %v513_v31 }
  0xb0   : > { %6128 = vmatmul.mubr.f32.vlgmr.msra.gmra.mxu1 %v7570_v28  ;;  %6083 = vmatprep.mubr.f32.mxu0 %v7567_v2 }
  0xb1   : > { %6130 = vmatprep.mubr.f32.mxu1 %v7572_v30  ;;  %6080 = vmatpush3.msra.mxu0 %v513_v31 }
  0xb2   : > { %6081 = vmatprep.subr.mxu0 %v512_v33 }
  0xb3   : > { %6082 = vmatpush3.msra.mxu0 %v512_v33 }
  0xb4   : > { %6131 = vmatmul.mubr.f32.gmra.mxu1 %v7576_v32  ;;  %6084 = vmatmul.mubr.f32.vlgmr.msra.gmra.mxu0 %v7570_v28 }
  0xb5   : > { %6133 = vmatprep.mubr.f32.mxu1 %v7578_v34  ;;  %6086 = vmatprep.mubr.f32.mxu0 %v7572_v30 }
  0xb6   : > { %6139 = vmatprep.subr.mxu0 %v777_v38 }
  0xb7   : > { %6140 = vmatpush3.msra.mxu0 %v777_v38 }
  0xb8   : > { %6134 = vmatmul.mubr.f32.gmra.mxu1 %v7583_v35  ;;  %6087 = vmatmul.mubr.f32.gmra.mxu0 %v7576_v32 }
  0xb9   : > { %6136 = vmatprep.mubr.f32.mxu1 %v7585_v36  ;;  %6089 = vmatprep.mubr.f32.mxu0 %v7578_v34 }
  0xba   : > { %6141 = vmatprep.subr.mxu0 %v776_v39 }
  0xbb   : > { %6142 = vmatpush3.msra.mxu0 %v776_v39 }
  0xbc   : > { %6137 = vmatmul.mubr.f32.gmra.mxu1 %v510_v37  ;;  %6090 = vmatmul.mubr.f32.gmra.mxu0 %v7583_v35 }
  0xbd   : > { %6092 = vmatprep.mubr.f32.mxu0 %v7585_v36  ;;  %6143 = vmatprep.subr.mxu0 %v775_v40 }
  0xbe   : > { %6144 = vmatpush3.msra.mxu0 %v775_v40 }
  0xbf   : > { %6145 = vmatprep.subr.mxu0 %v774_v41 }
  0xc0   : > { %6093 = vmatmul.mubr.f32.gmra.mxu0 %v510_v37 }
  0xc1   : > { %6171 = vmatprep.mubr.f32.mxu0 %v7567_v2  ;;  %6146 = vmatpush3.msra.mxu0 %v774_v41 }
  0xc2   : > { %6147 = vmatprep.subr.mxu0 %v773_v42 }
  0xc3   : > { %6148 = vmatpush3.msra.mxu0 %v773_v42 }
  0xc4   : > { %6149 = vmatprep.subr.mxu0 %v772_v43 }
  0xc5   : > { %6150 = vmatpush3.msra.mxu0 %v772_v43 }
  0xc6   : > { %6151 = vmatprep.subr.mxu0 %v771_v44 }
  0xc7   : > { %6152 = vmatpush3.msra.mxu0 %v771_v44 }
  0xc8   : > { %6153 = vmatprep.subr.mxu0 %v770_v45 }
  0xc9   : > { %6154 = vmatpush3.msra.mxu0 %v770_v45 }
  0xca   : > { %6155 = vmatprep.subr.mxu0 %v769_v46 }
  0xcb   : > { %6156 = vmatpush3.msra.mxu0 %v769_v46 }
  0xcc   : > { %6157 = vmatprep.subr.mxu0 %v768_v47 }
  0xcd   : > { %6158 = vmatpush3.msra.mxu0 %v768_v47 }
  0xce   : > { %6159 = vmatprep.subr.mxu0 %v767_v48 }
  0xcf   : > { %6160 = vmatpush3.msra.mxu0 %v767_v48 }
  0xd0   : > { %6161 = vmatprep.subr.mxu0 %v766_v49 }
  0xd1   : > { %6162 = vmatpush3.msra.mxu0 %v766_v49 }
  0xd2   : > { %6163 = vmatprep.subr.mxu0 %v765_v50 }
  0xd3   : > { %6164 = vmatpush3.msra.mxu0 %v765_v50 }
  0xd4   : > { %6165 = vmatprep.subr.mxu0 %v764_v51 }
  0xd5   : > { %6166 = vmatpush3.msra.mxu0 %v764_v51 }
  0xd6   : > { %6167 = vmatprep.subr.mxu0 %v763_v52 }
  0xd7   : > { %6168 = vmatpush3.msra.mxu0 %v763_v52 }
  0xd8   : > { %6169 = vmatprep.subr.mxu0 %v762_v53 }
  0xd9   : > { %6170 = vmatpush3.msra.mxu0 %v762_v53 }
  0xda   : > { %6172 = vmatmul.mubr.f32.vlgmr.msra.gmra.mxu0 %v7570_v28 }
  0xdb   : > { %6174 = vmatprep.mubr.f32.mxu0 %v7572_v30 }
  0xde   : > { %6175 = vmatmul.mubr.f32.gmra.mxu0 %v7576_v32  ;;  %v780_v32 = vsub.s32 2, %v7602_v55 }
  0xdf   : > { %6177 = vmatprep.mubr.f32.mxu0 %v7578_v34 }
  0xe2   : > { %6178 = vmatmul.mubr.f32.gmra.mxu0 %v7583_v35  ;;  %v781_v35 = vrot.slane %v7608_v59, %v780_v32 }
  0xe3   : > { %6180 = vmatprep.mubr.f32.mxu0 %v7585_v36 }
  0xe6   : > { %6181 = vmatmul.mubr.f32.gmra.mxu0 %v510_v37 }
 0x170   : > { %v6129_v56 = vpop.f32.mrf.mxu1 }
 0x171   : > { %v7651_v16 = vadd.f32 %v6129_v56, %v656_v5 }
 0x172   : > { %v723_v58 = vpop.f32.mrf.mxu1 }
 0x173   : > { %v7657_v18 = vadd.f32 %v723_v58, %v656_v5 }
 0x174   : > { %v6132_v60 = vpop.f32.mrf.mxu1  ;;  %v6085_v63 = vpop.f32.mrf.mxu0 }
 0x175   : > { %v7639_v12 = vadd.f32 %v6132_v60, %v656_v5  ;;  %v7667_v21 = vadd.f32 %v6085_v63, %v531_v61 }
 0x176   : > { %v733_v62 = vpop.f32.mrf.mxu1  ;;  %v598_v2 = vpop.f32.mrf.mxu0 }
 0x177   : > { %v7612_v3 = vadd.f32 %v598_v2, %v531_v61  ;;  %v7645_v14 = vadd.f32 %v733_v62, %v656_v5 }
 0x178   : > { %v6135_v1 = vpop.f32.mrf.mxu1  ;;  %v6088_v13 = vpop.f32.mrf.mxu0 }
 0x179   : > { %6199 = vmatprep.mubr.msk.f32.mxu1 %vm894_vm7, %v7612_v3  ;;  %v7627_v10 = vadd.f32 %v6135_v1, %v656_v5  ;;  %v7669_v23 = vadd.f32 %v6088_v13, %v531_v61 }
 0x17a   : > { %v743_v4 = vpop.f32.mrf.mxu1  ;;  %v608_v15 = vpop.f32.mrf.mxu0 }
 0x17b   : > { %v7633_v11 = vadd.f32 %v743_v4, %v656_v5  ;;  %v7665_v20 = vadd.f32 %v608_v15, %v531_v61 }
 0x17c   : > { %v6138_v6 = vpop.f32.mrf.mxu1  ;;  %v6091_v17 = vpop.f32.mrf.mxu0 }
 0x17d   : > { %v7617_v7 = vadd.f32 %v6138_v6, %v656_v5  ;;  %v7677_v26 = vadd.f32 %v6091_v17, %v531_v61 }
 0x17e   : > { %v753_v8 = vpop.f32.mrf.mxu1  ;;  %v618_v19 = vpop.f32.mrf.mxu0 }
 0x17f   : > { %v7619_v9 = vadd.f32 %v753_v8, %v656_v5  ;;  %6183 = vmatprep.subr.msk.mxu1 %vm894_vm7, %v7617_v7  ;;  %v7675_v24 = vadd.f32 %v618_v19, %v531_v61 }
 0x180   : > { %6184 = vmatpush3.xpose.msk.msra.mxu1 %vm894_vm7, %v7617_v7  ;;  %v6094_v22 = vpop.f32.mrf.mxu0 }
 0x181   : > { %6185 = vmatprep.subr.msk.mxu1 %vm894_vm7, %v7619_v9  ;;  %v7685_v28 = vadd.f32 %v6094_v22, %v531_v61 }
 0x182   : > { %v628_v25 = vpop.f32.mrf.mxu0 }
 0x183   : > { %v7683_v27 = vadd.f32 %v628_v25, %v531_v61 }
 0x184   : > { %6186 = vmatpush3.xpose.msk.msra.mxu1 %vm894_vm7, %v7619_v9 }
 0x185   : > { %6187 = vmatprep.subr.msk.mxu1 %vm894_vm7, %v7627_v10 }
 0x188   : > { %6188 = vmatpush3.xpose.msk.msra.mxu1 %vm894_vm7, %v7627_v10 }
 0x189   : > { %6189 = vmatprep.subr.msk.mxu1 %vm894_vm7, %v7633_v11 }
 0x18c   : > { %6190 = vmatpush3.xpose.msk.msra.mxu1 %vm894_vm7, %v7633_v11 }
 0x18d   : > { %6191 = vmatprep.subr.msk.mxu1 %vm894_vm7, %v7639_v12 }
 0x190   : > { %6192 = vmatpush3.xpose.msk.msra.mxu1 %vm894_vm7, %v7639_v12 }
 0x191   : > { %6193 = vmatprep.subr.msk.mxu1 %vm894_vm7, %v7645_v14 }
 0x194   : > { %6194 = vmatpush3.xpose.msk.msra.mxu1 %vm894_vm7, %v7645_v14 }
 0x195   : > { %6195 = vmatprep.subr.msk.mxu1 %vm894_vm7, %v7651_v16 }
 0x198   : > { %6196 = vmatpush3.xpose.msk.msra.mxu1 %vm894_vm7, %v7651_v16 }
 0x199   : > { %6197 = vmatprep.subr.msk.mxu1 %vm894_vm7, %v7657_v18 }
 0x19a   : > { %v6173_v29 = vpop.f32.mrf.mxu0 }
 0x19b   : > { %v7741_v61 = vadd.f32 %v6173_v29, %v781_v35 }
 0x19c   : > { %6198 = vmatpush3.xpose.msk.msra.mxu1 %vm894_vm7, %v7657_v18  ;;  %v848_v30 = vpop.f32.mrf.mxu0 }
 0x19d   : > { %v7745_v62 = vadd.f32 %v848_v30, %v781_v35 }
 0x19e   : > { %v6176_v31 = vpop.f32.mrf.mxu0 }
 0x19f   : > { %6200 = vmatmul.mubr.msk.f32.vlgmr.msra.gmra.mxu1 %vm894_vm7, %v7667_v21  ;;  %v7733_v59 = vadd.f32 %v6176_v31, %v781_v35 }
 0x1a0   : > { %6202 = vmatprep.mubr.msk.f32.mxu1 %vm894_vm7, %v7665_v20  ;;  %v858_v33 = vpop.f32.mrf.mxu0 }
 0x1a1   : > { %v7737_v60 = vadd.f32 %v858_v33, %v781_v35 }
 0x1a2   : > { %v6179_v34 = vpop.f32.mrf.mxu0 }
 0x1a3   : > { %6203 = vmatmul.mubr.msk.f32.gmra.mxu1 %vm894_vm7, %v7669_v23  ;;  %v7721_v54 = vadd.f32 %v6179_v34, %v781_v35 }
 0x1a4   : > { %6205 = vmatprep.mubr.msk.f32.mxu1 %vm894_vm7, %v7675_v24  ;;  %v868_v36 = vpop.f32.mrf.mxu0 }
 0x1a5   : > { %v7729_v58 = vadd.f32 %v868_v36, %v781_v35 }
 0x1a6   : > { %v6182_v37 = vpop.f32.mrf.mxu0 }
 0x1a7   : > { %6206 = vmatmul.mubr.msk.f32.gmra.mxu1 %vm894_vm7, %v7677_v26  ;;  %v7695_v38 = vadd.f32 %v6182_v37, %v781_v35 }
 0x1a8   : > { %6208 = vmatprep.mubr.msk.f32.mxu1 %vm894_vm7, %v7683_v27  ;;  %v878_v52 = vpop.f32.mrf.mxu0 }
 0x1a9   : > { %6211 = vmatprep.subr.mxu0 %v7695_v38  ;;  %v7723_v55 = vadd.f32 %v878_v52, %v781_v35 }
 0x1aa   : > { %6212 = vmatpush3.msra.mxu0 %v7695_v38 }
 0x1ab   : > { %6209 = vmatmul.mubr.msk.f32.gmra.mxu1 %vm894_vm7, %v7685_v28  ;;  %6213 = vmatprep.subr.mxu0 %v7723_v55 }
 0x1ac   : > { %6214 = vmatpush3.msra.mxu0 %v7723_v55 }
 0x1ad   : > { %6215 = vmatprep.subr.mxu0 %v7721_v54 }
 0x1ae   : > { %6216 = vmatpush3.msra.mxu0 %v7721_v54 }
 0x1af   : > { %6217 = vmatprep.subr.mxu0 %v7729_v58 }
 0x1b0   : > { %6218 = vmatpush3.msra.mxu0 %v7729_v58 }
 0x1b1   : > { %6219 = vmatprep.subr.mxu0 %v7733_v59 }
 0x1b2   : > { %6220 = vmatpush3.msra.mxu0 %v7733_v59 }
 0x1b3   : > { %6221 = vmatprep.subr.mxu0 %v7737_v60 }
 0x1b4   : > { %6222 = vmatpush3.msra.mxu0 %v7737_v60 }
 0x1b5   : > { %6223 = vmatprep.subr.mxu0 %v7741_v61 }
 0x1b6   : > { %6224 = vmatpush3.msra.mxu0 %v7741_v61 }
 0x1b7   : > { %6225 = vmatprep.subr.mxu0 %v7745_v62 }
 0x1b8   : > { %6226 = vmatpush3.msra.mxu0 %v7745_v62 }
 0x25f   : > { %v6201_v39 = vpop.f32.mrf.mxu1 }
 0x260   : > { %v1052_v40 = vsel %vm1048_vm8, %v6201_v39, -inf }
 0x261   : > { %1053 = vmax.xlane.f32.xlu0 %v1052_v40  ;;  %v1009_v41 = vpop.f32.mrf.mxu1 }
 0x262   : > { %v1049_v43 = vsel %vm1048_vm8, %v1009_v41, -inf }
 0x263   : > { %v7700_v42 = vpop.f32.mrf.mxu1 }
 0x264   : > { %v1058_v44 = vsel %vm1048_vm8, %v7700_v42, -inf }
 0x265   : > { %1050 = vmax.xlane.f32.xlu0 %v1049_v43  ;;  %1059 = vmax.xlane.f32.xlu1 %v1058_v44  ;;  %v7705_v45 = vpop.f32.mrf.mxu1 }
 0x266   : > { %v1055_v46 = vsel %vm1048_vm8, %v7705_v45, -inf }
 0x267   : > { %v7709_v47 = vpop.f32.mrf.mxu1 }
 0x268   : > { %v1064_v50 = vsel %vm1048_vm8, %v7709_v47, -inf }
 0x269   : > { %1056 = vmax.xlane.f32.xlu1 %v1055_v46  ;;  %v7711_v48 = vpop.f32.mrf.mxu1 }
 0x26a   : > { %v1061_v49 = vsel %vm1048_vm8, %v7711_v48, -inf }
 0x26b   : > { %1062 = vmax.xlane.f32.xlu0 %v1061_v49  ;;  %v7717_v51 = vpop.f32.mrf.mxu1 }
 0x26c   : > { %v1070_v57 = vsel %vm1048_vm8, %v7717_v51, -inf }
 0x26d   : > { %1065 = vmax.xlane.f32.xlu1 %v1064_v50  ;;  %v7719_v53 = vpop.f32.mrf.mxu1 }
 0x26e   : > { %v1067_v56 = vsel %vm1048_vm8, %v7719_v53, -inf }
 0x26f   : > { %1068 = vmax.xlane.f32.xlu0 %v1067_v56 }
 0x271   : > { %1071 = vmax.xlane.f32.xlu1 %v1070_v57 }
 0x282   : > { %1433 = vrot.lane.b32.xlu1 %v7619_v9, %s7325_s8 }
 0x285   : > { %1435 = vrot.lane.b32.xlu0 %v7617_v7, %s7325_s8 }
 0x286   : > { %1431 = vrot.lane.b32.xlu1 %v7627_v10, %s7325_s8 }
 0x28a   : > { %1429 = vrot.lane.b32.xlu1 %v7633_v11, %s7325_s8 }
 0x2ea   : > { %v1054_v63 = vpop.xlane.xlu0 %1053 }
 0x2eb   : > { %v1074_v0 = vsub.f32 %v6201_v39, %v1054_v63 }
 0x2ed   : > { %v1083_v1 = vmul.f32 1.442695, %v1074_v0 }
 0x2ee   : > { %v1051_v2 = vpop.xlane.xlu0 %1050  ;;  %v1060_v25 = vpop.xlane.xlu1 %1059 }
 0x2ef   : > { %6857 = vpow2.f32 %v1083_v1  ;;  %v1073_v4 = vsub.f32 %v1009_v41, %v1051_v2  ;;  %v1076_v31 = vsub.f32 %v7700_v42, %v1060_v25 }
 0x2f1   : > { %v1081_v5 = vmul.f32 1.442695, %v1073_v4  ;;  %v1087_v33 = vmul.f32 1.442695, %v1076_v31 }
 0x2f2   : > { %v1057_v29 = vpop.xlane.xlu1 %1056 }
 0x2f3   : > { %6859 = vpow2.f32 %v1081_v5  ;;  %v1075_v32 = vsub.f32 %v7705_v45, %v1057_v29 }
 0x2f4   : > { %v1063_v6 = vpop.xlane.xlu0 %1062  ;;  %6861 = vpow2.f32 %v1087_v33 }
 0x2f5   : > { %v1085_v36 = vmul.f32 1.442695, %v1075_v32  ;;  %v1077_v37 = vsub.f32 %v7711_v48, %v1063_v6 }
 0x2f6   : > { %v1066_v30 = vpop.xlane.xlu1 %1065 }
 0x2f7   : > { %v1078_v34 = vsub.f32 %v7709_v47, %v1066_v30  ;;  %6863 = vpow2.f32 %v1085_v36  ;;  %v1089_v41 = vmul.f32 1.442695, %v1077_v37 }
 0x2f8   : > { %v1069_v8 = vpop.xlane.xlu0 %1068 }
 0x2f9   : > { %v1091_v39 = vmul.f32 1.442695, %v1078_v34  ;;  %v1079_v43 = vsub.f32 %v7719_v53, %v1069_v8 }
 0x2fa   : > { %v1072_v35 = vpop.xlane.xlu1 %1071 }
 0x2fb   : > { %v1080_v40 = vsub.f32 %v7717_v51, %v1072_v35  ;;  %6865 = vpow2.f32 %v1091_v39  ;;  %v1093_v42 = vmul.f32 1.442695, %v1079_v43 }
 0x2fc   : > { %v7761_v13 = vpop.eup %6857  ;;  %v7763_v15 = vpop.permute.xlu0 %1435  ;;  %6867 = vpow2.f32 %v1089_v41 }
 0x2fd   : > { %6255 = vmatprep.subr.msk.mxu0 %vm894_vm7, %v7763_v15  ;;  %v1100_v17 = vsel %vm1048_vm8, %v7761_v13, 0.0  ;;  %v1095_v44 = vmul.f32 1.442695, %v1080_v40 }
 0x2fe   : > { %1101 = vadd.xlane.f32.xlu1 %v1100_v17  ;;  %v1434_v0 = vpop.permute.xlu1 %1433 }
 0x2ff   : > { %6869 = vpow2.f32 %v1095_v44 }
 0x300   : > { %v7769_v19 = vpop.eup %6859  ;;  %6871 = vpow2.f32 %v1093_v42 }
 0x301   : > { %v1097_v22 = vsel %vm1048_vm8, %v7769_v19, 0.0  ;;  %v7783_v45 = vpop.eup %6861 }
 0x302   : > { %1098 = vadd.xlane.f32.xlu0 %v1097_v22  ;;  %v1106_v47 = vsel %vm1048_vm8, %v7783_v45, 0.0  ;;  %v1432_v1 = vpop.permute.xlu1 %1431 }
 0x304   : > { %v7785_v46 = vpop.eup %6863 }
 0x305   : > { %v1103_v51 = vsel %vm1048_vm8, %v7785_v46, 0.0 }
 0x306   : > { %v1430_v2 = vpop.permute.xlu1 %1429 }
 0x308   : > { %v7789_v48 = vpop.eup %6865 }
 0x309   : > { %v7791_v49 = vpop.eup %6867  ;;  %v1112_v50 = vsel %vm1048_vm8, %v7789_v48, 0.0 }
 0x30a   : > { %v1109_v56 = vsel %vm1048_vm8, %v7791_v49, 0.0 }
 0x30c   : > { %v7797_v52 = vpop.eup %6869 }
 0x30d   : > { %v1118_v53 = vsel %vm1048_vm8, %v7797_v52, 0.0  ;;  %v7803_v57 = vpop.eup %6871 }
 0x30e   : > { %v1115_v63 = vsel %vm1048_vm8, %v7803_v57, 0.0 }
 0x30f   : > { %1425 = vrot.lane.b32.xlu1 %v7645_v14, %s7325_s8 }
 0x318   : > { %1427 = vrot.lane.b32.xlu0 %v7639_v12, %s7325_s8 }
 0x333   : > { %1107 = vadd.xlane.f32.xlu1 %v1106_v47 }
 0x337   : > { %1113 = vadd.xlane.f32.xlu1 %v1112_v50  ;;  %1104 = vadd.xlane.f32.xlu0 %v1103_v51 }
 0x33b   : > { %1119 = vadd.xlane.f32.xlu1 %v1118_v53  ;;  %1110 = vadd.xlane.f32.xlu0 %v1109_v56 }
 0x33f   : > { %1116 = vadd.xlane.f32.xlu0 %v1115_v63 }
 0x34c   : > { %1421 = vrot.lane.b32.xlu1 %v7657_v18, %s7325_s8 }
 0x350   : > { %1407 = vrot.lane.b32.xlu1 %v7667_v21, %s7325_s8 }
 0x354   : > { %1411 = vrot.lane.b32.xlu1 %v7669_v23, %s7325_s8 }
 0x355   : > { %1423 = vrot.lane.b32.xlu0 %v7651_v16, %s7325_s8 }
 0x358   : > { %1415 = vrot.lane.b32.xlu1 %v7677_v26, %s7325_s8 }
 0x359   : > { %1405 = vrot.lane.b32.xlu0 %v7612_v3, %s7325_s8 }
 0x35c   : > { %1419 = vrot.lane.b32.xlu1 %v7685_v28, %s7325_s8 }
 0x35d   : > { %1409 = vrot.lane.b32.xlu0 %v7665_v20, %s7325_s8 }
 0x360   : > { %1990 = vrot.lane.b32.xlu1 %v7619_v9, %s7326_s11 }
 0x361   : > { %1413 = vrot.lane.b32.xlu0 %v7675_v24, %s7325_s8 }
 0x364   : > { %1986 = vrot.lane.b32.xlu1 %v7633_v11, %s7326_s11 }
 0x365   : > { %1417 = vrot.lane.b32.xlu0 %v7683_v27, %s7325_s8 }
 0x368   : > { %1982 = vrot.lane.b32.xlu1 %v7645_v14, %s7326_s11 }
 0x369   : > { %1992 = vrot.lane.b32.xlu0 %v7617_v7, %s7326_s11 }
 0x36c   : > { %1978 = vrot.lane.b32.xlu1 %v7657_v18, %s7326_s11 }
 0x36d   : > { %1988 = vrot.lane.b32.xlu0 %v7627_v10, %s7326_s11 }
 0x370   : > { %1964 = vrot.lane.b32.xlu1 %v7667_v21, %s7326_s11 }
 0x371   : > { %1984 = vrot.lane.b32.xlu0 %v7639_v12, %s7326_s11 }
 0x374   : > { %1968 = vrot.lane.b32.xlu1 %v7669_v23, %s7326_s11 }
 0x375   : > { %1980 = vrot.lane.b32.xlu0 %v7651_v16, %s7326_s11 }
 0x378   : > { %1972 = vrot.lane.b32.xlu1 %v7677_v26, %s7326_s11 }
 0x379   : > { %1962 = vrot.lane.b32.xlu0 %v7612_v3, %s7326_s11 }
 0x37c   : > { %1976 = vrot.lane.b32.xlu1 %v7685_v28, %s7326_s11 }
 0x37d   : > { %1966 = vrot.lane.b32.xlu0 %v7665_v20, %s7326_s11 }
 0x381   : > { %1970 = vrot.lane.b32.xlu0 %v7675_v24, %s7326_s11 }
 0x385   : > { %1974 = vrot.lane.b32.xlu0 %v7683_v27, %s7326_s11 }
 0x387   : > { %v1102_v4 = vpop.xlane.xlu1 %1101 }
 0x388   : > { %6873 = vrcp.f32 %v1102_v4 }
 0x38b   : > { %v1099_v5 = vpop.xlane.xlu0 %1098 }
 0x38c   : > { %6875 = vrcp.f32 %v1099_v5 }
 0x395   : > { %v6874_v6 = vpop.eup %6873 }
 0x396   : > { %v1130_v22 = vmul.f32 %v6874_v6, %v7761_v13  ;;  %v1426_v13 = vpop.permute.xlu1 %1425 }
 0x399   : > { %v6876_v8 = vpop.eup %6875 }
 0x39a   : > { %v1129_v17 = vmul.f32 %v6876_v8, %v7769_v19  ;;  %v1428_v19 = vpop.permute.xlu0 %1427 }
 0x39c   : > { %6227 = vmatprep.mubr.msk.f32.mxu0 %vm1048_vm8, %v1129_v17 }
 0x39d   : > { %6228 = vmatmul.mubr.msk.f32.vlgmr.msra.gmra.mxu0 %vm1048_vm8, %v1130_v22 }
 0x39e   : > { %6256 = vmatpush3.xpose.msk.msra.mxu0 %vm894_vm7, %v7763_v15 }
 0x39f   : > { %6257 = vmatprep.subr.msk.mxu0 %vm894_vm7, %v1434_v0 }
 0x3a2   : > { %6258 = vmatpush3.xpose.msk.msra.mxu0 %vm894_vm7, %v1434_v0 }
 0x3a3   : > { %6259 = vmatprep.subr.msk.mxu0 %vm894_vm7, %v1432_v1 }
 0x3a6   : > { %6260 = vmatpush3.xpose.msk.msra.mxu0 %vm894_vm7, %v1432_v1 }
 0x3a7   : > { %6261 = vmatprep.subr.msk.mxu0 %vm894_vm7, %v1430_v2 }
 0x3aa   : > { %6262 = vmatpush3.xpose.msk.msra.mxu0 %vm894_vm7, %v1430_v2  ;;  %v1266_v2 = vld [vmem:[#allocation11] sm:$0xff] }
 0x3ab   : > { %6263 = vmatprep.subr.msk.mxu0 %vm894_vm7, %v1428_v19 }
 0x3ae   : > { %6264 = vmatpush3.xpose.msk.msra.mxu0 %vm894_vm7, %v1428_v19 }
 0x3af   : > { %6265 = vmatprep.subr.msk.mxu0 %vm894_vm7, %v1426_v13 }
 0x3b2   : > { %6266 = vmatpush3.xpose.msk.msra.mxu0 %vm894_vm7, %v1426_v13 }
 0x3bc   : > { %v1108_v15 = vpop.xlane.xlu1 %1107 }
 0x3bd   : > { %6877 = vrcp.f32 %v1108_v15 }
 0x3c0   : > { %v1114_v25 = vpop.xlane.xlu1 %1113  ;;  %v1105_v29 = vpop.xlane.xlu0 %1104 }
 0x3c1   : > { %6879 = vrcp.f32 %v1105_v29 }
 0x3c2   : > { %6881 = vrcp.f32 %v1114_v25 }
 0x3c4   : > { %v1120_v30 = vpop.xlane.xlu1 %1119  ;;  %v1111_v31 = vpop.xlane.xlu0 %1110 }
 0x3c5   : > { %6883 = vrcp.f32 %v1111_v31 }
 0x3c6   : > { %6885 = vrcp.f32 %v1120_v30 }
 0x3c8   : > { %v1422_v32 = vpop.permute.xlu1 %1421  ;;  %v1117_v33 = vpop.xlane.xlu0 %1116 }
 0x3c9   : > { %6887 = vrcp.f32 %v1117_v33 }
 0x3ca   : > { %v6878_v36 = vpop.eup %6877 }
 0x3cb   : > { %v1132_v43 = vmul.f32 %v6878_v36, %v7783_v45 }
 0x3cc   : > { %v1408_v34 = vpop.permute.xlu1 %1407  ;;  %v1424_v35 = vpop.permute.xlu0 %1423 }
 0x3cd   : > { %6267 = vmatprep.subr.msk.mxu0 %vm894_vm7, %v1424_v35 }
 0x3ce   : > { %6268 = vmatpush3.xpose.msk.msra.mxu0 %vm894_vm7, %v1424_v35  ;;  %v6880_v37 = vpop.eup %6879 }
 0x3cf   : > { %6269 = vmatprep.subr.msk.mxu0 %vm894_vm7, %v1422_v32  ;;  %v1131_v41 = vmul.f32 %v6880_v37, %v7785_v46  ;;  %v6882_v44 = vpop.eup %6881 }
 0x3d0   : > { %v1412_v39 = vpop.permute.xlu1 %1411  ;;  %v1406_v40 = vpop.permute.xlu0 %1405  ;;  %v1134_v53 = vmul.f32 %v6882_v44, %v7789_v48  ;;  %v1267_v48 = vld [vmem:[#allocation11 + $0x8] sm:$0xff] }
 0x3d1   : > { %6230 = vmatprep.mubr.msk.f32.mxu0 %vm1048_vm8, %v1131_v41  ;;  %6239 = vmatprep.subr.mxu1 %v1267_v48 }
 0x3d2   : > { %6270 = vmatpush3.xpose.msk.msra.mxu0 %vm894_vm7, %v1422_v32  ;;  %v6884_v42 = vpop.eup %6883  ;;  %6240 = vmatpush3.msra.mxu1 %v1267_v48 }
 0x3d3   : > { %6231 = vmatmul.mubr.msk.f32.gmra.mxu0 %vm1048_vm8, %v1132_v43  ;;  %v1133_v50 = vmul.f32 %v6884_v42, %v7791_v49  ;;  %v6886_v51 = vpop.eup %6885  ;;  %6241 = vmatprep.subr.mxu1 %v1266_v2 }
 0x3d4   : > { %v1410_v47 = vpop.permute.xlu0 %1409  ;;  %v1416_v63 = vpop.permute.xlu1 %1415  ;;  %v1136_v0 = vmul.f32 %v6886_v51, %v7797_v52  ;;  %6242 = vmatpush3.msra.mxu1 %v1266_v2 }
 0x3d5   : > { %6233 = vmatprep.mubr.msk.f32.mxu0 %vm1048_vm8, %v1133_v50 }
 0x3d6   : > { %v6888_v56 = vpop.eup %6887 }
 0x3d7   : > { %6234 = vmatmul.mubr.msk.f32.gmra.mxu0 %vm1048_vm8, %v1134_v53  ;;  %v1135_v45 = vmul.f32 %v6888_v56, %v7803_v57 }
 0x3d8   : > { %v1414_v46 = vpop.permute.xlu0 %1413  ;;  %v1420_v1 = vpop.permute.xlu1 %1419 }
 0x3d9   : > { %6236 = vmatprep.mubr.msk.f32.mxu0 %vm1048_vm8, %v1135_v45 }
 0x3db   : > { %6237 = vmatmul.mubr.msk.f32.gmra.mxu0 %vm1048_vm8, %v1136_v0 }
 0x3dc   : > { %6271 = vmatprep.mubr.msk.f32.mxu0 %vm894_vm7, %v1406_v40  ;;  %v1418_v49 = vpop.permute.xlu0 %1417  ;;  %v1991_v52 = vpop.permute.xlu1 %1990 }
 0x3df   : > { %6272 = vmatmul.mubr.msk.f32.vlgmr.msra.gmra.mxu0 %vm894_vm7, %v1408_v34 }
 0x3e0   : > { %6274 = vmatprep.mubr.msk.f32.mxu0 %vm894_vm7, %v1410_v47  ;;  %v1993_v57 = vpop.permute.xlu0 %1992  ;;  %v1987_v5 = vpop.permute.xlu1 %1986 }
 0x3e1   : > { %6327 = vmatprep.subr.msk.mxu0 %vm894_vm7, %v1993_v57 }
 0x3e2   : > { %6328 = vmatpush3.xpose.msk.msra.mxu0 %vm894_vm7, %v1993_v57 }
 0x3e3   : > { %6275 = vmatmul.mubr.msk.f32.gmra.mxu0 %vm894_vm7, %v1412_v39  ;;  %6329 = vmatprep.subr.msk.mxu0 %vm894_vm7, %v1991_v52 }
 0x3e4   : > { %6277 = vmatprep.mubr.msk.f32.mxu0 %vm894_vm7, %v1414_v46  ;;  %v1989_v4 = vpop.permute.xlu0 %1988  ;;  %v1983_v17 = vpop.permute.xlu1 %1982 }
 0x3e6   : > { %6330 = vmatpush3.xpose.msk.msra.mxu0 %vm894_vm7, %v1991_v52 }
 0x3e7   : > { %6278 = vmatmul.mubr.msk.f32.gmra.mxu0 %vm894_vm7, %v1416_v63  ;;  %6331 = vmatprep.subr.msk.mxu0 %vm894_vm7, %v1989_v4 }
 0x3e8   : > { %6280 = vmatprep.mubr.msk.f32.mxu0 %vm894_vm7, %v1418_v49  ;;  %v1985_v6 = vpop.permute.xlu0 %1984  ;;  %v1979_v19 = vpop.permute.xlu1 %1978 }
 0x3ea   : > { %6332 = vmatpush3.xpose.msk.msra.mxu0 %vm894_vm7, %v1989_v4 }
 0x3eb   : > { %6281 = vmatmul.mubr.msk.f32.gmra.mxu0 %vm894_vm7, %v1420_v1  ;;  %6333 = vmatprep.subr.msk.mxu0 %vm894_vm7, %v1987_v5 }
 0x3ec   : > { %v1981_v8 = vpop.permute.xlu0 %1980  ;;  %v1965_v13 = vpop.permute.xlu1 %1964 }
 0x3ee   : > { %6334 = vmatpush3.xpose.msk.msra.mxu0 %vm894_vm7, %v1987_v5 }
 0x3ef   : > { %6335 = vmatprep.subr.msk.mxu0 %vm894_vm7, %v1985_v6 }
 0x3f0   : > { %v1963_v22 = vpop.permute.xlu0 %1962  ;;  %v1969_v25 = vpop.permute.xlu1 %1968 }
 0x3f1   : > { %6343 = vmatprep.mubr.msk.f32.mxu0 %vm894_vm7, %v1963_v22 }
 0x3f2   : > { %6336 = vmatpush3.xpose.msk.msra.mxu0 %vm894_vm7, %v1985_v6 }
 0x3f3   : > { %6337 = vmatprep.subr.msk.mxu0 %vm894_vm7, %v1983_v17 }
 0x3f4   : > { %v1967_v15 = vpop.permute.xlu0 %1966  ;;  %v1973_v30 = vpop.permute.xlu1 %1972 }
 0x3f6   : > { %6338 = vmatpush3.xpose.msk.msra.mxu0 %vm894_vm7, %v1983_v17 }
 0x3f7   : > { %6339 = vmatprep.subr.msk.mxu0 %vm894_vm7, %v1981_v8 }
 0x3f8   : > { %v1971_v29 = vpop.permute.xlu0 %1970  ;;  %v1977_v32 = vpop.permute.xlu1 %1976 }
 0x3fa   : > { %6340 = vmatpush3.xpose.msk.msra.mxu0 %vm894_vm7, %v1981_v8 }
 0x3fb   : > { %6341 = vmatprep.subr.msk.mxu0 %vm894_vm7, %v1979_v19 }
 0x3fc   : > { %v1975_v31 = vpop.permute.xlu0 %1974 }
 0x3fe   : > { %6342 = vmatpush3.xpose.msk.msra.mxu0 %vm894_vm7, %v1979_v19 }
 0x401   : > { %6344 = vmatmul.mubr.msk.f32.vlgmr.msra.gmra.mxu0 %vm894_vm7, %v1965_v13 }
 0x402   : > { %6346 = vmatprep.mubr.msk.f32.mxu0 %vm894_vm7, %v1967_v15 }
 0x405   : > { %6347 = vmatmul.mubr.msk.f32.gmra.mxu0 %vm894_vm7, %v1969_v25 }
 0x406   : > { %6349 = vmatprep.mubr.msk.f32.mxu0 %vm894_vm7, %v1971_v29 }
 0x409   : > { %6350 = vmatmul.mubr.msk.f32.gmra.mxu0 %vm894_vm7, %v1973_v30 }
 0x40a   : > { %6352 = vmatprep.mubr.msk.f32.mxu0 %vm894_vm7, %v1975_v31 }
 0x40d   : > { %6353 = vmatmul.mubr.msk.f32.gmra.mxu0 %vm894_vm7, %v1977_v32 }
 0x45d   : > { %v6229_v33 = vpop.f32.mrf.mxu0 }
 0x45f   : > { %v1227_v34 = vpop.f32.mrf.mxu0 }
 0x460   : > { %6243 = vmatprep.mubr.msk.f32.mxu1 %vm894_vm7, %v1227_v34 }
 0x461   : > { %6244 = vmatmul.mubr.msk.f32.vlgmr.msra.gmra.mxu1 %vm894_vm7, %v6229_v33 }
 0x493   : > { %v6232_v35 = vpop.f32.mrf.mxu0 }
 0x495   : > { %v1237_v36 = vpop.f32.mrf.mxu0 }
 0x496   : > { %6246 = vmatprep.mubr.msk.f32.mxu1 %vm894_vm7, %v1237_v36 }
 0x497   : > { %v6235_v37 = vpop.f32.mrf.mxu0  ;;  %6247 = vmatmul.mubr.msk.f32.gmra.mxu1 %vm894_vm7, %v6232_v35 }
 0x499   : > { %v1247_v39 = vpop.f32.mrf.mxu0 }
 0x49a   : > { %6249 = vmatprep.mubr.msk.f32.mxu1 %vm894_vm7, %v1247_v39 }
 0x49b   : > { %v6238_v40 = vpop.f32.mrf.mxu0  ;;  %6250 = vmatmul.mubr.msk.f32.gmra.mxu1 %vm894_vm7, %v6235_v37 }
 0x49d   : > { %v1257_v41 = vpop.f32.mrf.mxu0 }
 0x49e   : > { %6252 = vmatprep.mubr.msk.f32.mxu1 %vm894_vm7, %v1257_v41 }
 0x49f   : > { %6253 = vmatmul.mubr.msk.f32.gmra.mxu1 %vm894_vm7, %v6238_v40  ;;  %v6273_v43 = vpop.f32.mrf.mxu0 }
 0x4a0   : > { %v1577_v44 = vsel %vm1048_vm8, %v6273_v43, -inf }
 0x4a1   : > { %1578 = vmax.xlane.f32.xlu1 %v1577_v44  ;;  %v1535_v42 = vpop.f32.mrf.mxu0 }
 0x4a2   : > { %v1574_v47 = vsel %vm1048_vm8, %v1535_v42, -inf }
 0x4a3   : > { %1575 = vmax.xlane.f32.xlu0 %v1574_v47  ;;  %v6276_v50 = vpop.f32.mrf.mxu0 }
 0x4a4   : > { %v1583_v53 = vsel %vm1048_vm8, %v6276_v50, -inf }
 0x4a5   : > { %v1545_v51 = vpop.f32.mrf.mxu0 }
 0x4a6   : > { %v1580_v46 = vsel %vm1048_vm8, %v1545_v51, -inf }
 0x4a7   : > { %1584 = vmax.xlane.f32.xlu0 %v1583_v53  ;;  %v6279_v56 = vpop.f32.mrf.mxu0 }
 0x4a8   : > { %v1589_v63 = vsel %vm1048_vm8, %v6279_v56, -inf }
 0x4a9   : > { %1590 = vmax.xlane.f32.xlu1 %v1589_v63  ;;  %v1555_v45 = vpop.f32.mrf.mxu0 }
 0x4aa   : > { %v1586_v49 = vsel %vm1048_vm8, %v1555_v45, -inf }
 0x4ab   : > { %1581 = vmax.xlane.f32.xlu0 %v1580_v46  ;;  %v6282_v0 = vpop.f32.mrf.mxu0 }
 0x4ac   : > { %v1595_v1 = vsel %vm1048_vm8, %v6282_v0, -inf }
 0x4ad   : > { %1596 = vmax.xlane.f32.xlu1 %v1595_v1  ;;  %v1565_v48 = vpop.f32.mrf.mxu0 }
 0x4ae   : > { %v1592_v2 = vsel %vm1048_vm8, %v1565_v48, -inf }
 0x4af   : > { %1587 = vmax.xlane.f32.xlu0 %v1586_v49 }
 0x4b3   : > { %1593 = vmax.xlane.f32.xlu0 %v1592_v2 }
 0x4be   : > { %1682 = vrot.lane.b32.xlu1 %v7723_v55, %s7325_s8 }
 0x4c2   : > { %1680 = vrot.lane.b32.xlu1 %v7721_v54, %s7325_s8 }
 0x4c6   : > { %1678 = vrot.lane.b32.xlu1 %v7729_v58, %s7325_s8 }
 0x4c9   : > { %1684 = vrot.lane.b32.xlu0 %v7695_v38, %s7325_s8 }
 0x4ca   : > { %1674 = vrot.lane.b32.xlu1 %v7737_v60, %s7325_s8 }
 0x4cd   : > { %1676 = vrot.lane.b32.xlu0 %v7733_v59, %s7325_s8 }
 0x52a   : > { %v1579_v57 = vpop.xlane.xlu1 %1578 }
 0x52b   : > { %v1599_v52 = vsub.f32 %v6273_v43, %v1579_v57 }
 0x52c   : > { %v1576_v4 = vpop.xlane.xlu0 %1575 }
 0x52d   : > { %v1608_v5 = vmul.f32 1.442695, %v1599_v52  ;;  %v1598_v6 = vsub.f32 %v1535_v42, %v1576_v4 }
 0x52f   : > { %6889 = vpow2.f32 %v1608_v5  ;;  %v1606_v8 = vmul.f32 1.442695, %v1598_v6 }
 0x530   : > { %v1585_v17 = vpop.xlane.xlu0 %1584 }
 0x531   : > { %6891 = vpow2.f32 %v1606_v8  ;;  %v1601_v22 = vsub.f32 %v6276_v50, %v1585_v17  ;;  %v8019_v17 = vpop.f32.mrf.mxu0 }
 0x532   : > { %v1591_v19 = vpop.xlane.xlu1 %1590 }
 0x533   : > { %v1612_v13 = vmul.f32 1.442695, %v1601_v22  ;;  %v1603_v15 = vsub.f32 %v6279_v56, %v1591_v19  ;;  %v8021_v22 = vpop.f32.mrf.mxu0 }
 0x534   : > { %v1582_v25 = vpop.xlane.xlu0 %1581 }
 0x535   : > { %6893 = vpow2.f32 %v1612_v13  ;;  %v1616_v29 = vmul.f32 1.442695, %v1603_v15  ;;  %v1600_v30 = vsub.f32 %v1545_v51, %v1582_v25  ;;  %v8023_v19 = vpop.f32.mrf.mxu0  ;;  %v2134_v25 = vsel %vm1048_vm8, %v8019_v17, -inf }
 0x536   : > { %v1597_v31 = vpop.xlane.xlu1 %1596 }
 0x537   : > { %6895 = vpow2.f32 %v1616_v29  ;;  %v1610_v32 = vmul.f32 1.442695, %v1600_v30  ;;  %v1605_v33 = vsub.f32 %v6282_v0, %v1597_v31  ;;  %v8025_v13 = vpop.f32.mrf.mxu0 }
 0x538   : > { %v1588_v34 = vpop.xlane.xlu0 %1587 }
 0x539   : > { %6897 = vpow2.f32 %v1610_v32  ;;  %v1620_v35 = vmul.f32 1.442695, %v1605_v33  ;;  %v1602_v36 = vsub.f32 %v1555_v45, %v1588_v34  ;;  %v8027_v15 = vpop.f32.mrf.mxu0  ;;  %v2131_v32 = vsel %vm1048_vm8, %v8021_v22, -inf }
 0x53a   : > { %v1683_v37 = vpop.permute.xlu1 %1682  ;;  %v2146_v30 = vsel %vm1048_vm8, %v8027_v15, -inf  ;;  %v2137_v34 = vsel %vm1048_vm8, %v8025_v13, -inf }
 0x53b   : > { %6899 = vpow2.f32 %v1620_v35  ;;  %v1614_v39 = vmul.f32 1.442695, %v1602_v36  ;;  %v8031_v29 = vpop.f32.mrf.mxu0  ;;  %v2140_v35 = vsel %vm1048_vm8, %v8023_v19, -inf }
 0x53c   : > { %v7951_v40 = vpop.eup %6889  ;;  %v1594_v41 = vpop.xlane.xlu0 %1593  ;;  %v2143_v36 = vsel %vm1048_vm8, %v8031_v29, -inf }
 0x53d   : > { %6901 = vpow2.f32 %v1614_v39  ;;  %v1604_v43 = vsub.f32 %v1565_v48, %v1594_v41  ;;  %v1625_v44 = vsel %vm1048_vm8, %v7951_v40, 0.0  ;;  %v8035_v31 = vpop.f32.mrf.mxu0 }
 0x53e   : > { %v7955_v42 = vpop.eup %6891  ;;  %1626 = vadd.xlane.f32.xlu1 %v1625_v44  ;;  %v1681_v50 = vpop.permute.xlu1 %1680  ;;  %v2152_v33 = vsel %vm1048_vm8, %v8035_v31, -inf }
 0x53f   : > { %v1618_v47 = vmul.f32 1.442695, %v1604_v43  ;;  %v1622_v51 = vsel %vm1048_vm8, %v7955_v42, 0.0 }
 0x540   : > { %1623 = vadd.xlane.f32.xlu0 %v1622_v51  ;;  %v1685_v53 = vpop.permute.xlu0 %1684 }
 0x541   : > { %6903 = vpow2.f32 %v1618_v47  ;;  %6283 = vmatprep.subr.mxu1 %v1685_v53 }
 0x542   : > { %v7959_v56 = vpop.eup %6893  ;;  %6284 = vmatpush3.msra.mxu1 %v1685_v53  ;;  %v1679_v46 = vpop.permute.xlu1 %1678 }
 0x543   : > { %6285 = vmatprep.subr.mxu1 %v1683_v37  ;;  %v1631_v63 = vsel %vm1048_vm8, %v7959_v56, 0.0 }
 0x544   : > { %v7963_v45 = vpop.eup %6895  ;;  %1632 = vadd.xlane.f32.xlu1 %v1631_v63  ;;  %6286 = vmatpush3.msra.mxu1 %v1683_v37  ;;  %v1677_v2 = vpop.permute.xlu0 %1676 }
 0x545   : > { %6287 = vmatprep.subr.mxu1 %v1681_v50  ;;  %v1637_v1 = vsel %vm1048_vm8, %v7963_v45, 0.0  ;;  %v8047_v37 = vpop.f32.mrf.mxu0 }
 0x546   : > { %v7965_v0 = vpop.eup %6897  ;;  %6288 = vmatpush3.msra.mxu1 %v1681_v50  ;;  %v1675_v52 = vpop.permute.xlu1 %1674  ;;  %v2149_v39 = vsel %vm1048_vm8, %v8047_v37, -inf }
 0x547   : > { %6289 = vmatprep.subr.mxu1 %v1679_v46  ;;  %v1628_v49 = vsel %vm1048_vm8, %v7965_v0, 0.0 }
 0x548   : > { %v7971_v48 = vpop.eup %6899  ;;  %1638 = vadd.xlane.f32.xlu1 %v1637_v1  ;;  %1629 = vadd.xlane.f32.xlu0 %v1628_v49 }
 0x549   : > { %6290 = vmatpush3.msra.mxu1 %v1679_v46  ;;  %v1643_v4 = vsel %vm1048_vm8, %v7971_v48, 0.0 }
 0x54a   : > { %v7973_v57 = vpop.eup %6901  ;;  %6291 = vmatprep.subr.mxu1 %v1677_v2 }
 0x54b   : > { %6292 = vmatpush3.msra.mxu1 %v1677_v2  ;;  %v1634_v5 = vsel %vm1048_vm8, %v7973_v57, 0.0 }
 0x54c   : > { %6293 = vmatprep.subr.mxu1 %v1675_v52  ;;  %1644 = vadd.xlane.f32.xlu1 %v1643_v4 }
 0x54d   : > { %1635 = vadd.xlane.f32.xlu0 %v1634_v5  ;;  %6294 = vmatpush3.msra.mxu1 %v1675_v52 }
 0x54e   : > { %v7979_v6 = vpop.eup %6903 }
 0x54f   : > { %v1640_v8 = vsel %vm1048_vm8, %v7979_v6, 0.0 }
 0x551   : > { %1641 = vadd.xlane.f32.xlu0 %v1640_v8 }
 0x55d   : > { %1670 = vrot.lane.b32.xlu1 %v7745_v62, %s7325_s8 }
 0x561   : > { %2539 = vrot.lane.b32.xlu1 %v7619_v9, %s7327_s12 }
 0x565   : > { %2535 = vrot.lane.b32.xlu1 %v7633_v11, %s7327_s12 }
 0x567   : > { %1672 = vrot.lane.b32.xlu0 %v7741_v61, %s7325_s8 }
 0x569   : > { %2531 = vrot.lane.b32.xlu1 %v7645_v14, %s7327_s12 }
 0x56b   : > { %2541 = vrot.lane.b32.xlu0 %v7617_v7, %s7327_s12 }
 0x56d   : > { %2527 = vrot.lane.b32.xlu1 %v7657_v18, %s7327_s12 }
 0x56f   : > { %2537 = vrot.lane.b32.xlu0 %v7627_v10, %s7327_s12 }
 0x571   : > { %2513 = vrot.lane.b32.xlu1 %v7667_v21, %s7327_s12 }
 0x573   : > { %2533 = vrot.lane.b32.xlu0 %v7639_v12, %s7327_s12 }
 0x575   : > { %2517 = vrot.lane.b32.xlu1 %v7669_v23, %s7327_s12 }
 0x577   : > { %2529 = vrot.lane.b32.xlu0 %v7651_v16, %s7327_s12 }
 0x579   : > { %2521 = vrot.lane.b32.xlu1 %v7677_v26, %s7327_s12 }
 0x57b   : > { %2511 = vrot.lane.b32.xlu0 %v7612_v3, %s7327_s12 }
 0x57d   : > { %2525 = vrot.lane.b32.xlu1 %v7685_v28, %s7327_s12 }
 0x57f   : > { %2515 = vrot.lane.b32.xlu0 %v7665_v20, %s7327_s12 }
 0x583   : > { %2519 = vrot.lane.b32.xlu0 %v7675_v24, %s7327_s12 }
 0x587   : > { %2523 = vrot.lane.b32.xlu0 %v7683_v27, %s7327_s12 }
 0x5a1   : > { %2135 = vmax.xlane.f32.xlu1 %v2134_v25 }
 0x5a5   : > { %2147 = vmax.xlane.f32.xlu1 %v2146_v30  ;;  %v1824_v30 = vld [vmem:[#allocation11 + $0x18] sm:$0xff] }
 0x5a6   : > { %2132 = vmax.xlane.f32.xlu0 %v2131_v32 }
 0x5a9   : > { %2153 = vmax.xlane.f32.xlu1 %v2152_v33 }
 0x5aa   : > { %2138 = vmax.xlane.f32.xlu0 %v2137_v34  ;;  %v1823_v34 = vld [vmem:[#allocation11 + $0x10] sm:$0xff] }
 0x5ae   : > { %2141 = vmax.xlane.f32.xlu0 %v2140_v35 }
 0x5b2   : > { %2144 = vmax.xlane.f32.xlu0 %v2143_v36 }
 0x5b6   : > { %2150 = vmax.xlane.f32.xlu0 %v2149_v39 }
 0x5ba   : > { %2231 = vrot.lane.b32.xlu1 %v7723_v55, %s7326_s11 }
 0x5be   : > { %2229 = vrot.lane.b32.xlu1 %v7721_v54, %s7326_s11 }
 0x5c2   : > { %2227 = vrot.lane.b32.xlu1 %v7729_v58, %s7326_s11 }
 0x5c6   : > { %2223 = vrot.lane.b32.xlu1 %v7737_v60, %s7326_s11 }
 0x5c7   : > { %v1627_v41 = vpop.xlane.xlu1 %1626 }
 0x5c9   : > { %v1624_v43 = vpop.xlane.xlu0 %1623 }
 0x5ca   : > { %6905 = vrcp.f32 %v1624_v43 }
 0x5cb   : > { %6907 = vrcp.f32 %v1627_v41 }
 0x5cc   : > { %2233 = vrot.lane.b32.xlu0 %v7695_v38, %s7326_s11 }
 0x5cd   : > { %v1633_v44 = vpop.xlane.xlu1 %1632 }
 0x5d0   : > { %2225 = vrot.lane.b32.xlu0 %v7733_v59, %s7326_s11 }
 0x5d1   : > { %v1630_v47 = vpop.xlane.xlu0 %1629  ;;  %v1639_v50 = vpop.xlane.xlu1 %1638 }
 0x5d2   : > { %6909 = vrcp.f32 %v1630_v47 }
 0x5d3   : > { %6911 = vrcp.f32 %v1633_v44 }
 0x5d5   : > { %v1645_v63 = vpop.xlane.xlu1 %1644 }
 0x5d6   : > { %v1636_v51 = vpop.xlane.xlu0 %1635 }
 0x5d7   : > { %v6906_v53 = vpop.eup %6905  ;;  %6913 = vrcp.f32 %v1636_v51 }
 0x5d8   : > { %v1654_v46 = vmul.f32 %v6906_v53, %v7955_v42  ;;  %6915 = vrcp.f32 %v1639_v50  ;;  %v6908_v49 = vpop.eup %6907 }
 0x5d9   : > { %v1671_v2 = vpop.permute.xlu1 %1670  ;;  %v1655_v5 = vmul.f32 %v6908_v49, %v7951_v40 }
 0x5da   : > { %v1642_v1 = vpop.xlane.xlu0 %1641  ;;  %6299 = vmatprep.mubr.msk.f32.mxu1 %vm1048_vm8, %v1654_v46 }
 0x5db   : > { %6917 = vrcp.f32 %v1642_v1 }
 0x5dc   : > { %6919 = vrcp.f32 %v1645_v63 }
 0x5dd   : > { %v2540_v33 = vpop.permute.xlu1 %2539 }
 0x5de   : > { %v1673_v52 = vpop.permute.xlu0 %1672 }
 0x5df   : > { %6295 = vmatprep.subr.mxu1 %v1673_v52  ;;  %v6910_v4 = vpop.eup %6909 }
 0x5e0   : > { %6296 = vmatpush3.msra.mxu1 %v1673_v52  ;;  %v1656_v8 = vmul.f32 %v6910_v4, %v7965_v0  ;;  %v6912_v25 = vpop.eup %6911 }
 0x5e1   : > { %6297 = vmatprep.subr.mxu1 %v1671_v2  ;;  %v1657_v40 = vmul.f32 %v6912_v25, %v7959_v56  ;;  %v2536_v43 = vpop.permute.xlu1 %2535 }
 0x5e2   : > { %6298 = vmatpush3.msra.mxu1 %v1671_v2  ;;  %v2542_v42 = vpop.permute.xlu0 %2541 }
 0x5e3   : > { %6300 = vmatmul.mubr.msk.f32.vlgmr.msra.gmra.mxu1 %vm1048_vm8, %v1655_v5  ;;  %6399 = vmatprep.subr.msk.mxu0 %vm894_vm7, %v2542_v42 }
 0x5e4   : > { %v6914_v32 = vpop.eup %6913  ;;  %6302 = vmatprep.mubr.msk.f32.mxu1 %vm1048_vm8, %v1656_v8  ;;  %6400 = vmatpush3.xpose.msk.msra.mxu0 %vm894_vm7, %v2542_v42 }
 0x5e5   : > { %6401 = vmatprep.subr.msk.mxu0 %vm894_vm7, %v2540_v33  ;;  %v1658_v0 = vmul.f32 %v6914_v32, %v7973_v57  ;;  %6311 = vmatprep.subr.mxu1 %v1824_v30  ;;  %v6916_v35 = vpop.eup %6915 }
 0x5e6   : > { %v2538_v36 = vpop.permute.xlu0 %2537  ;;  %6312 = vmatpush3.msra.mxu1 %v1824_v30  ;;  %v1659_v41 = vmul.f32 %v6916_v35, %v7963_v45  ;;  %v2532_v45 = vpop.permute.xlu1 %2531 }
 0x5e7   : > { %6303 = vmatmul.mubr.msk.f32.gmra.mxu1 %vm1048_vm8, %v1657_v40  ;;  %6313 = vmatprep.subr.mxu1 %v1823_v34 }
 0x5e8   : > { %v6918_v39 = vpop.eup %6917  ;;  %6305 = vmatprep.mubr.msk.f32.mxu1 %vm1048_vm8, %v1658_v0  ;;  %6402 = vmatpush3.xpose.msk.msra.mxu0 %vm894_vm7, %v2540_v33 }
 0x5e9   : > { %6403 = vmatprep.subr.msk.mxu0 %vm894_vm7, %v2538_v36  ;;  %v1660_v56 = vmul.f32 %v6918_v39, %v7979_v6  ;;  %6314 = vmatpush3.msra.mxu1 %v1823_v34  ;;  %v6920_v57 = vpop.eup %6919 }
 0x5ea   : > { %v2534_v44 = vpop.permute.xlu0 %2533  ;;  %v1661_v47 = vmul.f32 %v6920_v57, %v7971_v48  ;;  %v2528_v51 = vpop.permute.xlu1 %2527 }
 0x5eb   : > { %6306 = vmatmul.mubr.msk.f32.gmra.mxu1 %vm1048_vm8, %v1659_v41 }
 0x5ec   : > { %6308 = vmatprep.mubr.msk.f32.mxu1 %vm1048_vm8, %v1660_v56  ;;  %6404 = vmatpush3.xpose.msk.msra.mxu0 %vm894_vm7, %v2538_v36 }
 0x5ed   : > { %6405 = vmatprep.subr.msk.mxu0 %vm894_vm7, %v2536_v43 }
 0x5ee   : > { %v2530_v50 = vpop.permute.xlu0 %2529  ;;  %v2514_v48 = vpop.permute.xlu1 %2513 }
 0x5ef   : > { %6309 = vmatmul.mubr.msk.f32.gmra.mxu1 %vm1048_vm8, %v1661_v47 }
 0x5f0   : > { %6406 = vmatpush3.xpose.msk.msra.mxu0 %vm894_vm7, %v2536_v43 }
 0x5f1   : > { %6407 = vmatprep.subr.msk.mxu0 %vm894_vm7, %v2534_v44 }
 0x5f2   : > { %v2512_v6 = vpop.permute.xlu0 %2511  ;;  %v2518_v63 = vpop.permute.xlu1 %2517 }
 0x5f3   : > { %6415 = vmatprep.mubr.msk.f32.mxu0 %vm894_vm7, %v2512_v6 }
 0x5f4   : > { %6408 = vmatpush3.xpose.msk.msra.mxu0 %vm894_vm7, %v2534_v44 }
 0x5f5   : > { %6409 = vmatprep.subr.msk.mxu0 %vm894_vm7, %v2532_v45 }
 0x5f6   : > { %v2516_v53 = vpop.permute.xlu0 %2515  ;;  %v2522_v1 = vpop.permute.xlu1 %2521 }
 0x5f8   : > { %6410 = vmatpush3.xpose.msk.msra.mxu0 %vm894_vm7, %v2532_v45 }
 0x5f9   : > { %6411 = vmatprep.subr.msk.mxu0 %vm894_vm7, %v2530_v50 }
 0x5fa   : > { %v2520_v46 = vpop.permute.xlu0 %2519  ;;  %v2526_v2 = vpop.permute.xlu1 %2525 }
 0x5fc   : > { %6412 = vmatpush3.xpose.msk.msra.mxu0 %vm894_vm7, %v2530_v50 }
 0x5fd   : > { %6413 = vmatprep.subr.msk.mxu0 %vm894_vm7, %v2528_v51 }
 0x5fe   : > { %v2524_v49 = vpop.permute.xlu0 %2523 }
 0x600   : > { %6414 = vmatpush3.xpose.msk.msra.mxu0 %vm894_vm7, %v2528_v51 }
 0x603   : > { %6416 = vmatmul.mubr.msk.f32.vlgmr.msra.gmra.mxu0 %vm894_vm7, %v2514_v48 }
 0x604   : > { %6418 = vmatprep.mubr.msk.f32.mxu0 %vm894_vm7, %v2516_v53 }
 0x607   : > { %6419 = vmatmul.mubr.msk.f32.gmra.mxu0 %vm894_vm7, %v2518_v63 }
 0x608   : > { %6421 = vmatprep.mubr.msk.f32.mxu0 %vm894_vm7, %v2520_v46 }
 0x60b   : > { %6422 = vmatmul.mubr.msk.f32.gmra.mxu0 %vm894_vm7, %v2522_v1 }
 0x60c   : > { %6424 = vmatprep.mubr.msk.f32.mxu0 %vm894_vm7, %v2524_v49 }
 0x60f   : > { %6425 = vmatmul.mubr.msk.f32.gmra.mxu0 %vm894_vm7, %v2526_v2 }
 0x62a   : > { %v2136_v52 = vpop.xlane.xlu1 %2135 }
 0x62b   : > { %v2156_v4 = vsub.f32 %v8019_v17, %v2136_v52 }
 0x62d   : > { %v2165_v5 = vmul.f32 1.442695, %v2156_v4  ;;  %v8177_v4 = vpop.f32.mrf.mxu1 }
 0x62e   : > { %v2148_v42 = vpop.xlane.xlu1 %2147 }
 0x62f   : > { %6921 = vpow2.f32 %v2165_v5  ;;  %v2133_v8 = vpop.xlane.xlu0 %2132  ;;  %v2160_v34 = vsub.f32 %v8027_v15, %v2148_v42  ;;  %v8181_v5 = vpop.f32.mrf.mxu1 }
 0x630   : > { %v2155_v25 = vsub.f32 %v8021_v22, %v2133_v8 }
 0x631   : > { %v2173_v17 = vmul.f32 1.442695, %v2160_v34  ;;  %v8183_v8 = vpop.f32.mrf.mxu1 }
 0x632   : > { %v2163_v30 = vmul.f32 1.442695, %v2155_v25  ;;  %v2154_v0 = vpop.xlane.xlu1 %2153 }
 0x633   : > { %v2139_v32 = vpop.xlane.xlu0 %2138  ;;  %v2162_v39 = vsub.f32 %v8035_v31, %v2154_v0  ;;  %v8185_v25 = vpop.f32.mrf.mxu1 }
 0x634   : > { %6923 = vpow2.f32 %v2163_v30  ;;  %v2157_v33 = vsub.f32 %v8025_v13, %v2139_v32 }
 0x635   : > { %v2177_v15 = vmul.f32 1.442695, %v2162_v39  ;;  %v8187_v42 = vpop.f32.mrf.mxu1 }
 0x636   : > { %v2167_v40 = vmul.f32 1.442695, %v2157_v33  ;;  %v2232_v33 = vpop.permute.xlu1 %2231 }
 0x637   : > { %v2142_v35 = vpop.xlane.xlu0 %2141  ;;  %v8189_v30 = vpop.f32.mrf.mxu1 }
 0x638   : > { %6925 = vpow2.f32 %v2167_v40  ;;  %v2158_v36 = vsub.f32 %v8023_v19, %v2142_v35 }
 0x639   : > { %v8191_v32 = vpop.f32.mrf.mxu1 }
 0x63a   : > { %v2169_v41 = vmul.f32 1.442695, %v2158_v36  ;;  %v2230_v0 = vpop.permute.xlu1 %2229 }
 0x63b   : > { %v2145_v56 = vpop.xlane.xlu0 %2144  ;;  %v8193_v34 = vpop.f32.mrf.mxu1 }
 0x63c   : > { %v8109_v22 = vpop.eup %6921  ;;  %6927 = vpow2.f32 %v2169_v41  ;;  %v2159_v57 = vsub.f32 %v8031_v29, %v2145_v56 }
 0x63d   : > { %v2182_v13 = vsel %vm1048_vm8, %v8109_v22, 0.0  ;;  %6929 = vpow2.f32 %v2173_v17 }
 0x63e   : > { %v2171_v43 = vmul.f32 1.442695, %v2159_v57  ;;  %2183 = vadd.xlane.f32.xlu1 %v2182_v13  ;;  %v2228_v39 = vpop.permute.xlu1 %2227 }
 0x63f   : > { %v2151_v44 = vpop.xlane.xlu0 %2150 }
 0x640   : > { %6931 = vpow2.f32 %v2171_v43  ;;  %v2161_v19 = vsub.f32 %v8047_v37, %v2151_v44 }
 0x641   : > { %v8115_v47 = vpop.eup %6923  ;;  %6933 = vpow2.f32 %v2177_v15 }
 0x642   : > { %v2175_v31 = vmul.f32 1.442695, %v2161_v19  ;;  %v2179_v50 = vsel %vm1048_vm8, %v8115_v47, 0.0  ;;  %v2224_v15 = vpop.permute.xlu1 %2223 }
 0x643   : > { %2180 = vadd.xlane.f32.xlu0 %v2179_v50  ;;  %v2234_v29 = vpop.permute.xlu0 %2233 }
 0x644   : > { %6935 = vpow2.f32 %v2175_v31  ;;  %6355 = vmatprep.subr.mxu1 %v2234_v29 }
 0x645   : > { %v8119_v45 = vpop.eup %6925 }
 0x646   : > { %v2185_v6 = vsel %vm1048_vm8, %v8119_v45, 0.0 }
 0x647   : > { %2186 = vadd.xlane.f32.xlu0 %v2185_v6  ;;  %v2226_v57 = vpop.permute.xlu0 %2225 }
 0x649   : > { %v8123_v51 = vpop.eup %6927 }
 0x64a   : > { %v2188_v37 = vsel %vm1048_vm8, %v8123_v51, 0.0  ;;  %v8127_v48 = vpop.eup %6929 }
 0x64b   : > { %2189 = vadd.xlane.f32.xlu1 %v2188_v37  ;;  %v2194_v63 = vsel %vm1048_vm8, %v8127_v48, 0.0 }
 0x64d   : > { %v8129_v53 = vpop.eup %6931 }
 0x64e   : > { %v2191_v46 = vsel %vm1048_vm8, %v8129_v53, 0.0  ;;  %v8135_v1 = vpop.eup %6933 }
 0x64f   : > { %2195 = vadd.xlane.f32.xlu1 %v2194_v63  ;;  %2192 = vadd.xlane.f32.xlu0 %v2191_v46  ;;  %v2200_v2 = vsel %vm1048_vm8, %v8135_v1, 0.0 }
 0x651   : > { %v8137_v49 = vpop.eup %6935 }
 0x652   : > { %v2197_v52 = vsel %vm1048_vm8, %v8137_v49, 0.0 }
 0x653   : > { %2201 = vadd.xlane.f32.xlu1 %v2200_v2  ;;  %2198 = vadd.xlane.f32.xlu0 %v2197_v52 }
 0x664   : > { %2219 = vrot.lane.b32.xlu1 %v7745_v62, %s7326_s11 }
 0x668   : > { %3088 = vrot.lane.b32.xlu1 %v7619_v9, %s7328_s13 }
 0x669   : > { %2221 = vrot.lane.b32.xlu0 %v7741_v61, %s7326_s11 }
 0x66c   : > { %3084 = vrot.lane.b32.xlu1 %v7633_v11, %s7328_s13 }
 0x66d   : > { %3090 = vrot.lane.b32.xlu0 %v7617_v7, %s7328_s13 }
 0x670   : > { %3080 = vrot.lane.b32.xlu1 %v7645_v14, %s7328_s13 }
 0x671   : > { %3086 = vrot.lane.b32.xlu0 %v7627_v10, %s7328_s13 }
 0x674   : > { %3076 = vrot.lane.b32.xlu1 %v7657_v18, %s7328_s13 }
 0x675   : > { %3082 = vrot.lane.b32.xlu0 %v7639_v12, %s7328_s13 }
 0x678   : > { %3062 = vrot.lane.b32.xlu1 %v7667_v21, %s7328_s13 }
 0x679   : > { %3078 = vrot.lane.b32.xlu0 %v7651_v16, %s7328_s13 }
 0x67c   : > { %3066 = vrot.lane.b32.xlu1 %v7669_v23, %s7328_s13 }
 0x67d   : > { %3060 = vrot.lane.b32.xlu0 %v7612_v3, %s7328_s13 }
 0x680   : > { %3070 = vrot.lane.b32.xlu1 %v7677_v26, %s7328_s13 }
 0x681   : > { %3064 = vrot.lane.b32.xlu0 %v7665_v20, %s7328_s13 }
 0x684   : > { %3074 = vrot.lane.b32.xlu1 %v7685_v28, %s7328_s13 }
 0x685   : > { %3068 = vrot.lane.b32.xlu0 %v7675_v24, %s7328_s13 }
 0x689   : > { %3072 = vrot.lane.b32.xlu0 %v7683_v27, %s7328_s13 }
 0x6a3   : > { %v6301_v40 = vpop.f32.mrf.mxu1 }
 0x6a5   : > { %v1784_v35 = vpop.f32.mrf.mxu1 }
 0x6a6   : > { %6315 = vmatprep.mubr.msk.f32.mxu1 %vm894_vm7, %v1784_v35 }
 0x6a7   : > { %v6304_v36 = vpop.f32.mrf.mxu1  ;;  %6316 = vmatmul.mubr.msk.f32.vlgmr.msra.gmra.mxu1 %vm894_vm7, %v6301_v40 }
 0x6a8   : > { %6356 = vmatpush3.msra.mxu1 %v2234_v29 }
 0x6a9   : > { %6357 = vmatprep.subr.mxu1 %v2232_v33  ;;  %v1794_v17 = vpop.f32.mrf.mxu1 }
 0x6aa   : > { %6358 = vmatpush3.msra.mxu1 %v2232_v33  ;;  %6318 = vmatprep.mubr.msk.f32.mxu1 %vm894_vm7, %v1794_v17 }
 0x6ab   : > { %6359 = vmatprep.subr.mxu1 %v2230_v0  ;;  %v6307_v41 = vpop.f32.mrf.mxu1  ;;  %6319 = vmatmul.mubr.msk.f32.gmra.mxu1 %vm894_vm7, %v6304_v36 }
 0x6ac   : > { %6360 = vmatpush3.msra.mxu1 %v2230_v0 }
 0x6ad   : > { %6361 = vmatprep.subr.mxu1 %v2228_v39  ;;  %v1804_v56 = vpop.f32.mrf.mxu1 }
 0x6ae   : > { %6362 = vmatpush3.msra.mxu1 %v2228_v39  ;;  %6321 = vmatprep.mubr.msk.f32.mxu1 %vm894_vm7, %v1804_v56 }
 0x6af   : > { %6363 = vmatprep.subr.mxu1 %v2226_v57  ;;  %v6310_v13 = vpop.f32.mrf.mxu1  ;;  %6322 = vmatmul.mubr.msk.f32.gmra.mxu1 %vm894_vm7, %v6307_v41 }
 0x6b0   : > { %6364 = vmatpush3.msra.mxu1 %v2226_v57 }
 0x6b1   : > { %6365 = vmatprep.subr.mxu1 %v2224_v15  ;;  %v1814_v43 = vpop.f32.mrf.mxu1 }
 0x6b2   : > { %6366 = vmatpush3.msra.mxu1 %v2224_v15  ;;  %6324 = vmatprep.mubr.msk.f32.mxu1 %vm894_vm7, %v1814_v43 }
 0x6b3   : > { %6325 = vmatmul.mubr.msk.f32.gmra.mxu1 %vm894_vm7, %v6310_v13 }
 0x6c3   : > { %v8203_v44 = vpop.f32.mrf.mxu0 }
 0x6c4   : > { %v2683_v19 = vsel %vm1048_vm8, %v8203_v44, -inf }
 0x6c5   : > { %v8207_v31 = vpop.f32.mrf.mxu0  ;;  %2684 = vmax.xlane.f32.xlu1 %v2683_v19 }
 0x6c6   : > { %v2680_v50 = vsel %vm1048_vm8, %v8207_v31, -inf }
 0x6c7   : > { %v8211_v29 = vpop.f32.mrf.mxu0  ;;  %2681 = vmax.xlane.f32.xlu0 %v2680_v50  ;;  %v2184_v0 = vpop.xlane.xlu1 %2183 }
 0x6c8   : > { %v2689_v33 = vsel %vm1048_vm8, %v8211_v29, -inf }
 0x6c9   : > { %v8213_v6 = vpop.f32.mrf.mxu0 }
 0x6ca   : > { %v2686_v37 = vsel %vm1048_vm8, %v8213_v6, -inf }
 0x6cb   : > { %v8217_v63 = vpop.f32.mrf.mxu0  ;;  %2687 = vmax.xlane.f32.xlu0 %v2686_v37 }
 0x6cc   : > { %v2181_v46 = vpop.xlane.xlu0 %2180  ;;  %v2695_v2 = vsel %vm1048_vm8, %v8217_v63, -inf }
 0x6cd   : > { %6937 = vrcp.f32 %v2181_v46  ;;  %v8221_v52 = vpop.f32.mrf.mxu0  ;;  %2696 = vmax.xlane.f32.xlu1 %v2695_v2 }
 0x6ce   : > { %v2692_v17 = vsel %vm1048_vm8, %v8221_v52, -inf  ;;  %6939 = vrcp.f32 %v2184_v0 }
 0x6cf   : > { %v8225_v40 = vpop.f32.mrf.mxu0  ;;  %2690 = vmax.xlane.f32.xlu0 %v2689_v33 }
 0x6d0   : > { %v2701_v35 = vsel %vm1048_vm8, %v8225_v40, -inf  ;;  %v2187_v36 = vpop.xlane.xlu0 %2186 }
 0x6d1   : > { %2702 = vmax.xlane.f32.xlu1 %v2701_v35  ;;  %v8231_v39 = vpop.f32.mrf.mxu0  ;;  %6941 = vrcp.f32 %v2187_v36 }
 0x6d2   : > { %v2698_v56 = vsel %vm1048_vm8, %v8231_v39, -inf }
 0x6d3   : > { %2693 = vmax.xlane.f32.xlu0 %v2692_v17  ;;  %v2373_v17 = vld [vmem:[#allocation11 + $0x28] sm:$0xff] }
 0x6d4   : > { %v2190_v41 = vpop.xlane.xlu1 %2189 }
 0x6d5   : > { %6943 = vrcp.f32 %v2190_v41  ;;  %v2372_v41 = vld [vmem:[#allocation11 + $0x20] sm:$0xff] }
 0x6d7   : > { %2699 = vmax.xlane.f32.xlu0 %v2698_v56 }
 0x6d8   : > { %v2196_v57 = vpop.xlane.xlu1 %2195  ;;  %v2193_v13 = vpop.xlane.xlu0 %2192 }
 0x6d9   : > { %6945 = vrcp.f32 %v2193_v13 }
 0x6da   : > { %v6938_v15 = vpop.eup %6937  ;;  %6947 = vrcp.f32 %v2196_v57 }
 0x6db   : > { %v2211_v43 = vmul.f32 %v6938_v15, %v8115_v47  ;;  %v6940_v37 = vpop.eup %6939 }
 0x6dc   : > { %v2202_v19 = vpop.xlane.xlu1 %2201  ;;  %v2199_v50 = vpop.xlane.xlu0 %2198  ;;  %v2212_v0 = vmul.f32 %v6940_v37, %v8109_v22 }
 0x6dd   : > { %6371 = vmatprep.mubr.msk.f32.mxu1 %vm1048_vm8, %v2211_v43  ;;  %6949 = vrcp.f32 %v2199_v50 }
 0x6de   : > { %6951 = vrcp.f32 %v2202_v19  ;;  %v6942_v2 = vpop.eup %6941 }
 0x6df   : > { %v2213_v36 = vmul.f32 %v6942_v2, %v8119_v45 }
 0x6e0   : > { %v2222_v46 = vpop.permute.xlu0 %2221  ;;  %v2220_v33 = vpop.permute.xlu1 %2219 }
 0x6e1   : > { %6367 = vmatprep.subr.mxu1 %v2222_v46 }
 0x6e2   : > { %2780 = vrot.lane.b32.xlu1 %v7723_v55, %s7327_s12  ;;  %6368 = vmatpush3.msra.mxu1 %v2222_v46  ;;  %v6944_v35 = vpop.eup %6943 }
 0x6e3   : > { %6369 = vmatprep.subr.mxu1 %v2220_v33  ;;  %v2214_v22 = vmul.f32 %v6944_v35, %v8123_v51 }
 0x6e4   : > { %6370 = vmatpush3.msra.mxu1 %v2220_v33  ;;  %v3091_v47 = vpop.permute.xlu0 %3090  ;;  %v3089_v57 = vpop.permute.xlu1 %3088 }
 0x6e5   : > { %6372 = vmatmul.mubr.msk.f32.vlgmr.msra.gmra.mxu1 %vm1048_vm8, %v2212_v0  ;;  %6471 = vmatprep.subr.msk.mxu0 %vm894_vm7, %v3091_v47 }
 0x6e6   : > { %2778 = vrot.lane.b32.xlu1 %v7721_v54, %s7327_s12  ;;  %6374 = vmatprep.mubr.msk.f32.mxu1 %vm1048_vm8, %v2213_v36  ;;  %v6946_v56 = vpop.eup %6945 }
 0x6e7   : > { %6472 = vmatpush3.xpose.msk.msra.mxu0 %vm894_vm7, %v3091_v47  ;;  %6383 = vmatprep.subr.mxu1 %v2373_v17  ;;  %v6948_v13 = vpop.eup %6947  ;;  %v2215_v15 = vmul.f32 %v6946_v56, %v8129_v53 }
 0x6e8   : > { %6473 = vmatprep.subr.msk.mxu0 %vm894_vm7, %v3089_v57  ;;  %v3087_v45 = vpop.permute.xlu0 %3086  ;;  %6384 = vmatpush3.msra.mxu1 %v2373_v17  ;;  %v2216_v51 = vmul.f32 %v6948_v13, %v8127_v48  ;;  %v3085_v37 = vpop.permute.xlu1 %3084 }
 0x6e9   : > { %6375 = vmatmul.mubr.msk.f32.gmra.mxu1 %vm1048_vm8, %v2214_v22  ;;  %6385 = vmatprep.subr.mxu1 %v2372_v41 }
 0x6ea   : > { %2776 = vrot.lane.b32.xlu1 %v7729_v58, %s7327_s12  ;;  %6377 = vmatprep.mubr.msk.f32.mxu1 %vm1048_vm8, %v2215_v15  ;;  %v6950_v43 = vpop.eup %6949 }
 0x6eb   : > { %6474 = vmatpush3.xpose.msk.msra.mxu0 %vm894_vm7, %v3089_v57  ;;  %6386 = vmatpush3.msra.mxu1 %v2372_v41  ;;  %v6952_v19 = vpop.eup %6951  ;;  %v2217_v53 = vmul.f32 %v6950_v43, %v8137_v49 }
 0x6ec   : > { %6475 = vmatprep.subr.msk.mxu0 %vm894_vm7, %v3087_v45  ;;  %v3083_v50 = vpop.permute.xlu0 %3082  ;;  %v2218_v48 = vmul.f32 %v6952_v19, %v8135_v1  ;;  %v3081_v49 = vpop.permute.xlu1 %3080 }
 0x6ed   : > { %2782 = vrot.lane.b32.xlu0 %v7695_v38, %s7327_s12  ;;  %6378 = vmatmul.mubr.msk.f32.gmra.mxu1 %vm1048_vm8, %v2216_v51 }
 0x6ee   : > { %2772 = vrot.lane.b32.xlu1 %v7737_v60, %s7327_s12  ;;  %6380 = vmatprep.mubr.msk.f32.mxu1 %vm1048_vm8, %v2217_v53 }
 0x6ef   : > { %6476 = vmatpush3.xpose.msk.msra.mxu0 %vm894_vm7, %v3087_v45 }
 0x6f0   : > { %6477 = vmatprep.subr.msk.mxu0 %vm894_vm7, %v3085_v37  ;;  %v3079_v46 = vpop.permute.xlu0 %3078  ;;  %v3077_v1 = vpop.permute.xlu1 %3076 }
 0x6f1   : > { %2774 = vrot.lane.b32.xlu0 %v7733_v59, %s7327_s12  ;;  %6381 = vmatmul.mubr.msk.f32.gmra.mxu1 %vm1048_vm8, %v2218_v48 }
 0x6f3   : > { %6478 = vmatpush3.xpose.msk.msra.mxu0 %vm894_vm7, %v3085_v37 }
 0x6f4   : > { %6479 = vmatprep.subr.msk.mxu0 %vm894_vm7, %v3083_v50  ;;  %v3061_v2 = vpop.permute.xlu0 %3060  ;;  %v3063_v33 = vpop.permute.xlu1 %3062 }
 0x6f5   : > { %6487 = vmatprep.mubr.msk.f32.mxu0 %vm894_vm7, %v3061_v2 }
 0x6f7   : > { %6480 = vmatpush3.xpose.msk.msra.mxu0 %vm894_vm7, %v3083_v50 }
 0x6f8   : > { %6481 = vmatprep.subr.msk.mxu0 %vm894_vm7, %v3081_v49  ;;  %v3065_v0 = vpop.permute.xlu0 %3064  ;;  %v3067_v35 = vpop.permute.xlu1 %3066 }
 0x6fb   : > { %6482 = vmatpush3.xpose.msk.msra.mxu0 %vm894_vm7, %v3081_v49 }
 0x6fc   : > { %6483 = vmatprep.subr.msk.mxu0 %vm894_vm7, %v3079_v46  ;;  %v3069_v47 = vpop.permute.xlu0 %3068  ;;  %v3071_v36 = vpop.permute.xlu1 %3070 }
 0x6ff   : > { %6484 = vmatpush3.xpose.msk.msra.mxu0 %vm894_vm7, %v3079_v46 }
 0x700   : > { %6485 = vmatprep.subr.msk.mxu0 %vm894_vm7, %v3077_v1  ;;  %v3073_v17 = vpop.permute.xlu0 %3072  ;;  %v3075_v41 = vpop.permute.xlu1 %3074 }
 0x703   : > { %6486 = vmatpush3.xpose.msk.msra.mxu0 %vm894_vm7, %v3077_v1 }
 0x706   : > { %6488 = vmatmul.mubr.msk.f32.vlgmr.msra.gmra.mxu0 %vm894_vm7, %v3063_v33 }
 0x707   : > { %6490 = vmatprep.mubr.msk.f32.mxu0 %vm894_vm7, %v3065_v0 }
 0x70a   : > { %6491 = vmatmul.mubr.msk.f32.gmra.mxu0 %vm894_vm7, %v3067_v35 }
 0x70b   : > { %6493 = vmatprep.mubr.msk.f32.mxu0 %vm894_vm7, %v3069_v47 }
 0x70e   : > { %6494 = vmatmul.mubr.msk.f32.gmra.mxu0 %vm894_vm7, %v3071_v36 }
 0x70f   : > { %6496 = vmatprep.mubr.msk.f32.mxu0 %vm894_vm7, %v3073_v17 }
 0x712   : > { %6497 = vmatmul.mubr.msk.f32.gmra.mxu0 %vm894_vm7, %v3075_v41 }
 0x74e   : > { %v2685_v56 = vpop.xlane.xlu1 %2684 }
 0x74f   : > { %v2705_v57 = vsub.f32 %v8203_v44, %v2685_v56 }
 0x750   : > { %v2682_v22 = vpop.xlane.xlu0 %2681 }
 0x751   : > { %v2714_v13 = vmul.f32 1.442695, %v2705_v57  ;;  %v2704_v45 = vsub.f32 %v8207_v31, %v2682_v22 }
 0x753   : > { %6953 = vpow2.f32 %v2714_v13  ;;  %v2712_v15 = vmul.f32 1.442695, %v2704_v45 }
 0x754   : > { %v2688_v43 = vpop.xlane.xlu0 %2687 }
 0x755   : > { %6955 = vpow2.f32 %v2712_v15  ;;  %v2706_v51 = vsub.f32 %v8213_v6, %v2688_v43 }
 0x756   : > { %v2697_v19 = vpop.xlane.xlu1 %2696 }
 0x757   : > { %v2716_v50 = vmul.f32 1.442695, %v2706_v51  ;;  %v2709_v53 = vsub.f32 %v8217_v63, %v2697_v19 }
 0x758   : > { %v2691_v37 = vpop.xlane.xlu0 %2690 }
 0x759   : > { %6957 = vpow2.f32 %v2716_v50  ;;  %v2707_v48 = vsub.f32 %v8211_v29, %v2691_v37  ;;  %v2722_v44 = vmul.f32 1.442695, %v2709_v53 }
 0x75a   : > { %v2703_v46 = vpop.xlane.xlu1 %2702 }
 0x75b   : > { %v2718_v49 = vmul.f32 1.442695, %v2707_v48  ;;  %v2711_v2 = vsub.f32 %v8225_v40, %v2703_v46  ;;  %v8304_v40 = vld [vmem:[%s9161_s6] ss:$0 sm:$0xff] }
 0x75c   : > { %v2694_v31 = vpop.xlane.xlu0 %2693  ;;  %v1398_v41 = vadd.f32 %v8177_v4, %v8304_v40  ;;  %v1400_v15 = vadd.f32 %v8183_v8, %v8304_v40  ;;  %v1402_v37 = vadd.f32 %v8187_v42, %v8304_v40  ;;  %v1404_v42 = vadd.f32 %v8191_v32, %v8304_v40 }
 0x75d   : > { %6959 = vpow2.f32 %v2718_v49  ;;  %v2708_v1 = vsub.f32 %v8221_v52, %v2694_v31  ;;  %v2726_v33 = vmul.f32 1.442695, %v2711_v2 }
 0x75e   : > { %6961 = vpow2.f32 %v2722_v44  ;;  %v2781_v32 = vpop.permute.xlu1 %2780 }
 0x75f   : > { %v2720_v6 = vmul.f32 1.442695, %v2708_v1 }
 0x760   : > { %v8294_v0 = vpop.eup %6953  ;;  %v2700_v35 = vpop.xlane.xlu0 %2699 }
 0x761   : > { %6963 = vpow2.f32 %v2720_v6  ;;  %v2710_v63 = vsub.f32 %v8231_v39, %v2700_v35  ;;  %v2731_v29 = vsel %vm1048_vm8, %v8294_v0, 0.0 }
 0x762   : > { %v8299_v47 = vpop.eup %6955  ;;  %2732 = vadd.xlane.f32.xlu1 %v2731_v29  ;;  %6965 = vpow2.f32 %v2726_v33 }
 0x763   : > { %v2724_v52 = vmul.f32 1.442695, %v2710_v63  ;;  %v2728_v36 = vsel %vm1048_vm8, %v8299_v47, 0.0 }
 0x764   : > { %2729 = vadd.xlane.f32.xlu0 %v2728_v36  ;;  %v2783_v17 = vpop.permute.xlu0 %2782 }
 0x765   : > { %6967 = vpow2.f32 %v2724_v52  ;;  %6427 = vmatprep.subr.mxu1 %v2783_v17  ;;  %v2779_v52 = vpop.permute.xlu1 %2778 }
 0x766   : > { %v8308_v39 = vpop.eup %6957 }
 0x767   : > { %v6317_v56 = vpop.f32.mrf.mxu1  ;;  %v2734_v57 = vsel %vm1048_vm8, %v8308_v39, 0.0 }
 0x768   : > { %v8314_v22 = vadd.f32 %v6317_v56, %v1398_v41  ;;  %2735 = vadd.xlane.f32.xlu0 %v2734_v57 }
 0x769   : > { %v8316_v13 = vpop.f32.mrf.mxu1  ;;  %v2777_v57 = vpop.permute.xlu1 %2776 }
 0x76a   : > { %v8318_v45 = vpop.eup %6959 }
 0x76b   : > { %v6320_v43 = vpop.f32.mrf.mxu1  ;;  %v2737_v51 = vsel %vm1048_vm8, %v8318_v45, 0.0  ;;  %v8324_v19 = vpop.eup %6961 }
 0x76c   : > { %v8326_v4 = vadd.f32 %v6320_v43, %v1400_v15  ;;  %2738 = vadd.xlane.f32.xlu1 %v2737_v51  ;;  %v2743_v8 = vsel %vm1048_vm8, %v8324_v19, 0.0  ;;  %v2775_v51 = vpop.permute.xlu0 %2774 }
 0x76d   : > { %v8328_v50 = vpop.f32.mrf.mxu1 }
 0x76e   : > { %v8330_v53 = vpop.eup %6963 }
 0x76f   : > { %v6323_v48 = vpop.f32.mrf.mxu1  ;;  %v2740_v46 = vsel %vm1048_vm8, %v8330_v53, 0.0  ;;  %v8338_v44 = vpop.eup %6965 }
 0x770   : > { %v8340_v49 = vadd.f32 %v6323_v48, %v1402_v37  ;;  %2744 = vadd.xlane.f32.xlu1 %v2743_v8  ;;  %2741 = vadd.xlane.f32.xlu0 %v2740_v46  ;;  %v2749_v33 = vsel %vm1048_vm8, %v8338_v44, 0.0  ;;  %v2773_v37 = vpop.permute.xlu1 %2772 }
 0x771   : > { %v8342_v2 = vpop.f32.mrf.mxu1 }
 0x772   : > { %v8344_v31 = vpop.eup %6967 }
 0x773   : > { %v6326_v1 = vpop.f32.mrf.mxu1  ;;  %v2746_v6 = vsel %vm1048_vm8, %v8344_v31, 0.0 }
 0x774   : > { %v8352_v35 = vadd.f32 %v6326_v1, %v1404_v42  ;;  %2750 = vadd.xlane.f32.xlu1 %v2749_v33  ;;  %2747 = vadd.xlane.f32.xlu0 %v2746_v6 }
 0x775   : > { %v8384_v63 = vpop.f32.mrf.mxu1 }
 0x776   : > { %9176 = vst [vmem:[#allocation17_spill] sm:$0xff] %v8384_v63 }
 0x785   : > { %2768 = vrot.lane.b32.xlu1 %v7745_v62, %s7327_s12 }
 0x789   : > { %3637 = vrot.lane.b32.xlu1 %v7619_v9, %s7329_s19 }
 0x78a   : > { %2770 = vrot.lane.b32.xlu0 %v7741_v61, %s7327_s12 }
 0x78d   : > { %3633 = vrot.lane.b32.xlu1 %v7633_v11, %s7329_s19 }
 0x78e   : > { %3639 = vrot.lane.b32.xlu0 %v7617_v7, %s7329_s19 }
 0x791   : > { %3629 = vrot.lane.b32.xlu1 %v7645_v14, %s7329_s19 }
 0x792   : > { %3635 = vrot.lane.b32.xlu0 %v7627_v10, %s7329_s19 }
 0x795   : > { %3625 = vrot.lane.b32.xlu1 %v7657_v18, %s7329_s19 }
 0x796   : > { %3631 = vrot.lane.b32.xlu0 %v7639_v12, %s7329_s19 }
 0x799   : > { %3611 = vrot.lane.b32.xlu1 %v7667_v21, %s7329_s19 }
 0x79a   : > { %3627 = vrot.lane.b32.xlu0 %v7651_v16, %s7329_s19 }
 0x79d   : > { %3615 = vrot.lane.b32.xlu1 %v7669_v23, %s7329_s19 }
 0x79e   : > { %3609 = vrot.lane.b32.xlu0 %v7612_v3, %s7329_s19 }
 0x7a1   : > { %3619 = vrot.lane.b32.xlu1 %v7677_v26, %s7329_s19 }
 0x7a2   : > { %3613 = vrot.lane.b32.xlu0 %v7665_v20, %s7329_s19 }
 0x7a5   : > { %v6373_v29 = vpop.f32.mrf.mxu1  ;;  %3623 = vrot.lane.b32.xlu1 %v7685_v28, %s7329_s19 }
 0x7a6   : > { %3617 = vrot.lane.b32.xlu0 %v7675_v24, %s7329_s19 }
 0x7a7   : > { %v2333_v36 = vpop.f32.mrf.mxu1 }
 0x7a8   : > { %6387 = vmatprep.mubr.msk.f32.mxu1 %vm894_vm7, %v2333_v36 }
 0x7a9   : > { %v6376_v41 = vpop.f32.mrf.mxu1  ;;  %6388 = vmatmul.mubr.msk.f32.vlgmr.msra.gmra.mxu1 %vm894_vm7, %v6373_v29 }
 0x7aa   : > { %6428 = vmatpush3.msra.mxu1 %v2783_v17  ;;  %3621 = vrot.lane.b32.xlu0 %v7683_v27, %s7329_s19 }
 0x7ab   : > { %6429 = vmatprep.subr.mxu1 %v2781_v32  ;;  %v2343_v56 = vpop.f32.mrf.mxu1 }
 0x7ac   : > { %6430 = vmatpush3.msra.mxu1 %v2781_v32  ;;  %6390 = vmatprep.mubr.msk.f32.mxu1 %vm894_vm7, %v2343_v56 }
 0x7ad   : > { %6431 = vmatprep.subr.mxu1 %v2779_v52  ;;  %v6379_v15 = vpop.f32.mrf.mxu1  ;;  %6391 = vmatmul.mubr.msk.f32.gmra.mxu1 %vm894_vm7, %v6376_v41 }
 0x7ae   : > { %6432 = vmatpush3.msra.mxu1 %v2779_v52 }
 0x7af   : > { %6433 = vmatprep.subr.mxu1 %v2777_v57  ;;  %v2353_v43 = vpop.f32.mrf.mxu1 }
 0x7b0   : > { %6434 = vmatpush3.msra.mxu1 %v2777_v57  ;;  %6393 = vmatprep.mubr.msk.f32.mxu1 %vm894_vm7, %v2353_v43 }
 0x7b1   : > { %6435 = vmatprep.subr.mxu1 %v2775_v51  ;;  %v6382_v17 = vpop.f32.mrf.mxu1  ;;  %6394 = vmatmul.mubr.msk.f32.gmra.mxu1 %vm894_vm7, %v6379_v15 }
 0x7b2   : > { %6436 = vmatpush3.msra.mxu1 %v2775_v51 }
 0x7b3   : > { %6437 = vmatprep.subr.mxu1 %v2773_v37  ;;  %v2363_v48 = vpop.f32.mrf.mxu1 }
 0x7b4   : > { %6438 = vmatpush3.msra.mxu1 %v2773_v37  ;;  %6396 = vmatprep.mubr.msk.f32.mxu1 %vm894_vm7, %v2363_v48 }
 0x7b5   : > { %6397 = vmatmul.mubr.msk.f32.gmra.mxu1 %vm894_vm7, %v6382_v17 }
 0x7c6   : > { %v8400_v8 = vpop.f32.mrf.mxu0 }
 0x7c7   : > { %v3232_v42 = vsel %vm1048_vm8, %v8400_v8, -inf }
 0x7c8   : > { %v8402_v46 = vpop.f32.mrf.mxu0 }
 0x7c9   : > { %3233 = vmax.xlane.f32.xlu1 %v3232_v42  ;;  %v3229_v1 = vsel %vm1048_vm8, %v8402_v46, -inf }
 0x7ca   : > { %v8408_v33 = vpop.f32.mrf.mxu0  ;;  %3230 = vmax.xlane.f32.xlu0 %v3229_v1 }
 0x7cb   : > { %v3238_v41 = vsel %vm1048_vm8, %v8408_v33, -inf }
 0x7cc   : > { %v8410_v6 = vpop.f32.mrf.mxu0 }
 0x7cd   : > { %v3235_v32 = vsel %vm1048_vm8, %v8410_v6, -inf }
 0x7ce   : > { %v8414_v29 = vpop.f32.mrf.mxu0  ;;  %3236 = vmax.xlane.f32.xlu0 %v3235_v32 }
 0x7cf   : > { %v3244_v52 = vsel %vm1048_vm8, %v8414_v29, -inf }
 0x7d0   : > { %v8418_v36 = vpop.f32.mrf.mxu0  ;;  %3245 = vmax.xlane.f32.xlu1 %v3244_v52 }
 0x7d1   : > { %v3241_v15 = vsel %vm1048_vm8, %v8418_v36, -inf }
 0x7d2   : > { %v8422_v56 = vpop.f32.mrf.mxu0  ;;  %3239 = vmax.xlane.f32.xlu0 %v3238_v41 }
 0x7d3   : > { %v3250_v57 = vsel %vm1048_vm8, %v8422_v56, -inf }
 0x7d4   : > { %3251 = vmax.xlane.f32.xlu1 %v3250_v57  ;;  %v8428_v43 = vpop.f32.mrf.mxu0 }
 0x7d5   : > { %v3247_v51 = vsel %vm1048_vm8, %v8428_v43, -inf }
 0x7d6   : > { %3242 = vmax.xlane.f32.xlu0 %v3241_v15 }
 0x7da   : > { %3248 = vmax.xlane.f32.xlu0 %v3247_v51 }
 0x7e5   : > { %3329 = vrot.lane.b32.xlu1 %v7723_v55, %s7328_s13 }
 0x7e9   : > { %3327 = vrot.lane.b32.xlu1 %v7721_v54, %s7328_s13 }
 0x7eb   : > { %v2733_v37 = vpop.xlane.xlu1 %2732 }
 0x7ed   : > { %3325 = vrot.lane.b32.xlu1 %v7729_v58, %s7328_s13  ;;  %v2730_v17 = vpop.xlane.xlu0 %2729 }
 0x7ee   : > { %6969 = vrcp.f32 %v2730_v17 }
 0x7ef   : > { %6971 = vrcp.f32 %v2733_v37 }
 0x7f0   : > { %3331 = vrot.lane.b32.xlu0 %v7695_v38, %s7328_s13 }
 0x7f1   : > { %3321 = vrot.lane.b32.xlu1 %v7737_v60, %s7328_s13  ;;  %v2736_v48 = vpop.xlane.xlu0 %2735 }
 0x7f2   : > { %6973 = vrcp.f32 %v2736_v48 }
 0x7f4   : > { %3323 = vrot.lane.b32.xlu0 %v7733_v59, %s7328_s13 }
 0x7f5   : > { %v2739_v42 = vpop.xlane.xlu1 %2738 }
 0x7f6   : > { %6975 = vrcp.f32 %v2739_v42 }
 0x7f9   : > { %v2745_v1 = vpop.xlane.xlu1 %2744  ;;  %v2742_v32 = vpop.xlane.xlu0 %2741 }
 0x7fa   : > { %6977 = vrcp.f32 %v2742_v32  ;;  %v2922_v32 = vld [vmem:[#allocation11 + $0x38] sm:$0xff] }
 0x7fb   : > { %v6970_v52 = vpop.eup %6969  ;;  %6979 = vrcp.f32 %v2745_v1 }
 0x7fc   : > { %v2760_v41 = vmul.f32 %v6970_v52, %v8299_v47  ;;  %v6972_v51 = vpop.eup %6971 }
 0x7fd   : > { %v2751_v57 = vpop.xlane.xlu1 %2750  ;;  %v2748_v15 = vpop.xlane.xlu0 %2747  ;;  %v2761_v48 = vmul.f32 %v6972_v51, %v8294_v0 }
 0x7fe   : > { %6443 = vmatprep.mubr.msk.f32.mxu1 %vm1048_vm8, %v2760_v41  ;;  %6981 = vrcp.f32 %v2748_v15  ;;  %v2921_v41 = vld [vmem:[#allocation11 + $0x30] sm:$0xff] }
 0x7ff   : > { %6983 = vrcp.f32 %v2751_v57  ;;  %v6974_v63 = vpop.eup %6973 }
 0x800   : > { %v2762_v47 = vmul.f32 %v6974_v63, %v8308_v39 }
 0x801   : > { %v2769_v17 = vpop.permute.xlu1 %2768  ;;  %v2771_v37 = vpop.permute.xlu0 %2770 }
 0x802   : > { %6439 = vmatprep.subr.mxu1 %v2771_v37 }
 0x803   : > { %6440 = vmatpush3.msra.mxu1 %v2771_v37  ;;  %v6976_v42 = vpop.eup %6975 }
 0x804   : > { %6441 = vmatprep.subr.mxu1 %v2769_v17  ;;  %v2763_v0 = vmul.f32 %v6976_v42, %v8318_v45 }
 0x805   : > { %6442 = vmatpush3.msra.mxu1 %v2769_v17  ;;  %v3640_v1 = vpop.permute.xlu0 %3639  ;;  %v3638_v52 = vpop.permute.xlu1 %3637 }
 0x806   : > { %6444 = vmatmul.mubr.msk.f32.vlgmr.msra.gmra.mxu1 %vm1048_vm8, %v2761_v48  ;;  %6543 = vmatprep.subr.msk.mxu0 %vm894_vm7, %v3640_v1 }
 0x807   : > { %6446 = vmatprep.mubr.msk.f32.mxu1 %vm1048_vm8, %v2762_v47  ;;  %6544 = vmatpush3.xpose.msk.msra.mxu0 %vm894_vm7, %v3640_v1  ;;  %v6978_v57 = vpop.eup %6977 }
 0x808   : > { %6545 = vmatprep.subr.msk.mxu0 %vm894_vm7, %v3638_v52  ;;  %6455 = vmatprep.subr.mxu1 %v2922_v32  ;;  %v6980_v15 = vpop.eup %6979  ;;  %v2764_v39 = vmul.f32 %v6978_v57, %v8330_v53 }
 0x809   : > { %v3636_v51 = vpop.permute.xlu0 %3635  ;;  %6456 = vmatpush3.msra.mxu1 %v2922_v32  ;;  %v2765_v17 = vmul.f32 %v6980_v15, %v8324_v19  ;;  %v3634_v37 = vpop.permute.xlu1 %3633 }
 0x80a   : > { %6447 = vmatmul.mubr.msk.f32.gmra.mxu1 %vm1048_vm8, %v2763_v0  ;;  %6457 = vmatprep.subr.mxu1 %v2921_v41 }
 0x80b   : > { %6449 = vmatprep.mubr.msk.f32.mxu1 %vm1048_vm8, %v2764_v39  ;;  %6546 = vmatpush3.xpose.msk.msra.mxu0 %vm894_vm7, %v3638_v52  ;;  %v6982_v63 = vpop.eup %6981 }
 0x80c   : > { %6547 = vmatprep.subr.msk.mxu0 %vm894_vm7, %v3636_v51  ;;  %6458 = vmatpush3.msra.mxu1 %v2921_v41  ;;  %v6984_v45 = vpop.eup %6983  ;;  %v2766_v42 = vmul.f32 %v6982_v63, %v8344_v31 }
 0x80d   : > { %v3632_v48 = vpop.permute.xlu0 %3631  ;;  %v2767_v53 = vmul.f32 %v6984_v45, %v8338_v44  ;;  %v3630_v19 = vpop.permute.xlu1 %3629 }
 0x80e   : > { %6450 = vmatmul.mubr.msk.f32.gmra.mxu1 %vm1048_vm8, %v2765_v17 }
 0x80f   : > { %6452 = vmatprep.mubr.msk.f32.mxu1 %vm1048_vm8, %v2766_v42  ;;  %6548 = vmatpush3.xpose.msk.msra.mxu0 %vm894_vm7, %v3636_v51 }
 0x810   : > { %6549 = vmatprep.subr.msk.mxu0 %vm894_vm7, %v3634_v37 }
 0x811   : > { %v3628_v1 = vpop.permute.xlu0 %3627  ;;  %v3626_v31 = vpop.permute.xlu1 %3625 }
 0x812   : > { %6453 = vmatmul.mubr.msk.f32.gmra.mxu1 %vm1048_vm8, %v2767_v53 }
 0x813   : > { %6550 = vmatpush3.xpose.msk.msra.mxu0 %vm894_vm7, %v3634_v37 }
 0x814   : > { %6551 = vmatprep.subr.msk.mxu0 %vm894_vm7, %v3632_v48 }
 0x815   : > { %v3610_v47 = vpop.permute.xlu0 %3609  ;;  %v3612_v44 = vpop.permute.xlu1 %3611 }
 0x816   : > { %6559 = vmatprep.mubr.msk.f32.mxu0 %vm894_vm7, %v3610_v47 }
 0x817   : > { %6552 = vmatpush3.xpose.msk.msra.mxu0 %vm894_vm7, %v3632_v48 }
 0x818   : > { %6553 = vmatprep.subr.msk.mxu0 %vm894_vm7, %v3630_v19 }
 0x819   : > { %v3614_v32 = vpop.permute.xlu0 %3613  ;;  %v3616_v52 = vpop.permute.xlu1 %3615 }
 0x81b   : > { %6554 = vmatpush3.xpose.msk.msra.mxu0 %vm894_vm7, %v3630_v19 }
 0x81c   : > { %6555 = vmatprep.subr.msk.mxu0 %vm894_vm7, %v3628_v1 }
 0x81d   : > { %v3618_v41 = vpop.permute.xlu0 %3617  ;;  %v3620_v57 = vpop.permute.xlu1 %3619 }
 0x81f   : > { %6556 = vmatpush3.xpose.msk.msra.mxu0 %vm894_vm7, %v3628_v1 }
 0x820   : > { %6557 = vmatprep.subr.msk.mxu0 %vm894_vm7, %v3626_v31 }
 0x821   : > { %v3622_v0 = vpop.permute.xlu0 %3621  ;;  %v3624_v15 = vpop.permute.xlu1 %3623 }
 0x823   : > { %6558 = vmatpush3.xpose.msk.msra.mxu0 %vm894_vm7, %v3626_v31 }
 0x826   : > { %6560 = vmatmul.mubr.msk.f32.vlgmr.msra.gmra.mxu0 %vm894_vm7, %v3612_v44 }
 0x827   : > { %6562 = vmatprep.mubr.msk.f32.mxu0 %vm894_vm7, %v3614_v32 }
 0x82a   : > { %6563 = vmatmul.mubr.msk.f32.gmra.mxu0 %vm894_vm7, %v3616_v52 }
 0x82b   : > { %6565 = vmatprep.mubr.msk.f32.mxu0 %vm894_vm7, %v3618_v41 }
 0x82e   : > { %6566 = vmatmul.mubr.msk.f32.gmra.mxu0 %vm894_vm7, %v3620_v57 }
 0x82f   : > { %6568 = vmatprep.mubr.msk.f32.mxu0 %vm894_vm7, %v3622_v0 }
 0x832   : > { %6569 = vmatmul.mubr.msk.f32.gmra.mxu0 %vm894_vm7, %v3624_v15 }
 0x852   : > { %v3234_v51 = vpop.xlane.xlu1 %3233 }
 0x853   : > { %v3254_v39 = vsub.f32 %v8400_v8, %v3234_v51  ;;  %v3231_v63 = vpop.xlane.xlu0 %3230 }
 0x854   : > { %v3253_v17 = vsub.f32 %v8402_v46, %v3231_v63  ;;  %v1397_v63 = vadd.f32 %v8304_v40, %v8181_v5 }
 0x855   : > { %v3263_v45 = vmul.f32 1.442695, %v3254_v39 }
 0x856   : > { %v3261_v37 = vmul.f32 1.442695, %v3253_v17 }
 0x857   : > { %6985 = vpow2.f32 %v3263_v45  ;;  %v3237_v48 = vpop.xlane.xlu0 %3236  ;;  %v1954_v45 = vadd.f32 %v8316_v13, %v1397_v63 }
 0x858   : > { %6987 = vpow2.f32 %v3261_v37  ;;  %v3255_v42 = vsub.f32 %v8410_v6, %v3237_v48 }
 0x859   : > { %v3246_v53 = vpop.xlane.xlu1 %3245 }
 0x85a   : > { %v3265_v1 = vmul.f32 1.442695, %v3255_v42  ;;  %v3258_v19 = vsub.f32 %v8414_v29, %v3246_v53  ;;  %v1399_v53 = vadd.f32 %v8304_v40, %v8185_v25  ;;  %v1401_v25 = vadd.f32 %v8304_v40, %v8189_v30 }
 0x85b   : > { %v3240_v47 = vpop.xlane.xlu0 %3239 }
 0x85c   : > { %6989 = vpow2.f32 %v3265_v1  ;;  %v3256_v31 = vsub.f32 %v8408_v33, %v3240_v47  ;;  %v3271_v8 = vmul.f32 1.442695, %v3258_v19  ;;  %v1956_v47 = vadd.f32 %v8328_v50, %v1399_v53 }
 0x85d   : > { %v3252_v44 = vpop.xlane.xlu1 %3251  ;;  %v1958_v50 = vadd.f32 %v8342_v2, %v1401_v25 }
 0x85e   : > { %v3267_v32 = vmul.f32 1.442695, %v3256_v31  ;;  %v3260_v46 = vsub.f32 %v8422_v56, %v3252_v44 }
 0x85f   : > { %v3243_v52 = vpop.xlane.xlu0 %3242 }
 0x860   : > { %6991 = vpow2.f32 %v3267_v32  ;;  %v3257_v41 = vsub.f32 %v8418_v36, %v3243_v52  ;;  %v3275_v57 = vmul.f32 1.442695, %v3260_v46 }
 0x861   : > { %6993 = vpow2.f32 %v3271_v8 }
 0x862   : > { %v3269_v6 = vmul.f32 1.442695, %v3257_v41 }
 0x863   : > { %v3249_v0 = vpop.xlane.xlu0 %3248 }
 0x864   : > { %v8491_v15 = vpop.eup %6985  ;;  %6995 = vpow2.f32 %v3269_v6  ;;  %v3259_v29 = vsub.f32 %v8428_v43, %v3249_v0 }
 0x865   : > { %v8494_v51 = vpop.eup %6987  ;;  %v3280_v33 = vsel %vm1048_vm8, %v8491_v15, 0.0  ;;  %6997 = vpow2.f32 %v3275_v57 }
 0x866   : > { %v3273_v56 = vmul.f32 1.442695, %v3259_v29  ;;  %3281 = vadd.xlane.f32.xlu1 %v3280_v33  ;;  %v3277_v36 = vsel %vm1048_vm8, %v8494_v51, 0.0 }
 0x867   : > { %3278 = vadd.xlane.f32.xlu0 %v3277_v36  ;;  %v8500_v39 = vpop.permute.xlu0 %3331 }
 0x868   : > { %6999 = vpow2.f32 %v3273_v56  ;;  %6499 = vmatprep.subr.mxu1 %v8500_v39 }
 0x869   : > { %v8505_v43 = vpop.eup %6989  ;;  %v6389_v17 = vpop.f32.mrf.mxu1 }
 0x86a   : > { %v8509_v37 = vadd.f32 %v6389_v17, %v8314_v22  ;;  %v3283_v48 = vsel %vm1048_vm8, %v8505_v43, 0.0 }
 0x86b   : > { %3284 = vadd.xlane.f32.xlu0 %v3283_v48  ;;  %v2464_v42 = vpop.f32.mrf.mxu1 }
 0x86c   : > { %v8515_v5 = vadd.f32 %v2464_v42, %v1954_v45 }
 0x86d   : > { %v8517_v1 = vpop.eup %6991  ;;  %v6392_v19 = vpop.f32.mrf.mxu1 }
 0x86e   : > { %v8521_v13 = vadd.f32 %v6392_v19, %v8326_v4  ;;  %v3286_v22 = vsel %vm1048_vm8, %v8517_v1, 0.0  ;;  %v8525_v31 = vpop.eup %6993  ;;  %v3324_v19 = vpop.permute.xlu0 %3323 }
 0x86f   : > { %3287 = vadd.xlane.f32.xlu1 %v3286_v22  ;;  %v2474_v44 = vpop.f32.mrf.mxu1  ;;  %v3292_v52 = vsel %vm1048_vm8, %v8525_v31, 0.0 }
 0x870   : > { %v8529_v8 = vadd.f32 %v2474_v44, %v1956_v47 }
 0x871   : > { %v8531_v32 = vpop.eup %6995  ;;  %v6395_v46 = vpop.f32.mrf.mxu1 }
 0x872   : > { %v8535_v4 = vadd.f32 %v6395_v46, %v8340_v49  ;;  %v3289_v41 = vsel %vm1048_vm8, %v8531_v32, 0.0  ;;  %v8541_v57 = vpop.eup %6997 }
 0x873   : > { %3293 = vadd.xlane.f32.xlu1 %v3292_v52  ;;  %3290 = vadd.xlane.f32.xlu0 %v3289_v41  ;;  %v2484_v30 = vpop.f32.mrf.mxu1  ;;  %v3298_v49 = vsel %vm1048_vm8, %v8541_v57, 0.0 }
 0x874   : > { %v8543_v40 = vadd.f32 %v2484_v30, %v1958_v50 }
 0x875   : > { %v8545_v6 = vpop.eup %6999  ;;  %v6398_v0 = vpop.f32.mrf.mxu1 }
 0x876   : > { %v8548_v2 = vadd.f32 %v6398_v0, %v8352_v35  ;;  %v3295_v29 = vsel %vm1048_vm8, %v8545_v6, 0.0  ;;  %v3330_v35 = vpop.permute.xlu1 %3329 }
 0x877   : > { %3299 = vadd.xlane.f32.xlu1 %v3298_v49  ;;  %3296 = vadd.xlane.f32.xlu0 %v3295_v29  ;;  %v8590_v33 = vpop.f32.mrf.mxu1 }
 0x87a   : > { %v3328_v36 = vpop.permute.xlu1 %3327 }
 0x87e   : > { %v3326_v48 = vpop.permute.xlu1 %3325 }
 0x888   : > { %3317 = vrot.lane.b32.xlu1 %v7745_v62, %s7328_s13 }
 0x88c   : > { %4186 = vrot.lane.b32.xlu1 %v7619_v9, %s7330_s23 }
 0x88d   : > { %3319 = vrot.lane.b32.xlu0 %v7741_v61, %s7328_s13 }
 0x890   : > { %4182 = vrot.lane.b32.xlu1 %v7633_v11, %s7330_s23 }
 0x891   : > { %4188 = vrot.lane.b32.xlu0 %v7617_v7, %s7330_s23 }
 0x894   : > { %4178 = vrot.lane.b32.xlu1 %v7645_v14, %s7330_s23 }
 0x895   : > { %4184 = vrot.lane.b32.xlu0 %v7627_v10, %s7330_s23 }
 0x898   : > { %4174 = vrot.lane.b32.xlu1 %v7657_v18, %s7330_s23 }
 0x899   : > { %4180 = vrot.lane.b32.xlu0 %v7639_v12, %s7330_s23 }
 0x89c   : > { %4160 = vrot.lane.b32.xlu1 %v7667_v21, %s7330_s23 }
 0x89d   : > { %4176 = vrot.lane.b32.xlu0 %v7651_v16, %s7330_s23 }
 0x8a0   : > { %4164 = vrot.lane.b32.xlu1 %v7669_v23, %s7330_s23 }
 0x8a1   : > { %4158 = vrot.lane.b32.xlu0 %v7612_v3, %s7330_s23 }
 0x8a4   : > { %4168 = vrot.lane.b32.xlu1 %v7677_v26, %s7330_s23 }
 0x8a5   : > { %4162 = vrot.lane.b32.xlu0 %v7665_v20, %s7330_s23 }
 0x8a8   : > { %4172 = vrot.lane.b32.xlu1 %v7685_v28, %s7330_s23 }
 0x8a9   : > { %4166 = vrot.lane.b32.xlu0 %v7675_v24, %s7330_s23 }
 0x8ad   : > { %4170 = vrot.lane.b32.xlu0 %v7683_v27, %s7330_s23 }
 0x8c6   : > { %v6445_v56 = vpop.f32.mrf.mxu1 }
 0x8c8   : > { %v2882_v63 = vpop.f32.mrf.mxu1 }
 0x8c9   : > { %6459 = vmatprep.mubr.msk.f32.mxu1 %vm894_vm7, %v2882_v63 }
 0x8ca   : > { %v6448_v17 = vpop.f32.mrf.mxu1  ;;  %6460 = vmatmul.mubr.msk.f32.vlgmr.msra.gmra.mxu1 %vm894_vm7, %v6445_v56 }
 0x8cb   : > { %6500 = vmatpush3.msra.mxu1 %v8500_v39  ;;  %v3322_v39 = vpop.permute.xlu1 %3321 }
 0x8cc   : > { %6501 = vmatprep.subr.mxu1 %v3330_v35  ;;  %v2892_v45 = vpop.f32.mrf.mxu1 }
 0x8cd   : > { %6502 = vmatpush3.msra.mxu1 %v3330_v35  ;;  %6462 = vmatprep.mubr.msk.f32.mxu1 %vm894_vm7, %v2892_v45 }
 0x8ce   : > { %6503 = vmatprep.subr.mxu1 %v3328_v36  ;;  %v6451_v42 = vpop.f32.mrf.mxu1  ;;  %6463 = vmatmul.mubr.msk.f32.gmra.mxu1 %vm894_vm7, %v6448_v17 }
 0x8cf   : > { %6504 = vmatpush3.msra.mxu1 %v3328_v36 }
 0x8d0   : > { %6505 = vmatprep.subr.mxu1 %v3326_v48  ;;  %v2902_v53 = vpop.f32.mrf.mxu1 }
 0x8d1   : > { %6506 = vmatpush3.msra.mxu1 %v3326_v48  ;;  %6465 = vmatprep.mubr.msk.f32.mxu1 %vm894_vm7, %v2902_v53 }
 0x8d2   : > { %6507 = vmatprep.subr.mxu1 %v3324_v19  ;;  %v6454_v47 = vpop.f32.mrf.mxu1  ;;  %6466 = vmatmul.mubr.msk.f32.gmra.mxu1 %vm894_vm7, %v6451_v42 }
 0x8d3   : > { %6508 = vmatpush3.msra.mxu1 %v3324_v19 }
 0x8d4   : > { %6509 = vmatprep.subr.mxu1 %v3322_v39  ;;  %v2912_v22 = vpop.f32.mrf.mxu1 }
 0x8d5   : > { %6510 = vmatpush3.msra.mxu1 %v3322_v39  ;;  %6468 = vmatprep.mubr.msk.f32.mxu1 %vm894_vm7, %v2912_v22 }
 0x8d6   : > { %6469 = vmatmul.mubr.msk.f32.gmra.mxu1 %vm894_vm7, %v6454_v47 }
 0x8e6   : > { %v8601_v44 = vpop.f32.mrf.mxu0 }
 0x8e7   : > { %v3781_v25 = vsel %vm1048_vm8, %v8601_v44, -inf }
 0x8e8   : > { %v8605_v46 = vpop.f32.mrf.mxu0  ;;  %3782 = vmax.xlane.f32.xlu1 %v3781_v25 }
 0x8e9   : > { %v3778_v50 = vsel %vm1048_vm8, %v8605_v46, -inf }
 0x8ea   : > { %v8609_v52 = vpop.f32.mrf.mxu0  ;;  %3779 = vmax.xlane.f32.xlu0 %v3778_v50 }
 0x8eb   : > { %v3787_v56 = vsel %vm1048_vm8, %v8609_v52, -inf }
 0x8ec   : > { %v8611_v41 = vpop.f32.mrf.mxu0 }
 0x8ed   : > { %v3784_v30 = vsel %vm1048_vm8, %v8611_v41, -inf }
 0x8ee   : > { %v8615_v0 = vpop.f32.mrf.mxu0  ;;  %3785 = vmax.xlane.f32.xlu0 %v3784_v30 }
 0x8ef   : > { %v3793_v49 = vsel %vm1048_vm8, %v8615_v0, -inf  ;;  %v3282_v17 = vpop.xlane.xlu1 %3281 }
 0x8f0   : > { %v3279_v29 = vpop.xlane.xlu0 %3278  ;;  %v8619_v35 = vpop.f32.mrf.mxu0  ;;  %3794 = vmax.xlane.f32.xlu1 %v3793_v49 }
 0x8f1   : > { %7001 = vrcp.f32 %v3279_v29  ;;  %v3790_v48 = vsel %vm1048_vm8, %v8619_v35, -inf }
 0x8f2   : > { %v8623_v36 = vpop.f32.mrf.mxu0  ;;  %3788 = vmax.xlane.f32.xlu0 %v3787_v56  ;;  %7003 = vrcp.f32 %v3282_v17 }
 0x8f3   : > { %v3799_v63 = vsel %vm1048_vm8, %v8623_v36, -inf }
 0x8f4   : > { %3800 = vmax.xlane.f32.xlu1 %v3799_v63  ;;  %v3285_v45 = vpop.xlane.xlu0 %3284  ;;  %v8629_v42 = vpop.f32.mrf.mxu0 }
 0x8f5   : > { %7005 = vrcp.f32 %v3285_v45  ;;  %v3796_v19 = vsel %vm1048_vm8, %v8629_v42, -inf }
 0x8f6   : > { %3791 = vmax.xlane.f32.xlu0 %v3790_v48 }
 0x8f8   : > { %v3288_v53 = vpop.xlane.xlu1 %3287 }
 0x8f9   : > { %7007 = vrcp.f32 %v3288_v53  ;;  %v3471_v53 = vld [vmem:[#allocation11 + $0x48] sm:$0xff] }
 0x8fa   : > { %3797 = vmax.xlane.f32.xlu0 %v3796_v19  ;;  %v3470_v19 = vld [vmem:[#allocation11 + $0x40] sm:$0xff] }
 0x8fc   : > { %v3294_v47 = vpop.xlane.xlu1 %3293  ;;  %v3291_v39 = vpop.xlane.xlu0 %3290 }
 0x8fd   : > { %7009 = vrcp.f32 %v3291_v39 }
 0x8fe   : > { %v7002_v22 = vpop.eup %7001  ;;  %7011 = vrcp.f32 %v3294_v47 }
 0x8ff   : > { %v3309_v25 = vmul.f32 %v7002_v22, %v8494_v51  ;;  %v7004_v49 = vpop.eup %7003 }
 0x900   : > { %v3300_v50 = vpop.xlane.xlu1 %3299  ;;  %v3297_v30 = vpop.xlane.xlu0 %3296  ;;  %v3310_v17 = vmul.f32 %v7004_v49, %v8491_v15 }
 0x901   : > { %6515 = vmatprep.mubr.msk.f32.mxu1 %vm1048_vm8, %v3309_v25  ;;  %7013 = vrcp.f32 %v3297_v30 }
 0x902   : > { %7015 = vrcp.f32 %v3300_v50  ;;  %v7006_v56 = vpop.eup %7005 }
 0x903   : > { %v3311_v48 = vmul.f32 %v7006_v56, %v8505_v43 }
 0x904   : > { %v3320_v29 = vpop.permute.xlu0 %3319  ;;  %v3318_v63 = vpop.permute.xlu1 %3317 }
 0x905   : > { %6511 = vmatprep.subr.mxu1 %v3320_v29  ;;  %3878 = vrot.lane.b32.xlu1 %v7723_v55, %s7329_s19 }
 0x906   : > { %6512 = vmatpush3.msra.mxu1 %v3320_v29  ;;  %v7008_v45 = vpop.eup %7007 }
 0x907   : > { %6513 = vmatprep.subr.mxu1 %v3318_v63  ;;  %v3312_v15 = vmul.f32 %v7008_v45, %v8517_v1 }
 0x908   : > { %6514 = vmatpush3.msra.mxu1 %v3318_v63  ;;  %v4189_v51 = vpop.permute.xlu0 %4188  ;;  %v4187_v39 = vpop.permute.xlu1 %4186 }
 0x909   : > { %6516 = vmatmul.mubr.msk.f32.vlgmr.msra.gmra.mxu1 %vm1048_vm8, %v3310_v17  ;;  %6615 = vmatprep.subr.msk.mxu0 %vm894_vm7, %v4189_v51 }
 0x90a   : > { %3876 = vrot.lane.b32.xlu1 %v7721_v54, %s7329_s19  ;;  %6518 = vmatprep.mubr.msk.f32.mxu1 %vm1048_vm8, %v3311_v48  ;;  %v7010_v47 = vpop.eup %7009 }
 0x90b   : > { %6616 = vmatpush3.xpose.msk.msra.mxu0 %vm894_vm7, %v4189_v51  ;;  %6527 = vmatprep.subr.mxu1 %v3471_v53  ;;  %v7012_v22 = vpop.eup %7011  ;;  %v3313_v25 = vmul.f32 %v7010_v47, %v8531_v32 }
 0x90c   : > { %6617 = vmatprep.subr.msk.mxu0 %vm894_vm7, %v4187_v39  ;;  %v4185_v43 = vpop.permute.xlu0 %4184  ;;  %6528 = vmatpush3.msra.mxu1 %v3471_v53  ;;  %v3314_v1 = vmul.f32 %v7012_v22, %v8525_v31  ;;  %v4183_v29 = vpop.permute.xlu1 %4182 }
 0x90d   : > { %6519 = vmatmul.mubr.msk.f32.gmra.mxu1 %vm1048_vm8, %v3312_v15  ;;  %6529 = vmatprep.subr.mxu1 %v3470_v19 }
 0x90e   : > { %3874 = vrot.lane.b32.xlu1 %v7729_v58, %s7329_s19  ;;  %6521 = vmatprep.mubr.msk.f32.mxu1 %vm1048_vm8, %v3313_v25  ;;  %v7014_v50 = vpop.eup %7013 }
 0x90f   : > { %6618 = vmatpush3.xpose.msk.msra.mxu0 %vm894_vm7, %v4187_v39  ;;  %6530 = vmatpush3.msra.mxu1 %v3470_v19  ;;  %v7016_v30 = vpop.eup %7015  ;;  %v3315_v32 = vmul.f32 %v7014_v50, %v8545_v6 }
 0x910   : > { %6619 = vmatprep.subr.msk.mxu0 %vm894_vm7, %v4185_v43  ;;  %v4181_v49 = vpop.permute.xlu0 %4180  ;;  %3880 = vrot.lane.b32.xlu0 %v7695_v38, %s7329_s19  ;;  %v3316_v31 = vmul.f32 %v7016_v30, %v8541_v57  ;;  %v4179_v6 = vpop.permute.xlu1 %4178 }
 0x911   : > { %6522 = vmatmul.mubr.msk.f32.gmra.mxu1 %vm1048_vm8, %v3314_v1 }
 0x912   : > { %3870 = vrot.lane.b32.xlu1 %v7737_v60, %s7329_s19  ;;  %6524 = vmatprep.mubr.msk.f32.mxu1 %vm1048_vm8, %v3315_v32 }
 0x913   : > { %6620 = vmatpush3.xpose.msk.msra.mxu0 %vm894_vm7, %v4185_v43 }
 0x914   : > { %6621 = vmatprep.subr.msk.mxu0 %vm894_vm7, %v4183_v29  ;;  %v4177_v56 = vpop.permute.xlu0 %4176  ;;  %3872 = vrot.lane.b32.xlu0 %v7733_v59, %s7329_s19  ;;  %v4175_v57 = vpop.permute.xlu1 %4174 }
 0x915   : > { %6525 = vmatmul.mubr.msk.f32.gmra.mxu1 %vm1048_vm8, %v3316_v31 }
 0x917   : > { %6622 = vmatpush3.xpose.msk.msra.mxu0 %vm894_vm7, %v4183_v29 }
 0x918   : > { %6623 = vmatprep.subr.msk.mxu0 %vm894_vm7, %v4181_v49  ;;  %v4159_v63 = vpop.permute.xlu0 %4158  ;;  %v4161_v17 = vpop.permute.xlu1 %4160 }
 0x919   : > { %6631 = vmatprep.mubr.msk.f32.mxu0 %vm894_vm7, %v4159_v63 }
 0x91b   : > { %6624 = vmatpush3.xpose.msk.msra.mxu0 %vm894_vm7, %v4181_v49 }
 0x91c   : > { %6625 = vmatprep.subr.msk.mxu0 %vm894_vm7, %v4179_v6  ;;  %v4163_v45 = vpop.permute.xlu0 %4162  ;;  %v4165_v51 = vpop.permute.xlu1 %4164 }
 0x91f   : > { %6626 = vmatpush3.xpose.msk.msra.mxu0 %vm894_vm7, %v4179_v6 }
 0x920   : > { %6627 = vmatprep.subr.msk.mxu0 %vm894_vm7, %v4177_v56  ;;  %v4167_v48 = vpop.permute.xlu0 %4166  ;;  %v4169_v53 = vpop.permute.xlu1 %4168 }
 0x923   : > { %6628 = vmatpush3.xpose.msk.msra.mxu0 %vm894_vm7, %v4177_v56 }
 0x924   : > { %6629 = vmatprep.subr.msk.mxu0 %vm894_vm7, %v4175_v57  ;;  %v4171_v19 = vpop.permute.xlu0 %4170  ;;  %v4173_v47 = vpop.permute.xlu1 %4172 }
 0x927   : > { %6630 = vmatpush3.xpose.msk.msra.mxu0 %vm894_vm7, %v4175_v57 }
 0x92a   : > { %6632 = vmatmul.mubr.msk.f32.vlgmr.msra.gmra.mxu0 %vm894_vm7, %v4161_v17 }
 0x92b   : > { %6634 = vmatprep.mubr.msk.f32.mxu0 %vm894_vm7, %v4163_v45 }
 0x92e   : > { %6635 = vmatmul.mubr.msk.f32.gmra.mxu0 %vm894_vm7, %v4165_v51 }
 0x92f   : > { %6637 = vmatprep.mubr.msk.f32.mxu0 %vm894_vm7, %v4167_v48 }
 0x932   : > { %6638 = vmatmul.mubr.msk.f32.gmra.mxu0 %vm894_vm7, %v4169_v53 }
 0x933   : > { %6640 = vmatprep.mubr.msk.f32.mxu0 %vm894_vm7, %v4171_v19 }
 0x936   : > { %6641 = vmatmul.mubr.msk.f32.gmra.mxu0 %vm894_vm7, %v4173_v47 }
 0x971   : > { %v3783_v39 = vpop.xlane.xlu1 %3782 }
 0x972   : > { %v3803_v15 = vsub.f32 %v8601_v44, %v3783_v39 }
 0x973   : > { %v3780_v22 = vpop.xlane.xlu0 %3779 }
 0x974   : > { %v3812_v43 = vmul.f32 1.442695, %v3803_v15  ;;  %v3802_v25 = vsub.f32 %v8605_v46, %v3780_v22 }
 0x976   : > { %7017 = vpow2.f32 %v3812_v43  ;;  %v3810_v50 = vmul.f32 1.442695, %v3802_v25 }
 0x977   : > { %v3786_v1 = vpop.xlane.xlu0 %3785 }
 0x978   : > { %7019 = vpow2.f32 %v3810_v50  ;;  %v3804_v30 = vsub.f32 %v8611_v41, %v3786_v1 }
 0x979   : > { %v3795_v49 = vpop.xlane.xlu1 %3794 }
 0x97a   : > { %v3814_v32 = vmul.f32 1.442695, %v3804_v30  ;;  %v3807_v29 = vsub.f32 %v8615_v0, %v3795_v49 }
 0x97b   : > { %v3789_v31 = vpop.xlane.xlu0 %3788 }
 0x97c   : > { %7021 = vpow2.f32 %v3814_v32  ;;  %v3805_v56 = vsub.f32 %v8609_v52, %v3789_v31  ;;  %v3820_v44 = vmul.f32 1.442695, %v3807_v29 }
 0x97d   : > { %v3801_v6 = vpop.xlane.xlu1 %3800 }
 0x97e   : > { %v3816_v63 = vmul.f32 1.442695, %v3805_v56  ;;  %v3809_v57 = vsub.f32 %v8623_v36, %v3801_v6 }
 0x97f   : > { %v3792_v46 = vpop.xlane.xlu0 %3791 }
 0x980   : > { %7023 = vpow2.f32 %v3816_v63  ;;  %v3806_v17 = vsub.f32 %v8619_v35, %v3792_v46  ;;  %v3824_v45 = vmul.f32 1.442695, %v3809_v57  ;;  %v9177_v46 = vld [vmem:[#allocation17_spill] sm:$0xff] }
 0x981   : > { %7025 = vpow2.f32 %v3820_v44 }
 0x982   : > { %v3818_v41 = vmul.f32 1.442695, %v3806_v17 }
 0x983   : > { %v8692_v51 = vpop.eup %7017  ;;  %v3798_v48 = vpop.xlane.xlu0 %3797 }
 0x984   : > { %7027 = vpow2.f32 %v3818_v41  ;;  %v3808_v0 = vsub.f32 %v8629_v42, %v3798_v48  ;;  %v3829_v52 = vsel %vm1048_vm8, %v8692_v51, 0.0 }
 0x985   : > { %v8697_v53 = vpop.eup %7019  ;;  %3830 = vadd.xlane.f32.xlu1 %v3829_v52  ;;  %7029 = vpow2.f32 %v3824_v45 }
 0x986   : > { %v3822_v36 = vmul.f32 1.442695, %v3808_v0  ;;  %v3826_v35 = vsel %vm1048_vm8, %v8697_v53, 0.0 }
 0x987   : > { %3827 = vadd.xlane.f32.xlu0 %v3826_v35  ;;  %v8701_v19 = vpop.permute.xlu0 %3880 }
 0x988   : > { %7031 = vpow2.f32 %v3822_v36  ;;  %6571 = vmatprep.subr.mxu1 %v8701_v19 }
 0x989   : > { %v8704_v47 = vpop.eup %7021 }
 0x98a   : > { %v6461_v42 = vpop.f32.mrf.mxu1  ;;  %v3832_v39 = vsel %vm1048_vm8, %v8704_v47, 0.0 }
 0x98b   : > { %v8709_v15 = vadd.f32 %v6461_v42, %v8509_v37  ;;  %3833 = vadd.xlane.f32.xlu0 %v3832_v39 }
 0x98c   : > { %v3013_v22 = vpop.f32.mrf.mxu1 }
 0x98d   : > { %v8711_v43 = vpop.eup %7023  ;;  %v8714_v25 = vadd.f32 %v3013_v22, %v8515_v5 }
 0x98e   : > { %v6464_v50 = vpop.f32.mrf.mxu1  ;;  %v3835_v1 = vsel %vm1048_vm8, %v8711_v43, 0.0  ;;  %v8718_v30 = vpop.eup %7025 }
 0x98f   : > { %v8721_v49 = vadd.f32 %v6464_v50, %v8521_v13  ;;  %3836 = vadd.xlane.f32.xlu1 %v3835_v1  ;;  %v3841_v5 = vsel %vm1048_vm8, %v8718_v30, 0.0  ;;  %v7113_v13 = vld [vmem:[%s9161_s6] ss:$0 sm:$0xff] }
 0x990   : > { %v3023_v32 = vpop.f32.mrf.mxu1  ;;  %v1403_v44 = vadd.f32 %v7113_v13, %v8193_v34 }
 0x991   : > { %v8723_v37 = vpop.eup %7027  ;;  %v8726_v29 = vadd.f32 %v3023_v32, %v8529_v8 }
 0x992   : > { %v6467_v31 = vpop.f32.mrf.mxu1  ;;  %v3838_v56 = vsel %vm1048_vm8, %v8723_v37, 0.0  ;;  %v8732_v6 = vpop.eup %7029  ;;  %v1960_v17 = vadd.f32 %v9177_v46, %v1403_v44 }
 0x993   : > { %v8739_v63 = vadd.f32 %v6467_v31, %v8535_v4  ;;  %3842 = vadd.xlane.f32.xlu1 %v3841_v5  ;;  %3839 = vadd.xlane.f32.xlu0 %v3838_v56  ;;  %v3847_v48 = vsel %vm1048_vm8, %v8732_v6, 0.0 }
 0x994   : > { %v3033_v8 = vpop.f32.mrf.mxu1  ;;  %v2509_v4 = vadd.f32 %v8590_v33, %v1960_v17 }
 0x995   : > { %v8741_v57 = vpop.eup %7031  ;;  %v8745_v45 = vadd.f32 %v3033_v8, %v8543_v40 }
 0x996   : > { %v6470_v41 = vpop.f32.mrf.mxu1  ;;  %v3844_v34 = vsel %vm1048_vm8, %v8741_v57, 0.0 }
 0x997   : > { %v8753_v0 = vadd.f32 %v6470_v41, %v8548_v2  ;;  %3848 = vadd.xlane.f32.xlu1 %v3847_v48  ;;  %3845 = vadd.xlane.f32.xlu0 %v3844_v34 }
 0x998   : > { %v3043_v52 = vpop.f32.mrf.mxu1 }
 0x999   : > { %v8755_v36 = vadd.f32 %v3043_v52, %v2509_v4 }
 0x9a8   : > { %3866 = vrot.lane.b32.xlu1 %v7745_v62, %s7329_s19 }
 0x9ac   : > { %4735 = vrot.lane.b32.xlu1 %v7619_v9, %s7331_s27 }
 0x9ad   : > { %3868 = vrot.lane.b32.xlu0 %v7741_v61, %s7329_s19 }
 0x9b0   : > { %4731 = vrot.lane.b32.xlu1 %v7633_v11, %s7331_s27 }
 0x9b1   : > { %4737 = vrot.lane.b32.xlu0 %v7617_v7, %s7331_s27  ;;  %v3879_v7 = vpop.permute.xlu1 %3878 }
 0x9b4   : > { %4727 = vrot.lane.b32.xlu1 %v7645_v14, %s7331_s27 }
 0x9b5   : > { %4733 = vrot.lane.b32.xlu0 %v7627_v10, %s7331_s27  ;;  %v3877_v10 = vpop.permute.xlu1 %3876 }
 0x9b8   : > { %4723 = vrot.lane.b32.xlu1 %v7657_v18, %s7331_s27 }
 0x9b9   : > { %4729 = vrot.lane.b32.xlu0 %v7639_v12, %s7331_s27  ;;  %v3875_v14 = vpop.permute.xlu1 %3874 }
 0x9bc   : > { %4709 = vrot.lane.b32.xlu1 %v7667_v21, %s7331_s27 }
 0x9bd   : > { %4725 = vrot.lane.b32.xlu0 %v7651_v16, %s7331_s27 }
 0x9c0   : > { %4713 = vrot.lane.b32.xlu1 %v7669_v23, %s7331_s27  ;;  %v3871_v23 = vpop.permute.xlu1 %3870 }
 0x9c1   : > { %4707 = vrot.lane.b32.xlu0 %v7612_v3, %s7331_s27 }
 0x9c4   : > { %4717 = vrot.lane.b32.xlu1 %v7677_v26, %s7331_s27 }
 0x9c5   : > { %4711 = vrot.lane.b32.xlu0 %v7665_v20, %s7331_s27  ;;  %v3873_v20 = vpop.permute.xlu0 %3872 }
 0x9c8   : > { %4721 = vrot.lane.b32.xlu1 %v7685_v28, %s7331_s27 }
 0x9c9   : > { %v6517_v9 = vpop.f32.mrf.mxu1  ;;  %4715 = vrot.lane.b32.xlu0 %v7675_v24, %s7331_s27 }
 0x9cb   : > { %v3431_v11 = vpop.f32.mrf.mxu1 }
 0x9cc   : > { %6531 = vmatprep.mubr.msk.f32.mxu1 %vm894_vm7, %v3431_v11 }
 0x9cd   : > { %v6520_v12 = vpop.f32.mrf.mxu1  ;;  %6532 = vmatmul.mubr.msk.f32.vlgmr.msra.gmra.mxu1 %vm894_vm7, %v6517_v9  ;;  %4719 = vrot.lane.b32.xlu0 %v7683_v27, %s7331_s27 }
 0x9ce   : > { %6572 = vmatpush3.msra.mxu1 %v8701_v19 }
 0x9cf   : > { %6573 = vmatprep.subr.mxu1 %v3879_v7  ;;  %v3441_v3 = vpop.f32.mrf.mxu1 }
 0x9d0   : > { %6574 = vmatpush3.msra.mxu1 %v3879_v7  ;;  %6534 = vmatprep.mubr.msk.f32.mxu1 %vm894_vm7, %v3441_v3 }
 0x9d1   : > { %6575 = vmatprep.subr.mxu1 %v3877_v10  ;;  %v6523_v16 = vpop.f32.mrf.mxu1  ;;  %6535 = vmatmul.mubr.msk.f32.gmra.mxu1 %vm894_vm7, %v6520_v12 }
 0x9d2   : > { %6576 = vmatpush3.msra.mxu1 %v3877_v10 }
 0x9d3   : > { %6577 = vmatprep.subr.mxu1 %v3875_v14  ;;  %v3451_v18 = vpop.f32.mrf.mxu1 }
 0x9d4   : > { %6578 = vmatpush3.msra.mxu1 %v3875_v14  ;;  %6537 = vmatprep.mubr.msk.f32.mxu1 %vm894_vm7, %v3451_v18  ;;  %v4020_v14 = vld [vmem:[#allocation11 + $0x58] sm:$0xff]  ;;  %v4019_v18 = vld [vmem:[#allocation11 + $0x50] sm:$0xff] }
 0x9d5   : > { %6579 = vmatprep.subr.mxu1 %v3873_v20  ;;  %v6526_v21 = vpop.f32.mrf.mxu1  ;;  %6538 = vmatmul.mubr.msk.f32.gmra.mxu1 %vm894_vm7, %v6523_v16 }
 0x9d6   : > { %6580 = vmatpush3.msra.mxu1 %v3873_v20 }
 0x9d7   : > { %6581 = vmatprep.subr.mxu1 %v3871_v23  ;;  %v3461_v24 = vpop.f32.mrf.mxu1 }
 0x9d8   : > { %6582 = vmatpush3.msra.mxu1 %v3871_v23  ;;  %6540 = vmatprep.mubr.msk.f32.mxu1 %vm894_vm7, %v3461_v24 }
 0x9d9   : > { %6541 = vmatmul.mubr.msk.f32.gmra.mxu1 %vm894_vm7, %v6526_v21 }
 0x9ea   : > { %v8802_v26 = vpop.f32.mrf.mxu0 }
 0x9eb   : > { %v4330_v27 = vsel %vm1048_vm8, %v8802_v26, -inf }
 0x9ec   : > { %v8806_v28 = vpop.f32.mrf.mxu0  ;;  %4331 = vmax.xlane.f32.xlu1 %v4330_v27 }
 0x9ed   : > { %v4327_v40 = vsel %vm1048_vm8, %v8806_v28, -inf }
 0x9ee   : > { %v8810_v2 = vpop.f32.mrf.mxu0  ;;  %4328 = vmax.xlane.f32.xlu0 %v4327_v40 }
 0x9ef   : > { %v4336_v22 = vsel %vm1048_vm8, %v8810_v2, -inf }
 0x9f0   : > { %v8812_v33 = vpop.f32.mrf.mxu0 }
 0x9f1   : > { %v4333_v35 = vsel %vm1048_vm8, %v8812_v33, -inf }
 0x9f2   : > { %v8816_v19 = vpop.f32.mrf.mxu0  ;;  %4334 = vmax.xlane.f32.xlu0 %v4333_v35 }
 0x9f3   : > { %v4342_v42 = vsel %vm1048_vm8, %v8816_v19, -inf }
 0x9f4   : > { %v8820_v39 = vpop.f32.mrf.mxu0  ;;  %4343 = vmax.xlane.f32.xlu1 %v4342_v42 }
 0x9f5   : > { %v4339_v32 = vsel %vm1048_vm8, %v8820_v39, -inf }
 0x9f6   : > { %v8824_v50 = vpop.f32.mrf.mxu0  ;;  %4337 = vmax.xlane.f32.xlu0 %v4336_v22 }
 0x9f7   : > { %v4348_v1 = vsel %vm1048_vm8, %v8824_v50, -inf }
 0x9f8   : > { %4349 = vmax.xlane.f32.xlu1 %v4348_v1  ;;  %v8830_v31 = vpop.f32.mrf.mxu0 }
 0x9f9   : > { %v4345_v5 = vsel %vm1048_vm8, %v8830_v31, -inf }
 0x9fa   : > { %4340 = vmax.xlane.f32.xlu0 %v4339_v32 }
 0x9fe   : > { %4346 = vmax.xlane.f32.xlu0 %v4345_v5 }
 0xa09   : > { %4427 = vrot.lane.b32.xlu1 %v7723_v55, %s7330_s23 }
 0xa0d   : > { %4425 = vrot.lane.b32.xlu1 %v7721_v54, %s7330_s23 }
 0xa0e   : > { %v3831_v13 = vpop.xlane.xlu1 %3830 }
 0xa10   : > { %v3828_v56 = vpop.xlane.xlu0 %3827 }
 0xa11   : > { %4423 = vrot.lane.b32.xlu1 %v7729_v58, %s7330_s23  ;;  %7033 = vrcp.f32 %v3828_v56 }
 0xa12   : > { %7035 = vrcp.f32 %v3831_v13 }
 0xa14   : > { %4429 = vrot.lane.b32.xlu0 %v7695_v38, %s7330_s23  ;;  %v3834_v44 = vpop.xlane.xlu0 %3833 }
 0xa15   : > { %4419 = vrot.lane.b32.xlu1 %v7737_v60, %s7330_s23  ;;  %7037 = vrcp.f32 %v3834_v44 }
 0xa18   : > { %4421 = vrot.lane.b32.xlu0 %v7733_v59, %s7330_s23  ;;  %v3837_v8 = vpop.xlane.xlu1 %3836 }
 0xa19   : > { %7039 = vrcp.f32 %v3837_v8 }
 0xa1c   : > { %v3843_v46 = vpop.xlane.xlu1 %3842  ;;  %v3840_v17 = vpop.xlane.xlu0 %3839 }
 0xa1d   : > { %7041 = vrcp.f32 %v3840_v17 }
 0xa1e   : > { %v7034_v41 = vpop.eup %7033  ;;  %7043 = vrcp.f32 %v3843_v46 }
 0xa1f   : > { %v3858_v48 = vmul.f32 %v7034_v41, %v8697_v53  ;;  %v7036_v52 = vpop.eup %7035 }
 0xa20   : > { %v3849_v34 = vpop.xlane.xlu1 %3848  ;;  %v3846_v4 = vpop.xlane.xlu0 %3845  ;;  %v3859_v11 = vmul.f32 %v7036_v52, %v8692_v51 }
 0xa21   : > { %6587 = vmatprep.mubr.msk.f32.mxu1 %vm1048_vm8, %v3858_v48  ;;  %7045 = vrcp.f32 %v3846_v4 }
 0xa22   : > { %7047 = vrcp.f32 %v3849_v34  ;;  %v7038_v10 = vpop.eup %7037 }
 0xa23   : > { %v3860_v53 = vmul.f32 %v7038_v10, %v8704_v47 }
 0xa24   : > { %v3867_v7 = vpop.permute.xlu1 %3866  ;;  %v3869_v9 = vpop.permute.xlu0 %3868 }
 0xa25   : > { %6583 = vmatprep.subr.mxu1 %v3869_v9 }
 0xa26   : > { %6584 = vmatpush3.msra.mxu1 %v3869_v9  ;;  %v7040_v12 = vpop.eup %7039 }
 0xa27   : > { %6585 = vmatprep.subr.mxu1 %v3867_v7  ;;  %v3861_v51 = vmul.f32 %v7040_v12, %v8711_v43 }
 0xa28   : > { %6586 = vmatpush3.msra.mxu1 %v3867_v7  ;;  %v4738_v3 = vpop.permute.xlu0 %4737  ;;  %v4736_v16 = vpop.permute.xlu1 %4735 }
 0xa29   : > { %6588 = vmatmul.mubr.msk.f32.vlgmr.msra.gmra.mxu1 %vm1048_vm8, %v3859_v11  ;;  %6687 = vmatprep.subr.msk.mxu0 %vm894_vm7, %v4738_v3 }
 0xa2a   : > { %6590 = vmatprep.mubr.msk.f32.mxu1 %vm1048_vm8, %v3860_v53  ;;  %6688 = vmatpush3.xpose.msk.msra.mxu0 %vm894_vm7, %v4738_v3  ;;  %v7042_v20 = vpop.eup %7041 }
 0xa2b   : > { %6689 = vmatprep.subr.msk.mxu0 %vm894_vm7, %v4736_v16  ;;  %6599 = vmatprep.subr.mxu1 %v4020_v14  ;;  %v7044_v21 = vpop.eup %7043  ;;  %v3862_v47 = vmul.f32 %v7042_v20, %v8723_v37 }
 0xa2c   : > { %v4734_v23 = vpop.permute.xlu0 %4733  ;;  %6600 = vmatpush3.msra.mxu1 %v4020_v14  ;;  %v3863_v27 = vmul.f32 %v7044_v21, %v8718_v30  ;;  %v4732_v40 = vpop.permute.xlu1 %4731 }
 0xa2d   : > { %6591 = vmatmul.mubr.msk.f32.gmra.mxu1 %vm1048_vm8, %v3861_v51  ;;  %6601 = vmatprep.subr.mxu1 %v4019_v18 }
 0xa2e   : > { %6593 = vmatprep.mubr.msk.f32.mxu1 %vm1048_vm8, %v3862_v47  ;;  %6690 = vmatpush3.xpose.msk.msra.mxu0 %vm894_vm7, %v4736_v16  ;;  %v7046_v24 = vpop.eup %7045 }
 0xa2f   : > { %6691 = vmatprep.subr.msk.mxu0 %vm894_vm7, %v4734_v23  ;;  %6602 = vmatpush3.msra.mxu1 %v4019_v18  ;;  %v7048_v43 = vpop.eup %7047  ;;  %v3864_v42 = vmul.f32 %v7046_v24, %v8741_v57 }
 0xa30   : > { %v4730_v35 = vpop.permute.xlu0 %4729  ;;  %v3865_v37 = vmul.f32 %v7048_v43, %v8732_v6  ;;  %v4728_v30 = vpop.permute.xlu1 %4727 }
 0xa31   : > { %6594 = vmatmul.mubr.msk.f32.gmra.mxu1 %vm1048_vm8, %v3863_v27 }
 0xa32   : > { %6596 = vmatprep.mubr.msk.f32.mxu1 %vm1048_vm8, %v3864_v42  ;;  %6692 = vmatpush3.xpose.msk.msra.mxu0 %vm894_vm7, %v4734_v23 }
 0xa33   : > { %6693 = vmatprep.subr.msk.mxu0 %vm894_vm7, %v4732_v40 }
 0xa34   : > { %v4726_v22 = vpop.permute.xlu0 %4725  ;;  %v4724_v57 = vpop.permute.xlu1 %4723 }
 0xa35   : > { %6597 = vmatmul.mubr.msk.f32.gmra.mxu1 %vm1048_vm8, %v3865_v37 }
 0xa36   : > { %6694 = vmatpush3.xpose.msk.msra.mxu0 %vm894_vm7, %v4732_v40 }
 0xa37   : > { %6695 = vmatprep.subr.msk.mxu0 %vm894_vm7, %v4730_v35 }
 0xa38   : > { %v4708_v1 = vpop.permute.xlu0 %4707  ;;  %v4710_v6 = vpop.permute.xlu1 %4709 }
 0xa39   : > { %6703 = vmatprep.mubr.msk.f32.mxu0 %vm894_vm7, %v4708_v1 }
 0xa3a   : > { %6696 = vmatpush3.xpose.msk.msra.mxu0 %vm894_vm7, %v4730_v35 }
 0xa3b   : > { %6697 = vmatprep.subr.msk.mxu0 %vm894_vm7, %v4728_v30 }
 0xa3c   : > { %v4712_v32 = vpop.permute.xlu0 %4711  ;;  %v4714_v5 = vpop.permute.xlu1 %4713 }
 0xa3e   : > { %6698 = vmatpush3.xpose.msk.msra.mxu0 %vm894_vm7, %v4728_v30 }
 0xa3f   : > { %6699 = vmatprep.subr.msk.mxu0 %vm894_vm7, %v4726_v22 }
 0xa40   : > { %v4716_v56 = vpop.permute.xlu0 %4715  ;;  %v4718_v13 = vpop.permute.xlu1 %4717 }
 0xa42   : > { %6700 = vmatpush3.xpose.msk.msra.mxu0 %vm894_vm7, %v4726_v22 }
 0xa43   : > { %6701 = vmatprep.subr.msk.mxu0 %vm894_vm7, %v4724_v57 }
 0xa44   : > { %v4720_v44 = vpop.permute.xlu0 %4719  ;;  %v4722_v8 = vpop.permute.xlu1 %4721 }
 0xa46   : > { %6702 = vmatpush3.xpose.msk.msra.mxu0 %vm894_vm7, %v4724_v57 }
 0xa49   : > { %6704 = vmatmul.mubr.msk.f32.vlgmr.msra.gmra.mxu0 %vm894_vm7, %v4710_v6 }
 0xa4a   : > { %6706 = vmatprep.mubr.msk.f32.mxu0 %vm894_vm7, %v4712_v32 }
 0xa4d   : > { %6707 = vmatmul.mubr.msk.f32.gmra.mxu0 %vm894_vm7, %v4714_v5 }
 0xa4e   : > { %6709 = vmatprep.mubr.msk.f32.mxu0 %vm894_vm7, %v4716_v56 }
 0xa51   : > { %6710 = vmatmul.mubr.msk.f32.gmra.mxu0 %vm894_vm7, %v4718_v13 }
 0xa52   : > { %6712 = vmatprep.mubr.msk.f32.mxu0 %vm894_vm7, %v4720_v44 }
 0xa55   : > { %6713 = vmatmul.mubr.msk.f32.gmra.mxu0 %vm894_vm7, %v4722_v8 }
 0xa75   : > { %v4332_v46 = vpop.xlane.xlu1 %4331 }
 0xa76   : > { %v4352_v17 = vsub.f32 %v8802_v26, %v4332_v46 }
 0xa77   : > { %v4329_v41 = vpop.xlane.xlu0 %4328 }
 0xa78   : > { %v4361_v48 = vmul.f32 1.442695, %v4352_v17  ;;  %v4351_v34 = vsub.f32 %v8806_v28, %v4329_v41 }
 0xa7a   : > { %7049 = vpow2.f32 %v4361_v48  ;;  %v4359_v4 = vmul.f32 1.442695, %v4351_v34 }
 0xa7b   : > { %v4335_v52 = vpop.xlane.xlu0 %4334 }
 0xa7c   : > { %7051 = vpow2.f32 %v4359_v4  ;;  %v4353_v7 = vsub.f32 %v8812_v33, %v4335_v52 }
 0xa7d   : > { %v4344_v9 = vpop.xlane.xlu1 %4343 }
 0xa7e   : > { %v4363_v10 = vmul.f32 1.442695, %v4353_v7  ;;  %v4356_v11 = vsub.f32 %v8816_v19, %v4344_v9 }
 0xa7f   : > { %v4338_v12 = vpop.xlane.xlu0 %4337 }
 0xa80   : > { %7053 = vpow2.f32 %v4363_v10  ;;  %v4354_v3 = vsub.f32 %v8810_v2, %v4338_v12  ;;  %v4369_v26 = vmul.f32 1.442695, %v4356_v11 }
 0xa81   : > { %v4350_v53 = vpop.xlane.xlu1 %4349 }
 0xa82   : > { %v4365_v14 = vmul.f32 1.442695, %v4354_v3  ;;  %v4358_v16 = vsub.f32 %v8824_v50, %v4350_v53 }
 0xa83   : > { %v4341_v28 = vpop.xlane.xlu0 %4340 }
 0xa84   : > { %7055 = vpow2.f32 %v4365_v14  ;;  %v4355_v18 = vsub.f32 %v8820_v39, %v4341_v28  ;;  %v4373_v20 = vmul.f32 1.442695, %v4358_v16 }
 0xa85   : > { %7057 = vpow2.f32 %v4369_v26 }
 0xa86   : > { %v4367_v33 = vmul.f32 1.442695, %v4355_v18 }
 0xa87   : > { %v8893_v51 = vpop.eup %7049  ;;  %v4347_v21 = vpop.xlane.xlu0 %4346 }
 0xa88   : > { %7059 = vpow2.f32 %v4367_v33  ;;  %v4357_v19 = vsub.f32 %v8830_v31, %v4347_v21  ;;  %v4378_v2 = vsel %vm1048_vm8, %v8893_v51, 0.0 }
 0xa89   : > { %v8898_v23 = vpop.eup %7051  ;;  %4379 = vadd.xlane.f32.xlu1 %v4378_v2  ;;  %7061 = vpow2.f32 %v4373_v20 }
 0xa8a   : > { %v4371_v50 = vmul.f32 1.442695, %v4357_v19  ;;  %v4375_v39 = vsel %vm1048_vm8, %v8898_v23, 0.0 }
 0xa8b   : > { %4376 = vadd.xlane.f32.xlu0 %v4375_v39  ;;  %v4430_v47 = vpop.permute.xlu0 %4429 }
 0xa8c   : > { %7063 = vpow2.f32 %v4371_v50  ;;  %6643 = vmatprep.subr.mxu1 %v4430_v47 }
 0xa8d   : > { %v8902_v24 = vpop.eup %7053  ;;  %v6533_v27 = vpop.f32.mrf.mxu1 }
 0xa8e   : > { %v8905_v31 = vadd.f32 %v6533_v27, %v8709_v15  ;;  %v4381_v43 = vsel %vm1048_vm8, %v8902_v24, 0.0 }
 0xa8f   : > { %4382 = vadd.xlane.f32.xlu0 %v4381_v43  ;;  %v3562_v40 = vpop.f32.mrf.mxu1  ;;  %v4422_v11 = vpop.permute.xlu0 %4421 }
 0xa90   : > { %v8910_v35 = vadd.f32 %v3562_v40, %v8714_v25 }
 0xa91   : > { %v8912_v42 = vpop.eup %7055  ;;  %v6536_v37 = vpop.f32.mrf.mxu1 }
 0xa92   : > { %v8915_v22 = vadd.f32 %v6536_v37, %v8721_v49  ;;  %v4384_v30 = vsel %vm1048_vm8, %v8912_v42, 0.0  ;;  %v8919_v1 = vpop.eup %7057 }
 0xa93   : > { %4385 = vadd.xlane.f32.xlu1 %v4384_v30  ;;  %v3572_v15 = vpop.f32.mrf.mxu1  ;;  %v4390_v49 = vsel %vm1048_vm8, %v8919_v1, 0.0 }
 0xa94   : > { %v8922_v57 = vadd.f32 %v3572_v15, %v8726_v29 }
 0xa95   : > { %v8924_v6 = vpop.eup %7059  ;;  %v6539_v25 = vpop.f32.mrf.mxu1 }
 0xa96   : > { %v8927_v32 = vadd.f32 %v6539_v25, %v8739_v63  ;;  %v4387_v5 = vsel %vm1048_vm8, %v8924_v6, 0.0  ;;  %v8933_v56 = vpop.eup %7061 }
 0xa97   : > { %4391 = vadd.xlane.f32.xlu1 %v4390_v49  ;;  %4388 = vadd.xlane.f32.xlu0 %v4387_v5  ;;  %v3582_v13 = vpop.f32.mrf.mxu1  ;;  %v4396_v46 = vsel %vm1048_vm8, %v8933_v56, 0.0 }
 0xa98   : > { %v8936_v29 = vadd.f32 %v3582_v13, %v8745_v45  ;;  %v4428_v45 = vpop.permute.xlu1 %4427 }
 0xa99   : > { %v8938_v44 = vpop.eup %7063  ;;  %v6542_v8 = vpop.f32.mrf.mxu1 }
 0xa9a   : > { %v8941_v63 = vadd.f32 %v6542_v8, %v8753_v0  ;;  %v4393_v17 = vsel %vm1048_vm8, %v8938_v44, 0.0 }
 0xa9b   : > { %4397 = vadd.xlane.f32.xlu1 %v4396_v46  ;;  %4394 = vadd.xlane.f32.xlu0 %v4393_v17  ;;  %v8951_v41 = vpop.f32.mrf.mxu1 }
 0xa9c   : > { %v4426_v0 = vpop.permute.xlu1 %4425 }
 0xaa0   : > { %v4424_v7 = vpop.permute.xlu1 %4423 }
 0xaa4   : > { %v4420_v3 = vpop.permute.xlu1 %4419 }
 0xaac   : > { %4415 = vrot.lane.b32.xlu1 %v7745_v62, %s7330_s23 }
 0xab1   : > { %4417 = vrot.lane.b32.xlu0 %v7741_v61, %s7330_s23 }
 0xae9   : > { %v6589_v48 = vpop.f32.mrf.mxu1 }
 0xaeb   : > { %v3980_v34 = vpop.f32.mrf.mxu1 }
 0xaec   : > { %6603 = vmatprep.mubr.msk.f32.mxu1 %vm894_vm7, %v3980_v34 }
 0xaed   : > { %v6592_v4 = vpop.f32.mrf.mxu1  ;;  %6604 = vmatmul.mubr.msk.f32.vlgmr.msra.gmra.mxu1 %vm894_vm7, %v6589_v48 }
 0xaee   : > { %6644 = vmatpush3.msra.mxu1 %v4430_v47 }
 0xaef   : > { %6645 = vmatprep.subr.mxu1 %v4428_v45  ;;  %v3990_v52 = vpop.f32.mrf.mxu1 }
 0xaf0   : > { %6646 = vmatpush3.msra.mxu1 %v4428_v45  ;;  %6606 = vmatprep.mubr.msk.f32.mxu1 %vm894_vm7, %v3990_v52 }
 0xaf1   : > { %6647 = vmatprep.subr.mxu1 %v4426_v0  ;;  %v6595_v9 = vpop.f32.mrf.mxu1  ;;  %6607 = vmatmul.mubr.msk.f32.gmra.mxu1 %vm894_vm7, %v6592_v4  ;;  %v4569_v4 = vld [vmem:[#allocation11 + $0x68] sm:$0xff] }
 0xaf2   : > { %6648 = vmatpush3.msra.mxu1 %v4426_v0 }
 0xaf3   : > { %6649 = vmatprep.subr.mxu1 %v4424_v7  ;;  %v4000_v10 = vpop.f32.mrf.mxu1 }
 0xaf4   : > { %6650 = vmatpush3.msra.mxu1 %v4424_v7  ;;  %6609 = vmatprep.mubr.msk.f32.mxu1 %vm894_vm7, %v4000_v10 }
 0xaf5   : > { %6651 = vmatprep.subr.mxu1 %v4422_v11  ;;  %v6598_v12 = vpop.f32.mrf.mxu1  ;;  %6610 = vmatmul.mubr.msk.f32.gmra.mxu1 %vm894_vm7, %v6595_v9  ;;  %v4568_v9 = vld [vmem:[#allocation11 + $0x60] sm:$0xff] }
 0xaf6   : > { %6652 = vmatpush3.msra.mxu1 %v4422_v11 }
 0xaf7   : > { %6653 = vmatprep.subr.mxu1 %v4420_v3  ;;  %v4010_v53 = vpop.f32.mrf.mxu1 }
 0xaf8   : > { %6654 = vmatpush3.msra.mxu1 %v4420_v3  ;;  %6612 = vmatprep.mubr.msk.f32.mxu1 %vm894_vm7, %v4010_v53 }
 0xaf9   : > { %6613 = vmatmul.mubr.msk.f32.gmra.mxu1 %vm894_vm7, %v6598_v12 }
 0xb09   : > { %v8961_v26 = vpop.f32.mrf.mxu0 }
 0xb0a   : > { %v4879_v14 = vsel %vm1048_vm8, %v8961_v26, -inf }
 0xb0b   : > { %v8965_v16 = vpop.f32.mrf.mxu0  ;;  %4880 = vmax.xlane.f32.xlu1 %v4879_v14 }
 0xb0c   : > { %v4876_v28 = vsel %vm1048_vm8, %v8965_v16, -inf }
 0xb0d   : > { %v8969_v18 = vpop.f32.mrf.mxu0  ;;  %4877 = vmax.xlane.f32.xlu0 %v4876_v28 }
 0xb0e   : > { %v4885_v39 = vsel %vm1048_vm8, %v8969_v18, -inf }
 0xb0f   : > { %v8971_v20 = vpop.f32.mrf.mxu0 }
 0xb10   : > { %v4882_v33 = vsel %vm1048_vm8, %v8971_v20, -inf }
 0xb11   : > { %v8975_v21 = vpop.f32.mrf.mxu0  ;;  %4883 = vmax.xlane.f32.xlu0 %v4882_v33 }
 0xb12   : > { %v4891_v19 = vsel %vm1048_vm8, %v8975_v21, -inf  ;;  %v4380_v43 = vpop.xlane.xlu1 %4379 }
 0xb13   : > { %v8979_v2 = vpop.f32.mrf.mxu0  ;;  %4892 = vmax.xlane.f32.xlu1 %v4891_v19 }
 0xb14   : > { %v4377_v50 = vpop.xlane.xlu0 %4376  ;;  %v4888_v40 = vsel %vm1048_vm8, %v8979_v2, -inf }
 0xb15   : > { %7065 = vrcp.f32 %v4377_v50  ;;  %v8983_v47 = vpop.f32.mrf.mxu0  ;;  %4886 = vmax.xlane.f32.xlu0 %v4885_v39 }
 0xb16   : > { %v4897_v27 = vsel %vm1048_vm8, %v8983_v47, -inf  ;;  %7067 = vrcp.f32 %v4380_v43 }
 0xb17   : > { %4898 = vmax.xlane.f32.xlu1 %v4897_v27  ;;  %v8989_v30 = vpop.f32.mrf.mxu0 }
 0xb18   : > { %v4383_v37 = vpop.xlane.xlu0 %4382  ;;  %v4894_v15 = vsel %vm1048_vm8, %v8989_v30, -inf }
 0xb19   : > { %4889 = vmax.xlane.f32.xlu0 %v4888_v40  ;;  %7069 = vrcp.f32 %v4383_v37 }
 0xb1c   : > { %v4386_v25 = vpop.xlane.xlu1 %4385 }
 0xb1d   : > { %4895 = vmax.xlane.f32.xlu0 %v4894_v15  ;;  %7071 = vrcp.f32 %v4386_v25 }
 0xb20   : > { %v4392_v49 = vpop.xlane.xlu1 %4391  ;;  %v4389_v5 = vpop.xlane.xlu0 %4388 }
 0xb21   : > { %7073 = vrcp.f32 %v4389_v5 }
 0xb22   : > { %v7066_v13 = vpop.eup %7065  ;;  %7075 = vrcp.f32 %v4392_v49 }
 0xb23   : > { %v4407_v8 = vmul.f32 %v7066_v13, %v8898_v23  ;;  %v7068_v45 = vpop.eup %7067 }
 0xb24   : > { %v4398_v46 = vpop.xlane.xlu1 %4397  ;;  %v4395_v17 = vpop.xlane.xlu0 %4394  ;;  %v4408_v52 = vmul.f32 %v7068_v45, %v8893_v51 }
 0xb25   : > { %6659 = vmatprep.mubr.msk.f32.mxu1 %vm1048_vm8, %v4407_v8  ;;  %7077 = vrcp.f32 %v4395_v17 }
 0xb26   : > { %7079 = vrcp.f32 %v4398_v46  ;;  %v7070_v0 = vpop.eup %7069 }
 0xb27   : > { %v4409_v7 = vmul.f32 %v7070_v0, %v8902_v24 }
 0xb28   : > { %v4418_v48 = vpop.permute.xlu0 %4417  ;;  %4976 = vrot.lane.b32.xlu1 %v7723_v55, %s7331_s27  ;;  %v4416_v34 = vpop.permute.xlu1 %4415 }
 0xb29   : > { %6655 = vmatprep.subr.mxu1 %v4418_v48 }
 0xb2a   : > { %6656 = vmatpush3.msra.mxu1 %v4418_v48  ;;  %v7072_v23 = vpop.eup %7071 }
 0xb2b   : > { %6657 = vmatprep.subr.mxu1 %v4416_v34  ;;  %v4410_v10 = vmul.f32 %v7072_v23, %v8912_v42 }
 0xb2c   : > { %6658 = vmatpush3.msra.mxu1 %v4416_v34  ;;  %4974 = vrot.lane.b32.xlu1 %v7721_v54, %s7331_s27 }
 0xb2d   : > { %6660 = vmatmul.mubr.msk.f32.vlgmr.msra.gmra.mxu1 %vm1048_vm8, %v4408_v52  ;;  %6671 = vmatprep.subr.mxu1 %v4569_v4 }
 0xb2e   : > { %6662 = vmatprep.mubr.msk.f32.mxu1 %vm1048_vm8, %v4409_v7  ;;  %6672 = vmatpush3.msra.mxu1 %v4569_v4  ;;  %v7074_v55 = vpop.eup %7073 }
 0xb2f   : > { %6673 = vmatprep.subr.mxu1 %v4568_v9  ;;  %v7076_v51 = vpop.eup %7075  ;;  %v4411_v11 = vmul.f32 %v7074_v55, %v8924_v6 }
 0xb30   : > { %4972 = vrot.lane.b32.xlu1 %v7729_v58, %s7331_s27  ;;  %6674 = vmatpush3.msra.mxu1 %v4568_v9  ;;  %v4412_v24 = vmul.f32 %v7076_v51, %v8919_v1 }
 0xb31   : > { %6663 = vmatmul.mubr.msk.f32.gmra.mxu1 %vm1048_vm8, %v4410_v10 }
 0xb32   : > { %6665 = vmatprep.mubr.msk.f32.mxu1 %vm1048_vm8, %v4411_v11  ;;  %v7078_v54 = vpop.eup %7077 }
 0xb33   : > { %4978 = vrot.lane.b32.xlu0 %v7695_v38, %s7331_s27  ;;  %v7080_v12 = vpop.eup %7079  ;;  %v4413_v42 = vmul.f32 %v7078_v54, %v8938_v44 }
 0xb34   : > { %4968 = vrot.lane.b32.xlu1 %v7737_v60, %s7331_s27  ;;  %v4414_v58 = vmul.f32 %v7080_v12, %v8933_v56  ;;  %v3607_v12 = vadd.f32 %v8951_v41, %v8755_v36 }
 0xb35   : > { %6666 = vmatmul.mubr.msk.f32.gmra.mxu1 %vm1048_vm8, %v4412_v24 }
 0xb36   : > { %6668 = vmatprep.mubr.msk.f32.mxu1 %vm1048_vm8, %v4413_v42 }
 0xb37   : > { %4970 = vrot.lane.b32.xlu0 %v7733_v59, %s7331_s27 }
 0xb39   : > { %6669 = vmatmul.mubr.msk.f32.gmra.mxu1 %vm1048_vm8, %v4414_v58 }
 0xb94   : > { %v4881_v38 = vpop.xlane.xlu1 %4880 }
 0xb95   : > { %v4901_v1 = vsub.f32 %v8961_v26, %v4881_v38 }
 0xb96   : > { %v4878_v6 = vpop.xlane.xlu0 %4877 }
 0xb97   : > { %v4910_v3 = vmul.f32 1.442695, %v4901_v1  ;;  %v4900_v60 = vsub.f32 %v8965_v16, %v4878_v6 }
 0xb99   : > { %7081 = vpow2.f32 %v4910_v3  ;;  %v4908_v44 = vmul.f32 1.442695, %v4900_v60 }
 0xb9a   : > { %v4884_v53 = vpop.xlane.xlu0 %4883 }
 0xb9b   : > { %7083 = vpow2.f32 %v4908_v44  ;;  %v4902_v14 = vsub.f32 %v8971_v20, %v4884_v53 }
 0xb9c   : > { %v4893_v28 = vpop.xlane.xlu1 %4892 }
 0xb9d   : > { %v4912_v33 = vmul.f32 1.442695, %v4902_v14  ;;  %v4905_v59 = vsub.f32 %v8975_v21, %v4893_v28 }
 0xb9e   : > { %v4887_v56 = vpop.xlane.xlu0 %4886 }
 0xb9f   : > { %7085 = vpow2.f32 %v4912_v33  ;;  %v4903_v19 = vsub.f32 %v8969_v18, %v4887_v56  ;;  %v4918_v26 = vmul.f32 1.442695, %v4905_v59 }
 0xba0   : > { %v4899_v50 = vpop.xlane.xlu1 %4898 }
 0xba1   : > { %v4914_v39 = vmul.f32 1.442695, %v4903_v19  ;;  %v4907_v27 = vsub.f32 %v8983_v47, %v4899_v50 }
 0xba2   : > { %v4890_v16 = vpop.xlane.xlu0 %4889 }
 0xba3   : > { %7087 = vpow2.f32 %v4914_v39  ;;  %v4904_v43 = vsub.f32 %v8979_v2, %v4890_v16  ;;  %v4922_v40 = vmul.f32 1.442695, %v4907_v27 }
 0xba4   : > { %7089 = vpow2.f32 %v4918_v26 }
 0xba5   : > { %v4916_v20 = vmul.f32 1.442695, %v4904_v43 }
 0xba6   : > { %v9028_v37 = vpop.eup %7081  ;;  %v4896_v15 = vpop.xlane.xlu0 %4895 }
 0xba7   : > { %7091 = vpow2.f32 %v4916_v20  ;;  %v4906_v21 = vsub.f32 %v8989_v30, %v4896_v15  ;;  %v4927_v18 = vsel %vm1048_vm8, %v9028_v37, 0.0  ;;  %v5118_v15 = vld [vmem:[#allocation11 + $0x78] sm:$0xff] }
 0xba8   : > { %v9033_v25 = vpop.eup %7083  ;;  %4928 = vadd.xlane.f32.xlu1 %v4927_v18  ;;  %7093 = vpow2.f32 %v4922_v40 }
 0xba9   : > { %v4920_v47 = vmul.f32 1.442695, %v4906_v21  ;;  %v4924_v2 = vsel %vm1048_vm8, %v9033_v25, 0.0 }
 0xbaa   : > { %4925 = vadd.xlane.f32.xlu0 %v4924_v2  ;;  %v4979_v49 = vpop.permute.xlu0 %4978 }
 0xbab   : > { %7095 = vpow2.f32 %v4920_v47  ;;  %6715 = vmatprep.subr.mxu1 %v4979_v49  ;;  %v5117_v47 = vld [vmem:[#allocation11 + $0x70] sm:$0xff] }
 0xbac   : > { %v9037_v5 = vpop.eup %7085 }
 0xbad   : > { %v6605_v13 = vpop.f32.mrf.mxu1  ;;  %v4930_v30 = vsel %vm1048_vm8, %v9037_v5, 0.0 }
 0xbae   : > { %v9042_v8 = vadd.f32 %v6605_v13, %v8905_v31  ;;  %4931 = vadd.xlane.f32.xlu0 %v4930_v30  ;;  %v4971_v3 = vpop.permute.xlu0 %4970 }
 0xbaf   : > { %v4111_v46 = vpop.f32.mrf.mxu1 }
 0xbb0   : > { %v9044_v17 = vpop.eup %7087  ;;  %v9047_v45 = vadd.f32 %v4111_v46, %v8910_v35 }
 0xbb1   : > { %v6608_v48 = vpop.f32.mrf.mxu1  ;;  %v4933_v0 = vsel %vm1048_vm8, %v9044_v17, 0.0  ;;  %v9051_v34 = vpop.eup %7089 }
 0xbb2   : > { %v9054_v4 = vadd.f32 %v6608_v48, %v8915_v22  ;;  %4934 = vadd.xlane.f32.xlu1 %v4933_v0  ;;  %v4939_v35 = vsel %vm1048_vm8, %v9051_v34, 0.0 }
 0xbb3   : > { %v4121_v52 = vpop.f32.mrf.mxu1 }
 0xbb4   : > { %v9056_v31 = vpop.eup %7091  ;;  %v9059_v23 = vadd.f32 %v4121_v52, %v8922_v57 }
 0xbb5   : > { %v6611_v7 = vpop.f32.mrf.mxu1  ;;  %v4936_v9 = vsel %vm1048_vm8, %v9056_v31, 0.0  ;;  %v9065_v55 = vpop.eup %7093 }
 0xbb6   : > { %v9068_v10 = vadd.f32 %v6611_v7, %v8927_v32  ;;  %4940 = vadd.xlane.f32.xlu1 %v4939_v35  ;;  %4937 = vadd.xlane.f32.xlu0 %v4936_v9  ;;  %v4945_v54 = vsel %vm1048_vm8, %v9065_v55, 0.0 }
 0xbb7   : > { %v4131_v22 = vpop.f32.mrf.mxu1 }
 0xbb8   : > { %v9070_v51 = vpop.eup %7095  ;;  %v9073_v57 = vadd.f32 %v4131_v22, %v8936_v29  ;;  %v4977_v29 = vpop.permute.xlu1 %4976 }
 0xbb9   : > { %v6614_v11 = vpop.f32.mrf.mxu1  ;;  %v4942_v24 = vsel %vm1048_vm8, %v9070_v51, 0.0 }
 0xbba   : > { %v9082_v32 = vadd.f32 %v6614_v11, %v8941_v63  ;;  %4946 = vadd.xlane.f32.xlu1 %v4945_v54  ;;  %4943 = vadd.xlane.f32.xlu0 %v4942_v24 }
 0xbbb   : > { %v4141_v42 = vpop.f32.mrf.mxu1 }
 0xbbc   : > { %v9084_v58 = vadd.f32 %v4141_v42, %v3607_v12  ;;  %v4975_v1 = vpop.permute.xlu1 %4974 }
 0xbc0   : > { %v4973_v41 = vpop.permute.xlu1 %4972 }
 0xbc4   : > { %v4969_v44 = vpop.permute.xlu1 %4968 }
 0xbcb   : > { %4964 = vrot.lane.b32.xlu1 %v7745_v62, %s7331_s27 }
 0xbd0   : > { %4966 = vrot.lane.b32.xlu0 %v7741_v61, %s7331_s27 }
 0xbed   : > { %v6661_v38 = vpop.f32.mrf.mxu1 }
 0xbef   : > { %v4529_v6 = vpop.f32.mrf.mxu1 }
 0xbf0   : > { %6675 = vmatprep.mubr.msk.f32.mxu1 %vm894_vm7, %v4529_v6 }
 0xbf1   : > { %v6664_v36 = vpop.f32.mrf.mxu1  ;;  %6676 = vmatmul.mubr.msk.f32.vlgmr.msra.gmra.mxu1 %vm894_vm7, %v6661_v38 }
 0xbf2   : > { %6716 = vmatpush3.msra.mxu1 %v4979_v49 }
 0xbf3   : > { %6717 = vmatprep.subr.mxu1 %v4977_v29  ;;  %v4539_v63 = vpop.f32.mrf.mxu1 }
 0xbf4   : > { %6718 = vmatpush3.msra.mxu1 %v4977_v29  ;;  %6678 = vmatprep.mubr.msk.f32.mxu1 %vm894_vm7, %v4539_v63 }
 0xbf5   : > { %6719 = vmatprep.subr.mxu1 %v4975_v1  ;;  %v6667_v62 = vpop.f32.mrf.mxu1  ;;  %6679 = vmatmul.mubr.msk.f32.gmra.mxu1 %vm894_vm7, %v6664_v36 }
 0xbf6   : > { %6720 = vmatpush3.msra.mxu1 %v4975_v1 }
 0xbf7   : > { %6721 = vmatprep.subr.mxu1 %v4973_v41  ;;  %v4549_v61 = vpop.f32.mrf.mxu1 }
 0xbf8   : > { %6722 = vmatpush3.msra.mxu1 %v4973_v41  ;;  %6681 = vmatprep.mubr.msk.f32.mxu1 %vm894_vm7, %v4549_v61 }
 0xbf9   : > { %6723 = vmatprep.subr.mxu1 %v4971_v3  ;;  %v6670_v60 = vpop.f32.mrf.mxu1  ;;  %6682 = vmatmul.mubr.msk.f32.gmra.mxu1 %vm894_vm7, %v6667_v62 }
 0xbfa   : > { %6724 = vmatpush3.msra.mxu1 %v4971_v3 }
 0xbfb   : > { %6725 = vmatprep.subr.mxu1 %v4969_v44  ;;  %v4559_v53 = vpop.f32.mrf.mxu1 }
 0xbfc   : > { %6726 = vmatpush3.msra.mxu1 %v4969_v44  ;;  %6684 = vmatprep.mubr.msk.f32.mxu1 %vm894_vm7, %v4559_v53 }
 0xbfd   : > { %6685 = vmatmul.mubr.msk.f32.gmra.mxu1 %vm894_vm7, %v6670_v60 }
 0xc31   : > { %v4929_v28 = vpop.xlane.xlu1 %4928 }
 0xc33   : > { %v4926_v14 = vpop.xlane.xlu0 %4925 }
 0xc34   : > { %7097 = vrcp.f32 %v4926_v14 }
 0xc35   : > { %7099 = vrcp.f32 %v4929_v28 }
 0xc37   : > { %v4932_v33 = vpop.xlane.xlu0 %4931 }
 0xc38   : > { %7101 = vrcp.f32 %v4932_v33 }
 0xc3b   : > { %v4935_v59 = vpop.xlane.xlu1 %4934 }
 0xc3c   : > { %7103 = vrcp.f32 %v4935_v59 }
 0xc3f   : > { %v4941_v56 = vpop.xlane.xlu1 %4940  ;;  %v4938_v19 = vpop.xlane.xlu0 %4937 }
 0xc40   : > { %7105 = vrcp.f32 %v4938_v19 }
 0xc41   : > { %v7098_v50 = vpop.eup %7097  ;;  %7107 = vrcp.f32 %v4941_v56 }
 0xc42   : > { %v4956_v26 = vmul.f32 %v7098_v50, %v9033_v25  ;;  %v7100_v16 = vpop.eup %7099 }
 0xc43   : > { %v4947_v39 = vpop.xlane.xlu1 %4946  ;;  %v4944_v27 = vpop.xlane.xlu0 %4943  ;;  %v4957_v21 = vmul.f32 %v7100_v16, %v9028_v37 }
 0xc44   : > { %6731 = vmatprep.mubr.msk.f32.mxu1 %vm1048_vm8, %v4956_v26  ;;  %7109 = vrcp.f32 %v4944_v27 }
 0xc45   : > { %7111 = vrcp.f32 %v4947_v39  ;;  %v7102_v40 = vpop.eup %7101 }
 0xc46   : > { %v4958_v25 = vmul.f32 %v7102_v40, %v9037_v5 }
 0xc47   : > { %v4967_v43 = vpop.permute.xlu0 %4966  ;;  %v4965_v20 = vpop.permute.xlu1 %4964 }
 0xc48   : > { %6727 = vmatprep.subr.mxu1 %v4967_v43 }
 0xc49   : > { %6728 = vmatpush3.msra.mxu1 %v4967_v43  ;;  %v7104_v18 = vpop.eup %7103 }
 0xc4a   : > { %6729 = vmatprep.subr.mxu1 %v4965_v20  ;;  %v4959_v49 = vmul.f32 %v7104_v18, %v9044_v17 }
 0xc4b   : > { %6730 = vmatpush3.msra.mxu1 %v4965_v20 }
 0xc4c   : > { %6732 = vmatmul.mubr.msk.f32.vlgmr.msra.gmra.mxu1 %vm1048_vm8, %v4957_v21  ;;  %6743 = vmatprep.subr.mxu1 %v5118_v15 }
 0xc4d   : > { %6734 = vmatprep.mubr.msk.f32.mxu1 %vm1048_vm8, %v4958_v25  ;;  %6744 = vmatpush3.msra.mxu1 %v5118_v15  ;;  %v7106_v2 = vpop.eup %7105 }
 0xc4e   : > { %6745 = vmatprep.subr.mxu1 %v5117_v47  ;;  %v7108_v13 = vpop.eup %7107  ;;  %v4960_v30 = vmul.f32 %v7106_v2, %v9056_v31 }
 0xc4f   : > { %6746 = vmatpush3.msra.mxu1 %v5117_v47  ;;  %v4961_v5 = vmul.f32 %v7108_v13, %v9051_v34 }
 0xc50   : > { %6735 = vmatmul.mubr.msk.f32.gmra.mxu1 %vm1048_vm8, %v4959_v49 }
 0xc51   : > { %6737 = vmatprep.mubr.msk.f32.mxu1 %vm1048_vm8, %v4960_v30  ;;  %v7110_v37 = vpop.eup %7109 }
 0xc52   : > { %v7112_v46 = vpop.eup %7111  ;;  %v4962_v48 = vmul.f32 %v7110_v37, %v9070_v51 }
 0xc53   : > { %v4963_v17 = vmul.f32 %v7112_v46, %v9065_v55 }
 0xc54   : > { %6738 = vmatmul.mubr.msk.f32.gmra.mxu1 %vm1048_vm8, %v4961_v5 }
 0xc55   : > { %6740 = vmatprep.mubr.msk.f32.mxu1 %vm1048_vm8, %v4962_v48 }
 0xc58   : > { %6741 = vmatmul.mubr.msk.f32.gmra.mxu1 %vm1048_vm8, %v4963_v17 }
 0xcb1   : > { %v6677_v0 = vpop.f32.mrf.mxu1 }
 0xcb2   : > { %v4700_v52 = vadd.f32 %v6677_v0, %v9042_v8 }
 0xcb3   : > { %v4660_v31 = vpop.f32.mrf.mxu1 }
 0xcb4   : > { %v4699_v7 = vadd.f32 %v4660_v31, %v9047_v45 }
 0xcb5   : > { %v6680_v35 = vpop.f32.mrf.mxu1 }
 0xcb6   : > { %v4702_v34 = vadd.f32 %v6680_v35, %v9054_v4 }
 0xcb7   : > { %v4670_v9 = vpop.f32.mrf.mxu1 }
 0xcb8   : > { %v4701_v22 = vadd.f32 %v4670_v9, %v9059_v23 }
 0xcb9   : > { %v6683_v51 = vpop.f32.mrf.mxu1 }
 0xcba   : > { %v4704_v11 = vadd.f32 %v6683_v51, %v9068_v10 }
 0xcbb   : > { %v4680_v54 = vpop.f32.mrf.mxu1 }
 0xcbc   : > { %v4703_v55 = vadd.f32 %v4680_v54, %v9073_v57 }
 0xcbd   : > { %v6686_v24 = vpop.f32.mrf.mxu1 }
 0xcbe   : > { %v4706_v12 = vadd.f32 %v6686_v24, %v9082_v32 }
 0xcbf   : > { %v4690_v42 = vpop.f32.mrf.mxu1 }
 0xcc0   : > { %v4705_v28 = vadd.f32 %v4690_v42, %v9084_v58 }
 0xd0c   : > { %v6733_v8 = vpop.f32.mrf.mxu1 }
 0xd0e   : > { %v5078_v29 = vpop.f32.mrf.mxu1 }
 0xd0f   : > { %6747 = vmatprep.mubr.msk.f32.mxu1 %vm894_vm7, %v5078_v29 }
 0xd10   : > { %v6736_v45 = vpop.f32.mrf.mxu1  ;;  %6748 = vmatmul.mubr.msk.f32.vlgmr.msra.gmra.mxu1 %vm894_vm7, %v6733_v8 }
 0xd12   : > { %v5088_v4 = vpop.f32.mrf.mxu1 }
 0xd13   : > { %6750 = vmatprep.mubr.msk.f32.mxu1 %vm894_vm7, %v5088_v4 }
 0xd14   : > { %v6739_v23 = vpop.f32.mrf.mxu1  ;;  %6751 = vmatmul.mubr.msk.f32.gmra.mxu1 %vm894_vm7, %v6736_v45 }
 0xd16   : > { %v5098_v10 = vpop.f32.mrf.mxu1 }
 0xd17   : > { %6753 = vmatprep.mubr.msk.f32.mxu1 %vm894_vm7, %v5098_v10 }
 0xd18   : > { %v6742_v57 = vpop.f32.mrf.mxu1  ;;  %6754 = vmatmul.mubr.msk.f32.gmra.mxu1 %vm894_vm7, %v6739_v23 }
 0xd1a   : > { %v5108_v32 = vpop.f32.mrf.mxu1 }
 0xd1b   : > { %6756 = vmatprep.mubr.msk.f32.mxu1 %vm894_vm7, %v5108_v32 }
 0xd1c   : > { %6757 = vmatmul.mubr.msk.f32.gmra.mxu1 %vm894_vm7, %v6742_v57 }
 0xdd0   : > { %v6749_v38 = vpop.f32.mrf.mxu1 }
 0xdd1   : > { %v5249_v1 = vadd.f32 %v6749_v38, %v4700_v52 }
 0xdd2   : > { %v5209_v6 = vpop.f32.mrf.mxu1 }
 0xdd3   : > { %5257 = vst [vmem:[#allocation12 + $0x8] sm:$0xff] %v5249_v1  ;;  %v5248_v36 = vadd.f32 %v5209_v6, %v4699_v7 }
 0xdd4   : > { %v6752_v63 = vpop.f32.mrf.mxu1 }
 0xdd5   : > { %5256 = vst [vmem:[#allocation12] sm:$0xff] %v5248_v36  ;;  %v5251_v41 = vadd.f32 %v6752_v63, %v4702_v34 }
 0xdd6   : > { %v5219_v62 = vpop.f32.mrf.mxu1 }
 0xdd7   : > { %5259 = vst [vmem:[#allocation12 + $0x18] sm:$0xff] %v5251_v41  ;;  %v5250_v61 = vadd.f32 %v5219_v62, %v4701_v22 }
 0xdd8   : > { %v6755_v3 = vpop.f32.mrf.mxu1 }
 0xdd9   : > { %5258 = vst [vmem:[#allocation12 + $0x10] sm:$0xff] %v5250_v61  ;;  %v5253_v60 = vadd.f32 %v6755_v3, %v4704_v11 }
 0xdda   : > { %v5229_v44 = vpop.f32.mrf.mxu1 }
 0xddb   : > { %5261 = vst [vmem:[#allocation12 + $0x28] sm:$0xff] %v5253_v60  ;;  %v5252_v53 = vadd.f32 %v5229_v44, %v4703_v55 }
 0xddc   : > { %v6758_v14 = vpop.f32.mrf.mxu1 }
 0xddd   : > { %5260 = vst [vmem:[#allocation12 + $0x20] sm:$0xff] %v5252_v53  ;;  %v5255_v33 = vadd.f32 %v6758_v14, %v4706_v12 }
 0xdde   : > { %v5239_v59 = vpop.f32.mrf.mxu1 }
 0xddf   : > { %5263 = vst [vmem:[#allocation12 + $0x38] sm:$0xff] %v5255_v33  ;;  %v5254_v56 = vadd.f32 %v5239_v59, %v4705_v28 }
 0xde1   : > { %5262 = vst [vmem:[#allocation12 + $0x30] sm:$0xff] %v5254_v56 }
 0xde2 PF: > { %p6807_p8 = scmp.eq.s32.totalorder %s7394_s28, 3  ;;  %s7332_s14 = smov [#allocation12]  }
 0xde3   : > { %s5270_s10 = sshll.u32 %s7332_s14, 4  ;;  %s5271_s10 = int_to_ptr.vmem [resolvable:$true] %s5270_s10 }
 0xde4   : > { %s7246_s18 = scalar_lea.vmem %s5271_s10, 1024  ;;  %p7253_p13 = scmp.lt.s32.totalorder %s5271_s10, %s5271_s10 }
 0xde5   : > { %p7247_p10 = scmp.ne.s32.totalorder %s5271_s10, %s7246_s18  ;;  %p7254_p0 = scmp.lt.s32.totalorder %s7246_s18, %s7246_s18 }
 0xde7   : > { %p7248_p11 = pnand %p7247_p10, %p6807_p8  ;;  %p7255_p3 = por %p7254_p0, %p7253_p13 }
 0xde9   : > { %p7249_p12 = pneg %p7248_p11 }
 0xdeb   : > { %p7256_p2 = pnand %p7255_p3, %p7249_p12 }
 0xded   : > { %7259 = shalt.err (!%p7256_p2)
}
 0xdee   : > { %s7333_s29 = smov 128   ;;  %s7334_s30 = smov 8  }
 0xdef   : > { %6778 = dma.vmem_to_hbm [thread:$0]  (%p6807_p8), %s5271_s10, 1024, %s9162_s7, [#allocation5], %s7333_s29, %s7333_s29, %s7334_s30  }
 0xdf0   : > { %7299 = dma.done.wait (%p6807_p8), [#allocation5], 1024  }
 0xdf1   : > { %7301 = vsyncadd (%p6807_p8), [#allocation5], 4294966272 }
 0xdf2 PF: > { %p20_p1 = scmp.ge.s32.totalorder %s7465_s15, 6   ;;  %s9178_s24 = smov %s7308_s25 }
 0xdf3   : > { %s9179_s25 = smov %s7312_s26  ;;  %s9180_s26 = smov %s7476_s20 }
 0xdf4   : > { %s9181_s27 = smov %s7465_s15  ;;  %22 = sbr.rel (!%p20_p1) target bundleno = 6 (0x6), region = 106 }
 0xdf9   :  { %5286 = vsyncpa [#allocation4], 1 }
 0xdfa   :  { %5288 = vsyncpa [#allocation4 + $0x1], 1 }
 0xdfb   :  { %5289 = vsyncpa [#allocation7], 1 }
 0xdfc   :  { %5290 = vsyncpa [#allocation10], 1 }
 0xdfd   :  { %5291 = vsyncpa [#allocation5], 1 }
 0xdfe   :  { %5293 = vsyncpa [#allocation5 + $0x1], 1 }

</bundles_post_ra>
